<compile_context>
chip_gen: v6e
topology: v6e:2x2x1
jax: 0.10.0
libtpu: 0.0.40
codegen_flags: <defaults>
</compile_context>

<pallas_src>
import functools

import jax
import jax.numpy as jnp
import numpy as np
from jax.experimental import pallas as pl
from jax.experimental.pallas import tpu as pltpu

_LANE_BATCH = 8   # batch elements per grid step (f32 sublane count)
_ROW_CHUNK = 8    # DP rows whose costs are produced by one MXU matmul


def _shift_right_lanes(v, s, fill):
    """w[:, j] = v[:, j - s] for j >= s, else `fill` (static shift s)."""
    tb, length = v.shape
    pad = jnp.full((tb, s), fill, v.dtype)
    return jnp.concatenate([pad, v[:, :length - s]], axis=1)


def _cumsum_lanes(v):
    """Inclusive prefix-sum along the lane axis (Hillis-Steele, log2 steps)."""
    s = 1
    while s < v.shape[-1]:
        v = v + _shift_right_lanes(v, s, 0.0)
        s *= 2
    return v


def _cummin_lanes(v):
    """Inclusive prefix-min along the lane axis (Hillis-Steele, log2 steps)."""
    s = 1
    while s < v.shape[-1]:
        v = jnp.minimum(v, _shift_right_lanes(v, s, jnp.inf))
        s *= 2
    return v


def _dtw_kernel(x_ref, y_ref, o_ref, prev_ref, cost_ref, *,
                n_rows, m, rt, normalize, matmul_dtype):
    tb = prev_ref.shape[0]
    c = pl.program_id(1)
    inf = jnp.float32(jnp.inf)

    # New batch tile: reset the DP row carry to D[0, 1..M] = +inf.
    @pl.when(c == 0)
    def _init():
        prev_ref[...] = jnp.full((tb, m), inf, jnp.float32)

    # ---- cost rows for this chunk: one batched MXU matmul -------------------
    # Features were augmented in the wrapper so that
    #   <xa[b, i, :], ya[b, j, :]> = ||x_i||^2 + ||y_j||^2 - 2 <x_i, y_j>.
    xa = x_ref[...]                                            # (tb, rt, F+2)
    ya = y_ref[...]                                            # (tb, M,  F+2)
    if matmul_dtype is not None:                               # opt-in bf16 MXU
        xa = xa.astype(matmul_dtype)
        ya = ya.astype(matmul_dtype)
    d2 = jnp.einsum("brf,bmf->brm", xa, ya,
                    preferred_element_type=jnp.float32)        # (tb, rt, m)
    cost_ref[...] = jnp.sqrt(jnp.maximum(d2, 0.0))

    # ---- DP: rt rows; within-row dependency solved by cumsum+cummin scans ---
    prev = prev_ref[...]                                       # D[i-1, 1..M]
    has_row_padding = (n_rows % rt) != 0
    for r in range(rt):                                        # static unroll
        i0 = c * rt + r                                        # 0-based row
        crow = cost_ref[:, r, :]                               # (tb, m)
        # D[i-1, 0] is 0 only for the very first DP row, +inf afterwards.
        corner = jnp.where(i0 == 0, jnp.float32(0.0), inf)
        if m > 1:
            prev_shift = jnp.concatenate(
                [jnp.broadcast_to(corner, (tb, 1)), prev[:, :m - 1]], axis=1)
        else:
            prev_shift = jnp.broadcast_to(corner, (tb, 1))
        # base[j] = cost[i-1, j] + min(D[i-1, j+1], D[i-1, j])   (0-based j)
        base = crow + jnp.minimum(prev, prev_shift)
        # D[i, j] = min(base[j], cost[i-1, j] + D[i, j-1])
        #         = min_{k<=j}(base[k] - S[k]) + S[j],  S = cumsum(cost row)
        s = _cumsum_lanes(crow)
        new_row = _cummin_lanes(base - s) + s
        if has_row_padding:
            new_row = jnp.where(i0 < n_rows, new_row, prev)    # skip pad rows
        prev = new_row
    prev_ref[...] = prev

    # ---- last chunk: emit D[N, M] (optionally normalized) -------------------
    @pl.when(c == pl.num_programs(1) - 1)
    def _finalize():
        dist = prev_ref[:, m - 1:m]                            # (tb, 1)
        if normalize:
            dist = dist / jnp.float32(n_rows + m)
        o_ref[...] = dist


def dtw_pallas(x, y=None, *, normalize=False, matmul_dtype=None,
               batch_block=_LANE_BATCH, row_chunk=_ROW_CHUNK):
    """Pallas DTW. x: (B, N, F) or (N, F); y: same-style or None (=> y = x)."""
    squeeze = x.ndim == 2
    if squeeze:
        x = x[None]
    if y is None:
        y = x
    elif y.ndim == 2:
        y = jnp.broadcast_to(y[None], (x.shape[0],) + y.shape)

    x = jnp.asarray(x, jnp.float32)
    y = jnp.asarray(y, jnp.float32)
    B, N, F = x.shape
    By, M, Fy = y.shape
    assert By == B and Fy == F

    tb = batch_block
    rt = row_chunk
    b_pad = ((B + tb - 1) // tb) * tb
    n_pad = ((N + rt - 1) // rt) * rt
    n_chunks = n_pad // rt

    # Augment features so the squared cdist is a single matmul:
    #   <xa_i, ya_j> = ||x_i||^2 + ||y_j||^2 - 2 <x_i, y_j>
    x2 = jnp.sum(x * x, axis=-1, keepdims=True)
    y2 = jnp.sum(y * y, axis=-1, keepdims=True)
    xa = jnp.concatenate([-2.0 * x, x2, jnp.ones_like(x2)], axis=-1)
    ya = jnp.concatenate([y, jnp.ones_like(y2), y2], axis=-1)

    # Pad the batch to a multiple of the sublane tile and rows to the chunk.
    xa = jnp.pad(xa, ((0, b_pad - B), (0, n_pad - N), (0, 0)))
    ya = jnp.pad(ya, ((0, b_pad - B), (0, 0), (0, 0)))

    kernel = functools.partial(
        _dtw_kernel, n_rows=N, m=M, rt=rt, normalize=normalize,
        matmul_dtype=matmul_dtype)

    out = pl.pallas_call(
        kernel,
        out_shape=jax.ShapeDtypeStruct((b_pad, 1), jnp.float32),
        grid_spec=pltpu.PrefetchScalarGridSpec(
            num_scalar_prefetch=0,
            grid=(b_pad // tb, n_chunks),
            in_specs=[
                pl.BlockSpec((tb, rt, F + 2), lambda b, c: (b, c, 0)),
                pl.BlockSpec((tb, M, F + 2), lambda b, c: (b, 0, 0)),
            ],
            out_specs=pl.BlockSpec((tb, 1), lambda b, c: (b, 0)),
            scratch_shapes=[
                pltpu.VMEM((tb, M), jnp.float32),      # DP row carry D[i,1..M]
                pltpu.VMEM((tb, rt, M), jnp.float32),  # cost rows of the chunk
            ],
        ),
        compiler_params=pltpu.CompilerParams(
            dimension_semantics=("parallel", "arbitrary")),
    )(xa, ya)

    dist = out[:B, 0]
    if squeeze:
        dist = dist[0]
    return dist


def _dtw_reference(x, y, normalize=False):
    """Plain NumPy reference identical to the PyTorch module's forward."""
    x = np.asarray(x, np.float64)
    y = np.asarray(y, np.float64)
    B = x.shape[0]
    out = np.zeros(B, np.float64)
    for b in range(B):
        xb, yb = x[b], y[b]
        n, m = xb.shape[0], yb.shape[0]
        cost = np.sqrt(((xb[:, None, :] - yb[None, :, :]) ** 2).sum(-1))
        D = np.full((n + 1, m + 1), np.inf)
        D[0, 0] = 0.0
        for i in range(1, n + 1):
            for j in range(1, m + 1):
                D[i, j] = cost[i - 1, j - 1] + min(
                    D[i - 1, j], D[i, j - 1], D[i - 1, j - 1])
        d = D[n, m]
        if normalize:
            d = d / (n + m)
        out[b] = d
    return out


if __name__ == "__main__":
    key = jax.random.PRNGKey(0)
    kx, ky = jax.random.split(key)
    # Small shapes that exercise batch padding (3 -> 8), row padding (21 -> 24)
    # and a non-128 lane width (M = 17).
    B, N, M, F = 3, 21, 17, 5
    x = jax.random.normal(kx, (B, N, F), dtype=jnp.float32)
    y = jax.random.normal(ky, (B, M, F), dtype=jnp.float32)

    ref = _dtw_reference(np.asarray(x), np.asarray(y))

    dist = jax.block_until_ready(dtw_pallas(x, y))
    np.testing.assert_allclose(np.asarray(dist), ref, rtol=1e-4, atol=1e-4)

    dist_n = jax.block_until_ready(dtw_pallas(x, y, normalize=True))
    np.testing.assert_allclose(np.asarray(dist_n), ref / (N + M),
                               rtol=1e-4, atol=1e-4)

    # single-pair (2-D input) path
    d_pair = jax.block_until_ready(dtw_pallas(x[0], y[0]))
    np.testing.assert_allclose(np.asarray(d_pair), ref[0],
                               rtol=1e-4, atol=1e-4)

    # y=None path (x against itself): distances should be ~0
    d_self = jax.block_until_ready(dtw_pallas(x))
    np.testing.assert_allclose(np.asarray(d_self), np.zeros(B), atol=5e-2)

    print("KERNEL_OK")
</pallas_src>

<mosaic_0001>
module attributes {stable_mosaic.version = 11 : i64} {
  func.func @_dtw_kernel(%arg0: i32, %arg1: i32, %arg2: memref<8x8x7xf32, #tpu.memory_space<vmem>>, %arg3: memref<8x17x7xf32, #tpu.memory_space<vmem>>, %arg4: memref<8x1xf32, #tpu.memory_space<vmem>>, %arg5: memref<8x17xf32, #tpu.memory_space<vmem>>, %arg6: memref<8x8x17xf32, #tpu.memory_space<vmem>>) attributes {dimension_semantics = [#tpu.dimension_semantics<parallel>, #tpu.dimension_semantics<arbitrary>], iteration_bounds = array<i64: 1, 3>, scalar_prefetch = 0 : i64, scratch_operands = 2 : i64, tpu.core_type = #tpu.core_type<tc>, window_params = [{transform_indices = @transform_0, window_bounds = array<i64: 8, 8, 7>}, {transform_indices = @transform_1, window_bounds = array<i64: 8, 17, 7>}, {transform_indices = @transform_2, window_bounds = array<i64: 8, 1>}]} {
    %c0_i32 = arith.constant 0 : i32
    %0 = arith.cmpi eq, %arg1, %c0_i32 : i32
    %1 = arith.extui %0 : i1 to i32
    %cst = arith.constant 0x7F800000 : f32
    %c0_i32_0 = arith.constant 0 : i32
    %2 = arith.cmpi ne, %1, %c0_i32_0 : i32
    scf.if %2 {
      %455 = vector.broadcast %cst : f32 to vector<8x17xf32>
      %c0_153 = arith.constant 0 : index
      %c0_154 = arith.constant 0 : index
      %456 = vector.load %arg5[%c0_153, %c0_154] : memref<8x17xf32, #tpu.memory_space<vmem>>, vector<8x17xf32>
      tpu.vector_store %arg5[%c0_153, %c0_154], %455 {strides = array<i32>} : memref<8x17xf32, #tpu.memory_space<vmem>>, vector<8x17xf32>,
    } else {
    }
    %c0 = arith.constant 0 : index
    %c0_1 = arith.constant 0 : index
    %c0_2 = arith.constant 0 : index
    %3 = vector.load %arg2[%c0, %c0_1, %c0_2] : memref<8x8x7xf32, #tpu.memory_space<vmem>>, vector<8x8x7xf32>
    %c0_3 = arith.constant 0 : index
    %c0_4 = arith.constant 0 : index
    %c0_5 = arith.constant 0 : index
    %4 = vector.load %arg3[%c0_3, %c0_4, %c0_5] : memref<8x17x7xf32, #tpu.memory_space<vmem>>, vector<8x17x7xf32>
    "tpu.trace_start"() <{level = 10 : i32, message = "brf,bmf->brm"}> : () -> ()
    %cst_6 = arith.constant dense<0.000000e+00> : vector<8x8x17xf32>
    %5 = tpu.matmul %3, %4, %cst_6 {dimension_numbers = #tpu.dot_dimension_numbers<[2], [2], [1], [1], [0, 0, 0, 1, 1, 1], [0], [0]>} : vector<8x8x7xf32>, vector<8x17x7xf32>, vector<8x8x17xf32> -> vector<8x8x17xf32>
    "tpu.trace_stop"() : () -> ()
    %cst_7 = arith.constant 0.000000e+00 : f32
    %6 = vector.broadcast %cst_7 : f32 to vector<8x8x17xf32>
    %7 = arith.maximumf %5, %6 : vector<8x8x17xf32>
    %8 = math.sqrt %7 : vector<8x8x17xf32>
    %c0_8 = arith.constant 0 : index
    %c0_9 = arith.constant 0 : index
    %c0_10 = arith.constant 0 : index
    %9 = vector.load %arg6[%c0_8, %c0_9, %c0_10] : memref<8x8x17xf32, #tpu.memory_space<vmem>>, vector<8x8x17xf32>
    tpu.vector_store %arg6[%c0_8, %c0_9, %c0_10], %8 {strides = array<i32>} : memref<8x8x17xf32, #tpu.memory_space<vmem>>, vector<8x8x17xf32>,
    %c0_11 = arith.constant 0 : index
    %c0_12 = arith.constant 0 : index
    %10 = vector.load %arg5[%c0_11, %c0_12] : memref<8x17xf32, #tpu.memory_space<vmem>>, vector<8x17xf32>
    %c8_i32 = arith.constant 8 : i32
    %11 = arith.muli %arg1, %c8_i32 : i32
    %c0_i32_13 = arith.constant 0 : i32
    %12 = arith.addi %11, %c0_i32_13 : i32
    %c0_14 = arith.constant 0 : index
    %c0_15 = arith.constant 0 : index
    %c0_16 = arith.constant 0 : index
    %13 = vector.load %arg6[%c0_14, %c0_15, %c0_16] : memref<8x8x17xf32, #tpu.memory_space<vmem>>, vector<8x1x17xf32>
    %14 = vector.shape_cast %13 : vector<8x1x17xf32> to vector<8x17xf32>
    %c0_i32_17 = arith.constant 0 : i32
    %15 = arith.cmpi eq, %12, %c0_i32_17 : i32
    %cst_18 = arith.constant 0.000000e+00 : f32
    %cst_19 = arith.constant 0x7F800000 : f32
    %16 = arith.select %15, %cst_18, %cst_19 : f32
    %17 = vector.broadcast %16 : f32 to vector<8x1xf32>
    %18 = vector.extract_strided_slice %10 {offsets = [0, 0], sizes = [8, 16], strides = [1, 1]} : vector<8x17xf32> to vector<8x16xf32>
    %19 = tpu.concatenate %17, %18 in 1 : vector<8x1xf32>, vector<8x16xf32> -> vector<8x17xf32>
    %20 = arith.minimumf %10, %19 : vector<8x17xf32>
    %21 = arith.addf %14, %20 : vector<8x17xf32>
    %cst_20 = arith.constant 0.000000e+00 : f32
    %22 = vector.broadcast %cst_20 : f32 to vector<8x1xf32>
    %23 = vector.extract_strided_slice %14 {offsets = [0, 0], sizes = [8, 16], strides = [1, 1]} : vector<8x17xf32> to vector<8x16xf32>
    %24 = tpu.concatenate %22, %23 in 1 : vector<8x1xf32>, vector<8x16xf32> -> vector<8x17xf32>
    %25 = arith.addf %14, %24 : vector<8x17xf32>
    %cst_21 = arith.constant 0.000000e+00 : f32
    %26 = vector.broadcast %cst_21 : f32 to vector<8x2xf32>
    %27 = vector.extract_strided_slice %25 {offsets = [0, 0], sizes = [8, 15], strides = [1, 1]} : vector<8x17xf32> to vector<8x15xf32>
    %28 = tpu.concatenate %26, %27 in 1 : vector<8x2xf32>, vector<8x15xf32> -> vector<8x17xf32>
    %29 = arith.addf %25, %28 : vector<8x17xf32>
    %cst_22 = arith.constant 0.000000e+00 : f32
    %30 = vector.broadcast %cst_22 : f32 to vector<8x4xf32>
    %31 = vector.extract_strided_slice %29 {offsets = [0, 0], sizes = [8, 13], strides = [1, 1]} : vector<8x17xf32> to vector<8x13xf32>
    %32 = tpu.concatenate %30, %31 in 1 : vector<8x4xf32>, vector<8x13xf32> -> vector<8x17xf32>
    %33 = arith.addf %29, %32 : vector<8x17xf32>
    %cst_23 = arith.constant 0.000000e+00 : f32
    %34 = vector.broadcast %cst_23 : f32 to vector<8x8xf32>
    %35 = vector.extract_strided_slice %33 {offsets = [0, 0], sizes = [8, 9], strides = [1, 1]} : vector<8x17xf32> to vector<8x9xf32>
    %36 = tpu.concatenate %34, %35 in 1 : vector<8x8xf32>, vector<8x9xf32> -> vector<8x17xf32>
    %37 = arith.addf %33, %36 : vector<8x17xf32>
    %cst_24 = arith.constant 0.000000e+00 : f32
    %38 = vector.broadcast %cst_24 : f32 to vector<8x16xf32>
    %39 = vector.extract_strided_slice %37 {offsets = [0, 0], sizes = [8, 1], strides = [1, 1]} : vector<8x17xf32> to vector<8x1xf32>
    %40 = tpu.concatenate %38, %39 in 1 : vector<8x16xf32>, vector<8x1xf32> -> vector<8x17xf32>
    %41 = arith.addf %37, %40 : vector<8x17xf32>
    %42 = arith.subf %21, %41 : vector<8x17xf32>
    %cst_25 = arith.constant 0x7F800000 : f32
    %43 = vector.broadcast %cst_25 : f32 to vector<8x1xf32>
    %44 = vector.extract_strided_slice %42 {offsets = [0, 0], sizes = [8, 16], strides = [1, 1]} : vector<8x17xf32> to vector<8x16xf32>
    %45 = tpu.concatenate %43, %44 in 1 : vector<8x1xf32>, vector<8x16xf32> -> vector<8x17xf32>
    %46 = arith.minimumf %42, %45 : vector<8x17xf32>
    %cst_26 = arith.constant 0x7F800000 : f32
    %47 = vector.broadcast %cst_26 : f32 to vector<8x2xf32>
    %48 = vector.extract_strided_slice %46 {offsets = [0, 0], sizes = [8, 15], strides = [1, 1]} : vector<8x17xf32> to vector<8x15xf32>
    %49 = tpu.concatenate %47, %48 in 1 : vector<8x2xf32>, vector<8x15xf32> -> vector<8x17xf32>
    %50 = arith.minimumf %46, %49 : vector<8x17xf32>
    %cst_27 = arith.constant 0x7F800000 : f32
    %51 = vector.broadcast %cst_27 : f32 to vector<8x4xf32>
    %52 = vector.extract_strided_slice %50 {offsets = [0, 0], sizes = [8, 13], strides = [1, 1]} : vector<8x17xf32> to vector<8x13xf32>
    %53 = tpu.concatenate %51, %52 in 1 : vector<8x4xf32>, vector<8x13xf32> -> vector<8x17xf32>
    %54 = arith.minimumf %50, %53 : vector<8x17xf32>
    %cst_28 = arith.constant 0x7F800000 : f32
    %55 = vector.broadcast %cst_28 : f32 to vector<8x8xf32>
    %56 = vector.extract_strided_slice %54 {offsets = [0, 0], sizes = [8, 9], strides = [1, 1]} : vector<8x17xf32> to vector<8x9xf32>
    %57 = tpu.concatenate %55, %56 in 1 : vector<8x8xf32>, vector<8x9xf32> -> vector<8x17xf32>
    %58 = arith.minimumf %54, %57 : vector<8x17xf32>
    %cst_29 = arith.constant 0x7F800000 : f32
    %59 = vector.broadcast %cst_29 : f32 to vector<8x16xf32>
    %60 = vector.extract_strided_slice %58 {offsets = [0, 0], sizes = [8, 1], strides = [1, 1]} : vector<8x17xf32> to vector<8x1xf32>
    %61 = tpu.concatenate %59, %60 in 1 : vector<8x16xf32>, vector<8x1xf32> -> vector<8x17xf32>
    %62 = arith.minimumf %58, %61 : vector<8x17xf32>
    %63 = arith.addf %62, %41 : vector<8x17xf32>
    %c21_i32 = arith.constant 21 : i32
    %64 = arith.cmpi slt, %12, %c21_i32 : i32
    %65 = arith.select %64, %63, %10 : vector<8x17xf32>
    %c8_i32_30 = arith.constant 8 : i32
    %66 = arith.muli %arg1, %c8_i32_30 : i32
    %c1_i32 = arith.constant 1 : i32
    %67 = arith.addi %66, %c1_i32 : i32
    %c0_31 = arith.constant 0 : index
    %c1 = arith.constant 1 : index
    %c0_32 = arith.constant 0 : index
    %68 = vector.load %arg6[%c0_31, %c1, %c0_32] : memref<8x8x17xf32, #tpu.memory_space<vmem>>, vector<8x1x17xf32>
    %69 = vector.shape_cast %68 : vector<8x1x17xf32> to vector<8x17xf32>
    %c0_i32_33 = arith.constant 0 : i32
    %70 = arith.cmpi eq, %67, %c0_i32_33 : i32
    %cst_34 = arith.constant 0.000000e+00 : f32
    %cst_35 = arith.constant 0x7F800000 : f32
    %71 = arith.select %70, %cst_34, %cst_35 : f32
    %72 = vector.broadcast %71 : f32 to vector<8x1xf32>
    %73 = vector.extract_strided_slice %65 {offsets = [0, 0], sizes = [8, 16], strides = [1, 1]} : vector<8x17xf32> to vector<8x16xf32>
    %74 = tpu.concatenate %72, %73 in 1 : vector<8x1xf32>, vector<8x16xf32> -> vector<8x17xf32>
    %75 = arith.minimumf %65, %74 : vector<8x17xf32>
    %76 = arith.addf %69, %75 : vector<8x17xf32>
    %cst_36 = arith.constant 0.000000e+00 : f32
    %77 = vector.broadcast %cst_36 : f32 to vector<8x1xf32>
    %78 = vector.extract_strided_slice %69 {offsets = [0, 0], sizes = [8, 16], strides = [1, 1]} : vector<8x17xf32> to vector<8x16xf32>
    %79 = tpu.concatenate %77, %78 in 1 : vector<8x1xf32>, vector<8x16xf32> -> vector<8x17xf32>
    %80 = arith.addf %69, %79 : vector<8x17xf32>
    %cst_37 = arith.constant 0.000000e+00 : f32
    %81 = vector.broadcast %cst_37 : f32 to vector<8x2xf32>
    %82 = vector.extract_strided_slice %80 {offsets = [0, 0], sizes = [8, 15], strides = [1, 1]} : vector<8x17xf32> to vector<8x15xf32>
    %83 = tpu.concatenate %81, %82 in 1 : vector<8x2xf32>, vector<8x15xf32> -> vector<8x17xf32>
    %84 = arith.addf %80, %83 : vector<8x17xf32>
    %cst_38 = arith.constant 0.000000e+00 : f32
    %85 = vector.broadcast %cst_38 : f32 to vector<8x4xf32>
    %86 = vector.extract_strided_slice %84 {offsets = [0, 0], sizes = [8, 13], strides = [1, 1]} : vector<8x17xf32> to vector<8x13xf32>
    %87 = tpu.concatenate %85, %86 in 1 : vector<8x4xf32>, vector<8x13xf32> -> vector<8x17xf32>
    %88 = arith.addf %84, %87 : vector<8x17xf32>
    %cst_39 = arith.constant 0.000000e+00 : f32
    %89 = vector.broadcast %cst_39 : f32 to vector<8x8xf32>
    %90 = vector.extract_strided_slice %88 {offsets = [0, 0], sizes = [8, 9], strides = [1, 1]} : vector<8x17xf32> to vector<8x9xf32>
    %91 = tpu.concatenate %89, %90 in 1 : vector<8x8xf32>, vector<8x9xf32> -> vector<8x17xf32>
    %92 = arith.addf %88, %91 : vector<8x17xf32>
    %cst_40 = arith.constant 0.000000e+00 : f32
    %93 = vector.broadcast %cst_40 : f32 to vector<8x16xf32>
    %94 = vector.extract_strided_slice %92 {offsets = [0, 0], sizes = [8, 1], strides = [1, 1]} : vector<8x17xf32> to vector<8x1xf32>
    %95 = tpu.concatenate %93, %94 in 1 : vector<8x16xf32>, vector<8x1xf32> -> vector<8x17xf32>
    %96 = arith.addf %92, %95 : vector<8x17xf32>
    %97 = arith.subf %76, %96 : vector<8x17xf32>
    %cst_41 = arith.constant 0x7F800000 : f32
    %98 = vector.broadcast %cst_41 : f32 to vector<8x1xf32>
    %99 = vector.extract_strided_slice %97 {offsets = [0, 0], sizes = [8, 16], strides = [1, 1]} : vector<8x17xf32> to vector<8x16xf32>
    %100 = tpu.concatenate %98, %99 in 1 : vector<8x1xf32>, vector<8x16xf32> -> vector<8x17xf32>
    %101 = arith.minimumf %97, %100 : vector<8x17xf32>
    %cst_42 = arith.constant 0x7F800000 : f32
    %102 = vector.broadcast %cst_42 : f32 to vector<8x2xf32>
    %103 = vector.extract_strided_slice %101 {offsets = [0, 0], sizes = [8, 15], strides = [1, 1]} : vector<8x17xf32> to vector<8x15xf32>
    %104 = tpu.concatenate %102, %103 in 1 : vector<8x2xf32>, vector<8x15xf32> -> vector<8x17xf32>
    %105 = arith.minimumf %101, %104 : vector<8x17xf32>
    %cst_43 = arith.constant 0x7F800000 : f32
    %106 = vector.broadcast %cst_43 : f32 to vector<8x4xf32>
    %107 = vector.extract_strided_slice %105 {offsets = [0, 0], sizes = [8, 13], strides = [1, 1]} : vector<8x17xf32> to vector<8x13xf32>
    %108 = tpu.concatenate %106, %107 in 1 : vector<8x4xf32>, vector<8x13xf32> -> vector<8x17xf32>
    %109 = arith.minimumf %105, %108 : vector<8x17xf32>
    %cst_44 = arith.constant 0x7F800000 : f32
    %110 = vector.broadcast %cst_44 : f32 to vector<8x8xf32>
    %111 = vector.extract_strided_slice %109 {offsets = [0, 0], sizes = [8, 9], strides = [1, 1]} : vector<8x17xf32> to vector<8x9xf32>
    %112 = tpu.concatenate %110, %111 in 1 : vector<8x8xf32>, vector<8x9xf32> -> vector<8x17xf32>
    %113 = arith.minimumf %109, %112 : vector<8x17xf32>
    %cst_45 = arith.constant 0x7F800000 : f32
    %114 = vector.broadcast %cst_45 : f32 to vector<8x16xf32>
    %115 = vector.extract_strided_slice %113 {offsets = [0, 0], sizes = [8, 1], strides = [1, 1]} : vector<8x17xf32> to vector<8x1xf32>
    %116 = tpu.concatenate %114, %115 in 1 : vector<8x16xf32>, vector<8x1xf32> -> vector<8x17xf32>
    %117 = arith.minimumf %113, %116 : vector<8x17xf32>
    %118 = arith.addf %117, %96 : vector<8x17xf32>
    %c21_i32_46 = arith.constant 21 : i32
    %119 = arith.cmpi slt, %67, %c21_i32_46 : i32
    %120 = arith.select %119, %118, %65 : vector<8x17xf32>
    %c8_i32_47 = arith.constant 8 : i32
    %121 = arith.muli %arg1, %c8_i32_47 : i32
    %c2_i32 = arith.constant 2 : i32
    %122 = arith.addi %121, %c2_i32 : i32
    %c0_48 = arith.constant 0 : index
    %c2 = arith.constant 2 : index
    %c0_49 = arith.constant 0 : index
    %123 = vector.load %arg6[%c0_48, %c2, %c0_49] : memref<8x8x17xf32, #tpu.memory_space<vmem>>, vector<8x1x17xf32>
    %124 = vector.shape_cast %123 : vector<8x1x17xf32> to vector<8x17xf32>
    %c0_i32_50 = arith.constant 0 : i32
    %125 = arith.cmpi eq, %122, %c0_i32_50 : i32
    %cst_51 = arith.constant 0.000000e+00 : f32
    %cst_52 = arith.constant 0x7F800000 : f32
    %126 = arith.select %125, %cst_51, %cst_52 : f32
    %127 = vector.broadcast %126 : f32 to vector<8x1xf32>
    %128 = vector.extract_strided_slice %120 {offsets = [0, 0], sizes = [8, 16], strides = [1, 1]} : vector<8x17xf32> to vector<8x16xf32>
    %129 = tpu.concatenate %127, %128 in 1 : vector<8x1xf32>, vector<8x16xf32> -> vector<8x17xf32>
    %130 = arith.minimumf %120, %129 : vector<8x17xf32>
    %131 = arith.addf %124, %130 : vector<8x17xf32>
    %cst_53 = arith.constant 0.000000e+00 : f32
    %132 = vector.broadcast %cst_53 : f32 to vector<8x1xf32>
    %133 = vector.extract_strided_slice %124 {offsets = [0, 0], sizes = [8, 16], strides = [1, 1]} : vector<8x17xf32> to vector<8x16xf32>
    %134 = tpu.concatenate %132, %133 in 1 : vector<8x1xf32>, vector<8x16xf32> -> vector<8x17xf32>
    %135 = arith.addf %124, %134 : vector<8x17xf32>
    %cst_54 = arith.constant 0.000000e+00 : f32
    %136 = vector.broadcast %cst_54 : f32 to vector<8x2xf32>
    %137 = vector.extract_strided_slice %135 {offsets = [0, 0], sizes = [8, 15], strides = [1, 1]} : vector<8x17xf32> to vector<8x15xf32>
    %138 = tpu.concatenate %136, %137 in 1 : vector<8x2xf32>, vector<8x15xf32> -> vector<8x17xf32>
    %139 = arith.addf %135, %138 : vector<8x17xf32>
    %cst_55 = arith.constant 0.000000e+00 : f32
    %140 = vector.broadcast %cst_55 : f32 to vector<8x4xf32>
    %141 = vector.extract_strided_slice %139 {offsets = [0, 0], sizes = [8, 13], strides = [1, 1]} : vector<8x17xf32> to vector<8x13xf32>
    %142 = tpu.concatenate %140, %141 in 1 : vector<8x4xf32>, vector<8x13xf32> -> vector<8x17xf32>
    %143 = arith.addf %139, %142 : vector<8x17xf32>
    %cst_56 = arith.constant 0.000000e+00 : f32
    %144 = vector.broadcast %cst_56 : f32 to vector<8x8xf32>
    %145 = vector.extract_strided_slice %143 {offsets = [0, 0], sizes = [8, 9], strides = [1, 1]} : vector<8x17xf32> to vector<8x9xf32>
    %146 = tpu.concatenate %144, %145 in 1 : vector<8x8xf32>, vector<8x9xf32> -> vector<8x17xf32>
    %147 = arith.addf %143, %146 : vector<8x17xf32>
    %cst_57 = arith.constant 0.000000e+00 : f32
    %148 = vector.broadcast %cst_57 : f32 to vector<8x16xf32>
    %149 = vector.extract_strided_slice %147 {offsets = [0, 0], sizes = [8, 1], strides = [1, 1]} : vector<8x17xf32> to vector<8x1xf32>
    %150 = tpu.concatenate %148, %149 in 1 : vector<8x16xf32>, vector<8x1xf32> -> vector<8x17xf32>
    %151 = arith.addf %147, %150 : vector<8x17xf32>
    %152 = arith.subf %131, %151 : vector<8x17xf32>
    %cst_58 = arith.constant 0x7F800000 : f32
    %153 = vector.broadcast %cst_58 : f32 to vector<8x1xf32>
    %154 = vector.extract_strided_slice %152 {offsets = [0, 0], sizes = [8, 16], strides = [1, 1]} : vector<8x17xf32> to vector<8x16xf32>
    %155 = tpu.concatenate %153, %154 in 1 : vector<8x1xf32>, vector<8x16xf32> -> vector<8x17xf32>
    %156 = arith.minimumf %152, %155 : vector<8x17xf32>
    %cst_59 = arith.constant 0x7F800000 : f32
    %157 = vector.broadcast %cst_59 : f32 to vector<8x2xf32>
    %158 = vector.extract_strided_slice %156 {offsets = [0, 0], sizes = [8, 15], strides = [1, 1]} : vector<8x17xf32> to vector<8x15xf32>
    %159 = tpu.concatenate %157, %158 in 1 : vector<8x2xf32>, vector<8x15xf32> -> vector<8x17xf32>
    %160 = arith.minimumf %156, %159 : vector<8x17xf32>
    %cst_60 = arith.constant 0x7F800000 : f32
    %161 = vector.broadcast %cst_60 : f32 to vector<8x4xf32>
    %162 = vector.extract_strided_slice %160 {offsets = [0, 0], sizes = [8, 13], strides = [1, 1]} : vector<8x17xf32> to vector<8x13xf32>
    %163 = tpu.concatenate %161, %162 in 1 : vector<8x4xf32>, vector<8x13xf32> -> vector<8x17xf32>
    %164 = arith.minimumf %160, %163 : vector<8x17xf32>
    %cst_61 = arith.constant 0x7F800000 : f32
    %165 = vector.broadcast %cst_61 : f32 to vector<8x8xf32>
    %166 = vector.extract_strided_slice %164 {offsets = [0, 0], sizes = [8, 9], strides = [1, 1]} : vector<8x17xf32> to vector<8x9xf32>
    %167 = tpu.concatenate %165, %166 in 1 : vector<8x8xf32>, vector<8x9xf32> -> vector<8x17xf32>
    %168 = arith.minimumf %164, %167 : vector<8x17xf32>
    %cst_62 = arith.constant 0x7F800000 : f32
    %169 = vector.broadcast %cst_62 : f32 to vector<8x16xf32>
    %170 = vector.extract_strided_slice %168 {offsets = [0, 0], sizes = [8, 1], strides = [1, 1]} : vector<8x17xf32> to vector<8x1xf32>
    %171 = tpu.concatenate %169, %170 in 1 : vector<8x16xf32>, vector<8x1xf32> -> vector<8x17xf32>
    %172 = arith.minimumf %168, %171 : vector<8x17xf32>
    %173 = arith.addf %172, %151 : vector<8x17xf32>
    %c21_i32_63 = arith.constant 21 : i32
    %174 = arith.cmpi slt, %122, %c21_i32_63 : i32
    %175 = arith.select %174, %173, %120 : vector<8x17xf32>
    %c8_i32_64 = arith.constant 8 : i32
    %176 = arith.muli %arg1, %c8_i32_64 : i32
    %c3_i32 = arith.constant 3 : i32
    %177 = arith.addi %176, %c3_i32 : i32
    %c0_65 = arith.constant 0 : index
    %c3 = arith.constant 3 : index
    %c0_66 = arith.constant 0 : index
    %178 = vector.load %arg6[%c0_65, %c3, %c0_66] : memref<8x8x17xf32, #tpu.memory_space<vmem>>, vector<8x1x17xf32>
    %179 = vector.shape_cast %178 : vector<8x1x17xf32> to vector<8x17xf32>
    %c0_i32_67 = arith.constant 0 : i32
    %180 = arith.cmpi eq, %177, %c0_i32_67 : i32
    %cst_68 = arith.constant 0.000000e+00 : f32
    %cst_69 = arith.constant 0x7F800000 : f32
    %181 = arith.select %180, %cst_68, %cst_69 : f32
    %182 = vector.broadcast %181 : f32 to vector<8x1xf32>
    %183 = vector.extract_strided_slice %175 {offsets = [0, 0], sizes = [8, 16], strides = [1, 1]} : vector<8x17xf32> to vector<8x16xf32>
    %184 = tpu.concatenate %182, %183 in 1 : vector<8x1xf32>, vector<8x16xf32> -> vector<8x17xf32>
    %185 = arith.minimumf %175, %184 : vector<8x17xf32>
    %186 = arith.addf %179, %185 : vector<8x17xf32>
    %cst_70 = arith.constant 0.000000e+00 : f32
    %187 = vector.broadcast %cst_70 : f32 to vector<8x1xf32>
    %188 = vector.extract_strided_slice %179 {offsets = [0, 0], sizes = [8, 16], strides = [1, 1]} : vector<8x17xf32> to vector<8x16xf32>
    %189 = tpu.concatenate %187, %188 in 1 : vector<8x1xf32>, vector<8x16xf32> -> vector<8x17xf32>
    %190 = arith.addf %179, %189 : vector<8x17xf32>
    %cst_71 = arith.constant 0.000000e+00 : f32
    %191 = vector.broadcast %cst_71 : f32 to vector<8x2xf32>
    %192 = vector.extract_strided_slice %190 {offsets = [0, 0], sizes = [8, 15], strides = [1, 1]} : vector<8x17xf32> to vector<8x15xf32>
    %193 = tpu.concatenate %191, %192 in 1 : vector<8x2xf32>, vector<8x15xf32> -> vector<8x17xf32>
    %194 = arith.addf %190, %193 : vector<8x17xf32>
    %cst_72 = arith.constant 0.000000e+00 : f32
    %195 = vector.broadcast %cst_72 : f32 to vector<8x4xf32>
    %196 = vector.extract_strided_slice %194 {offsets = [0, 0], sizes = [8, 13], strides = [1, 1]} : vector<8x17xf32> to vector<8x13xf32>
    %197 = tpu.concatenate %195, %196 in 1 : vector<8x4xf32>, vector<8x13xf32> -> vector<8x17xf32>
    %198 = arith.addf %194, %197 : vector<8x17xf32>
    %cst_73 = arith.constant 0.000000e+00 : f32
    %199 = vector.broadcast %cst_73 : f32 to vector<8x8xf32>
    %200 = vector.extract_strided_slice %198 {offsets = [0, 0], sizes = [8, 9], strides = [1, 1]} : vector<8x17xf32> to vector<8x9xf32>
    %201 = tpu.concatenate %199, %200 in 1 : vector<8x8xf32>, vector<8x9xf32> -> vector<8x17xf32>
    %202 = arith.addf %198, %201 : vector<8x17xf32>
    %cst_74 = arith.constant 0.000000e+00 : f32
    %203 = vector.broadcast %cst_74 : f32 to vector<8x16xf32>
    %204 = vector.extract_strided_slice %202 {offsets = [0, 0], sizes = [8, 1], strides = [1, 1]} : vector<8x17xf32> to vector<8x1xf32>
    %205 = tpu.concatenate %203, %204 in 1 : vector<8x16xf32>, vector<8x1xf32> -> vector<8x17xf32>
    %206 = arith.addf %202, %205 : vector<8x17xf32>
    %207 = arith.subf %186, %206 : vector<8x17xf32>
    %cst_75 = arith.constant 0x7F800000 : f32
    %208 = vector.broadcast %cst_75 : f32 to vector<8x1xf32>
    %209 = vector.extract_strided_slice %207 {offsets = [0, 0], sizes = [8, 16], strides = [1, 1]} : vector<8x17xf32> to vector<8x16xf32>
    %210 = tpu.concatenate %208, %209 in 1 : vector<8x1xf32>, vector<8x16xf32> -> vector<8x17xf32>
    %211 = arith.minimumf %207, %210 : vector<8x17xf32>
    %cst_76 = arith.constant 0x7F800000 : f32
    %212 = vector.broadcast %cst_76 : f32 to vector<8x2xf32>
    %213 = vector.extract_strided_slice %211 {offsets = [0, 0], sizes = [8, 15], strides = [1, 1]} : vector<8x17xf32> to vector<8x15xf32>
    %214 = tpu.concatenate %212, %213 in 1 : vector<8x2xf32>, vector<8x15xf32> -> vector<8x17xf32>
    %215 = arith.minimumf %211, %214 : vector<8x17xf32>
    %cst_77 = arith.constant 0x7F800000 : f32
    %216 = vector.broadcast %cst_77 : f32 to vector<8x4xf32>
    %217 = vector.extract_strided_slice %215 {offsets = [0, 0], sizes = [8, 13], strides = [1, 1]} : vector<8x17xf32> to vector<8x13xf32>
    %218 = tpu.concatenate %216, %217 in 1 : vector<8x4xf32>, vector<8x13xf32> -> vector<8x17xf32>
    %219 = arith.minimumf %215, %218 : vector<8x17xf32>
    %cst_78 = arith.constant 0x7F800000 : f32
    %220 = vector.broadcast %cst_78 : f32 to vector<8x8xf32>
    %221 = vector.extract_strided_slice %219 {offsets = [0, 0], sizes = [8, 9], strides = [1, 1]} : vector<8x17xf32> to vector<8x9xf32>
    %222 = tpu.concatenate %220, %221 in 1 : vector<8x8xf32>, vector<8x9xf32> -> vector<8x17xf32>
    %223 = arith.minimumf %219, %222 : vector<8x17xf32>
    %cst_79 = arith.constant 0x7F800000 : f32
    %224 = vector.broadcast %cst_79 : f32 to vector<8x16xf32>
    %225 = vector.extract_strided_slice %223 {offsets = [0, 0], sizes = [8, 1], strides = [1, 1]} : vector<8x17xf32> to vector<8x1xf32>
    %226 = tpu.concatenate %224, %225 in 1 : vector<8x16xf32>, vector<8x1xf32> -> vector<8x17xf32>
    %227 = arith.minimumf %223, %226 : vector<8x17xf32>
    %228 = arith.addf %227, %206 : vector<8x17xf32>
    %c21_i32_80 = arith.constant 21 : i32
    %229 = arith.cmpi slt, %177, %c21_i32_80 : i32
    %230 = arith.select %229, %228, %175 : vector<8x17xf32>
    %c8_i32_81 = arith.constant 8 : i32
    %231 = arith.muli %arg1, %c8_i32_81 : i32
    %c4_i32 = arith.constant 4 : i32
    %232 = arith.addi %231, %c4_i32 : i32
    %c0_82 = arith.constant 0 : index
    %c4 = arith.constant 4 : index
    %c0_83 = arith.constant 0 : index
    %233 = vector.load %arg6[%c0_82, %c4, %c0_83] : memref<8x8x17xf32, #tpu.memory_space<vmem>>, vector<8x1x17xf32>
    %234 = vector.shape_cast %233 : vector<8x1x17xf32> to vector<8x17xf32>
    %c0_i32_84 = arith.constant 0 : i32
    %235 = arith.cmpi eq, %232, %c0_i32_84 : i32
    %cst_85 = arith.constant 0.000000e+00 : f32
    %cst_86 = arith.constant 0x7F800000 : f32
    %236 = arith.select %235, %cst_85, %cst_86 : f32
    %237 = vector.broadcast %236 : f32 to vector<8x1xf32>
    %238 = vector.extract_strided_slice %230 {offsets = [0, 0], sizes = [8, 16], strides = [1, 1]} : vector<8x17xf32> to vector<8x16xf32>
    %239 = tpu.concatenate %237, %238 in 1 : vector<8x1xf32>, vector<8x16xf32> -> vector<8x17xf32>
    %240 = arith.minimumf %230, %239 : vector<8x17xf32>
    %241 = arith.addf %234, %240 : vector<8x17xf32>
    %cst_87 = arith.constant 0.000000e+00 : f32
    %242 = vector.broadcast %cst_87 : f32 to vector<8x1xf32>
    %243 = vector.extract_strided_slice %234 {offsets = [0, 0], sizes = [8, 16], strides = [1, 1]} : vector<8x17xf32> to vector<8x16xf32>
    %244 = tpu.concatenate %242, %243 in 1 : vector<8x1xf32>, vector<8x16xf32> -> vector<8x17xf32>
    %245 = arith.addf %234, %244 : vector<8x17xf32>
    %cst_88 = arith.constant 0.000000e+00 : f32
    %246 = vector.broadcast %cst_88 : f32 to vector<8x2xf32>
    %247 = vector.extract_strided_slice %245 {offsets = [0, 0], sizes = [8, 15], strides = [1, 1]} : vector<8x17xf32> to vector<8x15xf32>
    %248 = tpu.concatenate %246, %247 in 1 : vector<8x2xf32>, vector<8x15xf32> -> vector<8x17xf32>
    %249 = arith.addf %245, %248 : vector<8x17xf32>
    %cst_89 = arith.constant 0.000000e+00 : f32
    %250 = vector.broadcast %cst_89 : f32 to vector<8x4xf32>
    %251 = vector.extract_strided_slice %249 {offsets = [0, 0], sizes = [8, 13], strides = [1, 1]} : vector<8x17xf32> to vector<8x13xf32>
    %252 = tpu.concatenate %250, %251 in 1 : vector<8x4xf32>, vector<8x13xf32> -> vector<8x17xf32>
    %253 = arith.addf %249, %252 : vector<8x17xf32>
    %cst_90 = arith.constant 0.000000e+00 : f32
    %254 = vector.broadcast %cst_90 : f32 to vector<8x8xf32>
    %255 = vector.extract_strided_slice %253 {offsets = [0, 0], sizes = [8, 9], strides = [1, 1]} : vector<8x17xf32> to vector<8x9xf32>
    %256 = tpu.concatenate %254, %255 in 1 : vector<8x8xf32>, vector<8x9xf32> -> vector<8x17xf32>
    %257 = arith.addf %253, %256 : vector<8x17xf32>
    %cst_91 = arith.constant 0.000000e+00 : f32
    %258 = vector.broadcast %cst_91 : f32 to vector<8x16xf32>
    %259 = vector.extract_strided_slice %257 {offsets = [0, 0], sizes = [8, 1], strides = [1, 1]} : vector<8x17xf32> to vector<8x1xf32>
    %260 = tpu.concatenate %258, %259 in 1 : vector<8x16xf32>, vector<8x1xf32> -> vector<8x17xf32>
    %261 = arith.addf %257, %260 : vector<8x17xf32>
    %262 = arith.subf %241, %261 : vector<8x17xf32>
    %cst_92 = arith.constant 0x7F800000 : f32
    %263 = vector.broadcast %cst_92 : f32 to vector<8x1xf32>
    %264 = vector.extract_strided_slice %262 {offsets = [0, 0], sizes = [8, 16], strides = [1, 1]} : vector<8x17xf32> to vector<8x16xf32>
    %265 = tpu.concatenate %263, %264 in 1 : vector<8x1xf32>, vector<8x16xf32> -> vector<8x17xf32>
    %266 = arith.minimumf %262, %265 : vector<8x17xf32>
    %cst_93 = arith.constant 0x7F800000 : f32
    %267 = vector.broadcast %cst_93 : f32 to vector<8x2xf32>
    %268 = vector.extract_strided_slice %266 {offsets = [0, 0], sizes = [8, 15], strides = [1, 1]} : vector<8x17xf32> to vector<8x15xf32>
    %269 = tpu.concatenate %267, %268 in 1 : vector<8x2xf32>, vector<8x15xf32> -> vector<8x17xf32>
    %270 = arith.minimumf %266, %269 : vector<8x17xf32>
    %cst_94 = arith.constant 0x7F800000 : f32
    %271 = vector.broadcast %cst_94 : f32 to vector<8x4xf32>
    %272 = vector.extract_strided_slice %270 {offsets = [0, 0], sizes = [8, 13], strides = [1, 1]} : vector<8x17xf32> to vector<8x13xf32>
    %273 = tpu.concatenate %271, %272 in 1 : vector<8x4xf32>, vector<8x13xf32> -> vector<8x17xf32>
    %274 = arith.minimumf %270, %273 : vector<8x17xf32>
    %cst_95 = arith.constant 0x7F800000 : f32
    %275 = vector.broadcast %cst_95 : f32 to vector<8x8xf32>
    %276 = vector.extract_strided_slice %274 {offsets = [0, 0], sizes = [8, 9], strides = [1, 1]} : vector<8x17xf32> to vector<8x9xf32>
    %277 = tpu.concatenate %275, %276 in 1 : vector<8x8xf32>, vector<8x9xf32> -> vector<8x17xf32>
    %278 = arith.minimumf %274, %277 : vector<8x17xf32>
    %cst_96 = arith.constant 0x7F800000 : f32
    %279 = vector.broadcast %cst_96 : f32 to vector<8x16xf32>
    %280 = vector.extract_strided_slice %278 {offsets = [0, 0], sizes = [8, 1], strides = [1, 1]} : vector<8x17xf32> to vector<8x1xf32>
    %281 = tpu.concatenate %279, %280 in 1 : vector<8x16xf32>, vector<8x1xf32> -> vector<8x17xf32>
    %282 = arith.minimumf %278, %281 : vector<8x17xf32>
    %283 = arith.addf %282, %261 : vector<8x17xf32>
    %c21_i32_97 = arith.constant 21 : i32
    %284 = arith.cmpi slt, %232, %c21_i32_97 : i32
    %285 = arith.select %284, %283, %230 : vector<8x17xf32>
    %c8_i32_98 = arith.constant 8 : i32
    %286 = arith.muli %arg1, %c8_i32_98 : i32
    %c5_i32 = arith.constant 5 : i32
    %287 = arith.addi %286, %c5_i32 : i32
    %c0_99 = arith.constant 0 : index
    %c5 = arith.constant 5 : index
    %c0_100 = arith.constant 0 : index
    %288 = vector.load %arg6[%c0_99, %c5, %c0_100] : memref<8x8x17xf32, #tpu.memory_space<vmem>>, vector<8x1x17xf32>
    %289 = vector.shape_cast %288 : vector<8x1x17xf32> to vector<8x17xf32>
    %c0_i32_101 = arith.constant 0 : i32
    %290 = arith.cmpi eq, %287, %c0_i32_101 : i32
    %cst_102 = arith.constant 0.000000e+00 : f32
    %cst_103 = arith.constant 0x7F800000 : f32
    %291 = arith.select %290, %cst_102, %cst_103 : f32
    %292 = vector.broadcast %291 : f32 to vector<8x1xf32>
    %293 = vector.extract_strided_slice %285 {offsets = [0, 0], sizes = [8, 16], strides = [1, 1]} : vector<8x17xf32> to vector<8x16xf32>
    %294 = tpu.concatenate %292, %293 in 1 : vector<8x1xf32>, vector<8x16xf32> -> vector<8x17xf32>
    %295 = arith.minimumf %285, %294 : vector<8x17xf32>
    %296 = arith.addf %289, %295 : vector<8x17xf32>
    %cst_104 = arith.constant 0.000000e+00 : f32
    %297 = vector.broadcast %cst_104 : f32 to vector<8x1xf32>
    %298 = vector.extract_strided_slice %289 {offsets = [0, 0], sizes = [8, 16], strides = [1, 1]} : vector<8x17xf32> to vector<8x16xf32>
    %299 = tpu.concatenate %297, %298 in 1 : vector<8x1xf32>, vector<8x16xf32> -> vector<8x17xf32>
    %300 = arith.addf %289, %299 : vector<8x17xf32>
    %cst_105 = arith.constant 0.000000e+00 : f32
    %301 = vector.broadcast %cst_105 : f32 to vector<8x2xf32>
    %302 = vector.extract_strided_slice %300 {offsets = [0, 0], sizes = [8, 15], strides = [1, 1]} : vector<8x17xf32> to vector<8x15xf32>
    %303 = tpu.concatenate %301, %302 in 1 : vector<8x2xf32>, vector<8x15xf32> -> vector<8x17xf32>
    %304 = arith.addf %300, %303 : vector<8x17xf32>
    %cst_106 = arith.constant 0.000000e+00 : f32
    %305 = vector.broadcast %cst_106 : f32 to vector<8x4xf32>
    %306 = vector.extract_strided_slice %304 {offsets = [0, 0], sizes = [8, 13], strides = [1, 1]} : vector<8x17xf32> to vector<8x13xf32>
    %307 = tpu.concatenate %305, %306 in 1 : vector<8x4xf32>, vector<8x13xf32> -> vector<8x17xf32>
    %308 = arith.addf %304, %307 : vector<8x17xf32>
    %cst_107 = arith.constant 0.000000e+00 : f32
    %309 = vector.broadcast %cst_107 : f32 to vector<8x8xf32>
    %310 = vector.extract_strided_slice %308 {offsets = [0, 0], sizes = [8, 9], strides = [1, 1]} : vector<8x17xf32> to vector<8x9xf32>
    %311 = tpu.concatenate %309, %310 in 1 : vector<8x8xf32>, vector<8x9xf32> -> vector<8x17xf32>
    %312 = arith.addf %308, %311 : vector<8x17xf32>
    %cst_108 = arith.constant 0.000000e+00 : f32
    %313 = vector.broadcast %cst_108 : f32 to vector<8x16xf32>
    %314 = vector.extract_strided_slice %312 {offsets = [0, 0], sizes = [8, 1], strides = [1, 1]} : vector<8x17xf32> to vector<8x1xf32>
    %315 = tpu.concatenate %313, %314 in 1 : vector<8x16xf32>, vector<8x1xf32> -> vector<8x17xf32>
    %316 = arith.addf %312, %315 : vector<8x17xf32>
    %317 = arith.subf %296, %316 : vector<8x17xf32>
    %cst_109 = arith.constant 0x7F800000 : f32
    %318 = vector.broadcast %cst_109 : f32 to vector<8x1xf32>
    %319 = vector.extract_strided_slice %317 {offsets = [0, 0], sizes = [8, 16], strides = [1, 1]} : vector<8x17xf32> to vector<8x16xf32>
    %320 = tpu.concatenate %318, %319 in 1 : vector<8x1xf32>, vector<8x16xf32> -> vector<8x17xf32>
    %321 = arith.minimumf %317, %320 : vector<8x17xf32>
    %cst_110 = arith.constant 0x7F800000 : f32
    %322 = vector.broadcast %cst_110 : f32 to vector<8x2xf32>
    %323 = vector.extract_strided_slice %321 {offsets = [0, 0], sizes = [8, 15], strides = [1, 1]} : vector<8x17xf32> to vector<8x15xf32>
    %324 = tpu.concatenate %322, %323 in 1 : vector<8x2xf32>, vector<8x15xf32> -> vector<8x17xf32>
    %325 = arith.minimumf %321, %324 : vector<8x17xf32>
    %cst_111 = arith.constant 0x7F800000 : f32
    %326 = vector.broadcast %cst_111 : f32 to vector<8x4xf32>
    %327 = vector.extract_strided_slice %325 {offsets = [0, 0], sizes = [8, 13], strides = [1, 1]} : vector<8x17xf32> to vector<8x13xf32>
    %328 = tpu.concatenate %326, %327 in 1 : vector<8x4xf32>, vector<8x13xf32> -> vector<8x17xf32>
    %329 = arith.minimumf %325, %328 : vector<8x17xf32>
    %cst_112 = arith.constant 0x7F800000 : f32
    %330 = vector.broadcast %cst_112 : f32 to vector<8x8xf32>
    %331 = vector.extract_strided_slice %329 {offsets = [0, 0], sizes = [8, 9], strides = [1, 1]} : vector<8x17xf32> to vector<8x9xf32>
    %332 = tpu.concatenate %330, %331 in 1 : vector<8x8xf32>, vector<8x9xf32> -> vector<8x17xf32>
    %333 = arith.minimumf %329, %332 : vector<8x17xf32>
    %cst_113 = arith.constant 0x7F800000 : f32
    %334 = vector.broadcast %cst_113 : f32 to vector<8x16xf32>
    %335 = vector.extract_strided_slice %333 {offsets = [0, 0], sizes = [8, 1], strides = [1, 1]} : vector<8x17xf32> to vector<8x1xf32>
    %336 = tpu.concatenate %334, %335 in 1 : vector<8x16xf32>, vector<8x1xf32> -> vector<8x17xf32>
    %337 = arith.minimumf %333, %336 : vector<8x17xf32>
    %338 = arith.addf %337, %316 : vector<8x17xf32>
    %c21_i32_114 = arith.constant 21 : i32
    %339 = arith.cmpi slt, %287, %c21_i32_114 : i32
    %340 = arith.select %339, %338, %285 : vector<8x17xf32>
    %c8_i32_115 = arith.constant 8 : i32
    %341 = arith.muli %arg1, %c8_i32_115 : i32
    %c6_i32 = arith.constant 6 : i32
    %342 = arith.addi %341, %c6_i32 : i32
    %c0_116 = arith.constant 0 : index
    %c6 = arith.constant 6 : index
    %c0_117 = arith.constant 0 : index
    %343 = vector.load %arg6[%c0_116, %c6, %c0_117] : memref<8x8x17xf32, #tpu.memory_space<vmem>>, vector<8x1x17xf32>
    %344 = vector.shape_cast %343 : vector<8x1x17xf32> to vector<8x17xf32>
    %c0_i32_118 = arith.constant 0 : i32
    %345 = arith.cmpi eq, %342, %c0_i32_118 : i32
    %cst_119 = arith.constant 0.000000e+00 : f32
    %cst_120 = arith.constant 0x7F800000 : f32
    %346 = arith.select %345, %cst_119, %cst_120 : f32
    %347 = vector.broadcast %346 : f32 to vector<8x1xf32>
    %348 = vector.extract_strided_slice %340 {offsets = [0, 0], sizes = [8, 16], strides = [1, 1]} : vector<8x17xf32> to vector<8x16xf32>
    %349 = tpu.concatenate %347, %348 in 1 : vector<8x1xf32>, vector<8x16xf32> -> vector<8x17xf32>
    %350 = arith.minimumf %340, %349 : vector<8x17xf32>
    %351 = arith.addf %344, %350 : vector<8x17xf32>
    %cst_121 = arith.constant 0.000000e+00 : f32
    %352 = vector.broadcast %cst_121 : f32 to vector<8x1xf32>
    %353 = vector.extract_strided_slice %344 {offsets = [0, 0], sizes = [8, 16], strides = [1, 1]} : vector<8x17xf32> to vector<8x16xf32>
    %354 = tpu.concatenate %352, %353 in 1 : vector<8x1xf32>, vector<8x16xf32> -> vector<8x17xf32>
    %355 = arith.addf %344, %354 : vector<8x17xf32>
    %cst_122 = arith.constant 0.000000e+00 : f32
    %356 = vector.broadcast %cst_122 : f32 to vector<8x2xf32>
    %357 = vector.extract_strided_slice %355 {offsets = [0, 0], sizes = [8, 15], strides = [1, 1]} : vector<8x17xf32> to vector<8x15xf32>
    %358 = tpu.concatenate %356, %357 in 1 : vector<8x2xf32>, vector<8x15xf32> -> vector<8x17xf32>
    %359 = arith.addf %355, %358 : vector<8x17xf32>
    %cst_123 = arith.constant 0.000000e+00 : f32
    %360 = vector.broadcast %cst_123 : f32 to vector<8x4xf32>
    %361 = vector.extract_strided_slice %359 {offsets = [0, 0], sizes = [8, 13], strides = [1, 1]} : vector<8x17xf32> to vector<8x13xf32>
    %362 = tpu.concatenate %360, %361 in 1 : vector<8x4xf32>, vector<8x13xf32> -> vector<8x17xf32>
    %363 = arith.addf %359, %362 : vector<8x17xf32>
    %cst_124 = arith.constant 0.000000e+00 : f32
    %364 = vector.broadcast %cst_124 : f32 to vector<8x8xf32>
    %365 = vector.extract_strided_slice %363 {offsets = [0, 0], sizes = [8, 9], strides = [1, 1]} : vector<8x17xf32> to vector<8x9xf32>
    %366 = tpu.concatenate %364, %365 in 1 : vector<8x8xf32>, vector<8x9xf32> -> vector<8x17xf32>
    %367 = arith.addf %363, %366 : vector<8x17xf32>
    %cst_125 = arith.constant 0.000000e+00 : f32
    %368 = vector.broadcast %cst_125 : f32 to vector<8x16xf32>
    %369 = vector.extract_strided_slice %367 {offsets = [0, 0], sizes = [8, 1], strides = [1, 1]} : vector<8x17xf32> to vector<8x1xf32>
    %370 = tpu.concatenate %368, %369 in 1 : vector<8x16xf32>, vector<8x1xf32> -> vector<8x17xf32>
    %371 = arith.addf %367, %370 : vector<8x17xf32>
    %372 = arith.subf %351, %371 : vector<8x17xf32>
    %cst_126 = arith.constant 0x7F800000 : f32
    %373 = vector.broadcast %cst_126 : f32 to vector<8x1xf32>
    %374 = vector.extract_strided_slice %372 {offsets = [0, 0], sizes = [8, 16], strides = [1, 1]} : vector<8x17xf32> to vector<8x16xf32>
    %375 = tpu.concatenate %373, %374 in 1 : vector<8x1xf32>, vector<8x16xf32> -> vector<8x17xf32>
    %376 = arith.minimumf %372, %375 : vector<8x17xf32>
    %cst_127 = arith.constant 0x7F800000 : f32
    %377 = vector.broadcast %cst_127 : f32 to vector<8x2xf32>
    %378 = vector.extract_strided_slice %376 {offsets = [0, 0], sizes = [8, 15], strides = [1, 1]} : vector<8x17xf32> to vector<8x15xf32>
    %379 = tpu.concatenate %377, %378 in 1 : vector<8x2xf32>, vector<8x15xf32> -> vector<8x17xf32>
    %380 = arith.minimumf %376, %379 : vector<8x17xf32>
    %cst_128 = arith.constant 0x7F800000 : f32
    %381 = vector.broadcast %cst_128 : f32 to vector<8x4xf32>
    %382 = vector.extract_strided_slice %380 {offsets = [0, 0], sizes = [8, 13], strides = [1, 1]} : vector<8x17xf32> to vector<8x13xf32>
    %383 = tpu.concatenate %381, %382 in 1 : vector<8x4xf32>, vector<8x13xf32> -> vector<8x17xf32>
    %384 = arith.minimumf %380, %383 : vector<8x17xf32>
    %cst_129 = arith.constant 0x7F800000 : f32
    %385 = vector.broadcast %cst_129 : f32 to vector<8x8xf32>
    %386 = vector.extract_strided_slice %384 {offsets = [0, 0], sizes = [8, 9], strides = [1, 1]} : vector<8x17xf32> to vector<8x9xf32>
    %387 = tpu.concatenate %385, %386 in 1 : vector<8x8xf32>, vector<8x9xf32> -> vector<8x17xf32>
    %388 = arith.minimumf %384, %387 : vector<8x17xf32>
    %cst_130 = arith.constant 0x7F800000 : f32
    %389 = vector.broadcast %cst_130 : f32 to vector<8x16xf32>
    %390 = vector.extract_strided_slice %388 {offsets = [0, 0], sizes = [8, 1], strides = [1, 1]} : vector<8x17xf32> to vector<8x1xf32>
    %391 = tpu.concatenate %389, %390 in 1 : vector<8x16xf32>, vector<8x1xf32> -> vector<8x17xf32>
    %392 = arith.minimumf %388, %391 : vector<8x17xf32>
    %393 = arith.addf %392, %371 : vector<8x17xf32>
    %c21_i32_131 = arith.constant 21 : i32
    %394 = arith.cmpi slt, %342, %c21_i32_131 : i32
    %395 = arith.select %394, %393, %340 : vector<8x17xf32>
    %c8_i32_132 = arith.constant 8 : i32
    %396 = arith.muli %arg1, %c8_i32_132 : i32
    %c7_i32 = arith.constant 7 : i32
    %397 = arith.addi %396, %c7_i32 : i32
    %c0_133 = arith.constant 0 : index
    %c7 = arith.constant 7 : index
    %c0_134 = arith.constant 0 : index
    %398 = vector.load %arg6[%c0_133, %c7, %c0_134] : memref<8x8x17xf32, #tpu.memory_space<vmem>>, vector<8x1x17xf32>
    %399 = vector.shape_cast %398 : vector<8x1x17xf32> to vector<8x17xf32>
    %c0_i32_135 = arith.constant 0 : i32
    %400 = arith.cmpi eq, %397, %c0_i32_135 : i32
    %cst_136 = arith.constant 0.000000e+00 : f32
    %cst_137 = arith.constant 0x7F800000 : f32
    %401 = arith.select %400, %cst_136, %cst_137 : f32
    %402 = vector.broadcast %401 : f32 to vector<8x1xf32>
    %403 = vector.extract_strided_slice %395 {offsets = [0, 0], sizes = [8, 16], strides = [1, 1]} : vector<8x17xf32> to vector<8x16xf32>
    %404 = tpu.concatenate %402, %403 in 1 : vector<8x1xf32>, vector<8x16xf32> -> vector<8x17xf32>
    %405 = arith.minimumf %395, %404 : vector<8x17xf32>
    %406 = arith.addf %399, %405 : vector<8x17xf32>
    %cst_138 = arith.constant 0.000000e+00 : f32
    %407 = vector.broadcast %cst_138 : f32 to vector<8x1xf32>
    %408 = vector.extract_strided_slice %399 {offsets = [0, 0], sizes = [8, 16], strides = [1, 1]} : vector<8x17xf32> to vector<8x16xf32>
    %409 = tpu.concatenate %407, %408 in 1 : vector<8x1xf32>, vector<8x16xf32> -> vector<8x17xf32>
    %410 = arith.addf %399, %409 : vector<8x17xf32>
    %cst_139 = arith.constant 0.000000e+00 : f32
    %411 = vector.broadcast %cst_139 : f32 to vector<8x2xf32>
    %412 = vector.extract_strided_slice %410 {offsets = [0, 0], sizes = [8, 15], strides = [1, 1]} : vector<8x17xf32> to vector<8x15xf32>
    %413 = tpu.concatenate %411, %412 in 1 : vector<8x2xf32>, vector<8x15xf32> -> vector<8x17xf32>
    %414 = arith.addf %410, %413 : vector<8x17xf32>
    %cst_140 = arith.constant 0.000000e+00 : f32
    %415 = vector.broadcast %cst_140 : f32 to vector<8x4xf32>
    %416 = vector.extract_strided_slice %414 {offsets = [0, 0], sizes = [8, 13], strides = [1, 1]} : vector<8x17xf32> to vector<8x13xf32>
    %417 = tpu.concatenate %415, %416 in 1 : vector<8x4xf32>, vector<8x13xf32> -> vector<8x17xf32>
    %418 = arith.addf %414, %417 : vector<8x17xf32>
    %cst_141 = arith.constant 0.000000e+00 : f32
    %419 = vector.broadcast %cst_141 : f32 to vector<8x8xf32>
    %420 = vector.extract_strided_slice %418 {offsets = [0, 0], sizes = [8, 9], strides = [1, 1]} : vector<8x17xf32> to vector<8x9xf32>
    %421 = tpu.concatenate %419, %420 in 1 : vector<8x8xf32>, vector<8x9xf32> -> vector<8x17xf32>
    %422 = arith.addf %418, %421 : vector<8x17xf32>
    %cst_142 = arith.constant 0.000000e+00 : f32
    %423 = vector.broadcast %cst_142 : f32 to vector<8x16xf32>
    %424 = vector.extract_strided_slice %422 {offsets = [0, 0], sizes = [8, 1], strides = [1, 1]} : vector<8x17xf32> to vector<8x1xf32>
    %425 = tpu.concatenate %423, %424 in 1 : vector<8x16xf32>, vector<8x1xf32> -> vector<8x17xf32>
    %426 = arith.addf %422, %425 : vector<8x17xf32>
    %427 = arith.subf %406, %426 : vector<8x17xf32>
    %cst_143 = arith.constant 0x7F800000 : f32
    %428 = vector.broadcast %cst_143 : f32 to vector<8x1xf32>
    %429 = vector.extract_strided_slice %427 {offsets = [0, 0], sizes = [8, 16], strides = [1, 1]} : vector<8x17xf32> to vector<8x16xf32>
    %430 = tpu.concatenate %428, %429 in 1 : vector<8x1xf32>, vector<8x16xf32> -> vector<8x17xf32>
    %431 = arith.minimumf %427, %430 : vector<8x17xf32>
    %cst_144 = arith.constant 0x7F800000 : f32
    %432 = vector.broadcast %cst_144 : f32 to vector<8x2xf32>
    %433 = vector.extract_strided_slice %431 {offsets = [0, 0], sizes = [8, 15], strides = [1, 1]} : vector<8x17xf32> to vector<8x15xf32>
    %434 = tpu.concatenate %432, %433 in 1 : vector<8x2xf32>, vector<8x15xf32> -> vector<8x17xf32>
    %435 = arith.minimumf %431, %434 : vector<8x17xf32>
    %cst_145 = arith.constant 0x7F800000 : f32
    %436 = vector.broadcast %cst_145 : f32 to vector<8x4xf32>
    %437 = vector.extract_strided_slice %435 {offsets = [0, 0], sizes = [8, 13], strides = [1, 1]} : vector<8x17xf32> to vector<8x13xf32>
    %438 = tpu.concatenate %436, %437 in 1 : vector<8x4xf32>, vector<8x13xf32> -> vector<8x17xf32>
    %439 = arith.minimumf %435, %438 : vector<8x17xf32>
    %cst_146 = arith.constant 0x7F800000 : f32
    %440 = vector.broadcast %cst_146 : f32 to vector<8x8xf32>
    %441 = vector.extract_strided_slice %439 {offsets = [0, 0], sizes = [8, 9], strides = [1, 1]} : vector<8x17xf32> to vector<8x9xf32>
    %442 = tpu.concatenate %440, %441 in 1 : vector<8x8xf32>, vector<8x9xf32> -> vector<8x17xf32>
    %443 = arith.minimumf %439, %442 : vector<8x17xf32>
    %cst_147 = arith.constant 0x7F800000 : f32
    %444 = vector.broadcast %cst_147 : f32 to vector<8x16xf32>
    %445 = vector.extract_strided_slice %443 {offsets = [0, 0], sizes = [8, 1], strides = [1, 1]} : vector<8x17xf32> to vector<8x1xf32>
    %446 = tpu.concatenate %444, %445 in 1 : vector<8x16xf32>, vector<8x1xf32> -> vector<8x17xf32>
    %447 = arith.minimumf %443, %446 : vector<8x17xf32>
    %448 = arith.addf %447, %426 : vector<8x17xf32>
    %c21_i32_148 = arith.constant 21 : i32
    %449 = arith.cmpi slt, %397, %c21_i32_148 : i32
    %450 = arith.select %449, %448, %395 : vector<8x17xf32>
    %c0_149 = arith.constant 0 : index
    %c0_150 = arith.constant 0 : index
    %451 = vector.load %arg5[%c0_149, %c0_150] : memref<8x17xf32, #tpu.memory_space<vmem>>, vector<8x17xf32>
    tpu.vector_store %arg5[%c0_149, %c0_150], %450 {strides = array<i32>} : memref<8x17xf32, #tpu.memory_space<vmem>>, vector<8x17xf32>,
    %c2_i32_151 = arith.constant 2 : i32
    %452 = arith.cmpi eq, %arg1, %c2_i32_151 : i32
    %453 = arith.extui %452 : i1 to i32
    %c0_i32_152 = arith.constant 0 : i32
    %454 = arith.cmpi ne, %453, %c0_i32_152 : i32
    scf.if %454 {
      %c0_153 = arith.constant 0 : index
      %c16 = arith.constant 16 : index
      %455 = vector.load %arg5[%c0_153, %c16] : memref<8x17xf32, #tpu.memory_space<vmem>>, vector<8x1xf32>
      %c0_154 = arith.constant 0 : index
      %c0_155 = arith.constant 0 : index
      %456 = vector.load %arg4[%c0_154, %c0_155] : memref<8x1xf32, #tpu.memory_space<vmem>>, vector<8x1xf32>
      tpu.vector_store %arg4[%c0_154, %c0_155], %455 {strides = array<i32>} : memref<8x1xf32, #tpu.memory_space<vmem>>, vector<8x1xf32>,
    } else {
    }
    return
  }
  func.func @transform_0(%arg0: i32, %arg1: i32) -> (i32, i32, i32) {
    %c0_i32 = arith.constant 0 : i32
    %c0_i32_0 = arith.constant 0 : i32
    return %arg0, %arg1, %c0_i32 : i32, i32, i32
  }
  func.func @transform_1(%arg0: i32, %arg1: i32) -> (i32, i32, i32) {
    %c0_i32 = arith.constant 0 : i32
    %c0_i32_0 = arith.constant 0 : i32
    %c0_i32_1 = arith.constant 0 : i32
    return %arg0, %c0_i32, %c0_i32_0 : i32, i32, i32
  }
  func.func @transform_2(%arg0: i32, %arg1: i32) -> (i32, i32) {
    %c0_i32 = arith.constant 0 : i32
    %c0_i32_0 = arith.constant 0 : i32
    return %arg0, %c0_i32 : i32, i32
  }
}

</mosaic_0001>

<bundles_post_ra>
// kernel: tpu_custom_call.1
= control target key start
LH: loop header
LB: loop body
LE: loop exit
PB: predicated region body
PF: predicated region fallthrough
CT: control target
= control target key end

     0   :  { %s6195_s9 = smov 0   ;;  %s6197_s10 = smov 0   ;;  %s10021_s0 = inlined_call_operand.vmem [shape: f32[8,24,7], index: 0, kind: input, shape index: {}]   ;;  %s10022_s1 = inlined_call_operand.vmem [shape: f32[8,17,7], index: 1, kind: input, shape index: {}]   ;;  %s10023_s2 = inlined_call_operand.vmem [shape: f32[8,1], index: 2, kind: output, shape index: {}]  }
   0x1   :  { %s6199_s11 = smov 0   ;;  %s6201_s12 = smov 0  }
   0x2   :  { %s6203_s13 = smov 0  }
   0x3 LB: > { %s21_s14 = sadd.s32 1, %s6165_s12  ;;  %p40_p1 = scmp.ne.s32.totalorder %s6157_s10, %s6153_s9  ;;  %s6169_s13 = sphi %s6203_s13, %s12_s13   ;;  %s6165_s12 = sphi %s6201_s12, %s10035_s12   ;;  %s6161_s11 = sphi %s6199_s11, %s10034_s11   ;;  %s6157_s10 = sphi %s6197_s10, %s10033_s10   ;;  %s6153_s9 = sphi %s6195_s9, %s10032_s9  }
   0x4   : > { %p22_p0 = scmp.ge.s32.totalorder %s21_s14, 3  ;;  %p41_p2 = scmp.eq.s32.totalorder %s6169_s13, 0 }
   0x5   : > { %s33_s16 = sadd.s32 1, %s6157_s10  ;;  %p5919_p5 = scmp.ge.s32.totalorder %s6169_s13, 3 }
   0x6   : > { %s10037_s14 = smov (%p22_p0, %s21_s14), 0  ;;  %p42_p3 = por %p41_p2, %p40_p1 }
   0x7   : > { %s29_s15 = ssub.s32 %s6165_s12, %s10037_s14  ;;  %128 = sbr.rel (%p5919_p5) target bundleno = 20 (0x14), region = 20 }
   0x8   : > { %p31_p4 = scmp.eq.s32.totalorder %s29_s15, 0 }
   0xa   : > { %s6230_s17 = scalar_select %p31_p4, %s6157_s10, %s33_s16  }
   0xc   : > { %131 = sbr.rel (!%p42_p3) target bundleno = 20 (0x14), region = 24  ;;  %s133_s18 = sand.u32 (%p42_p3), 1, %s6157_s10  }
   0xd   : > { %s5921_s19 = sshll.u32 (%p42_p3), %s6165_s12, 3  ;;  %s5920_s20 = sshll.u32 (%p42_p3), %s133_s18, 6 }
   0xe   : > { %s140_s23 = scalar_lea.vmem (%p42_p3), %s10021_s0, %s5921_s19  ;;  %s135_s24 = scalar_lea.vmem (%p42_p3), [#allocation4], %s5920_s20 }
   0xf   : > { %v183_v0 = vld [vmem:[%s140_s23] sm:$0xff] (%p42_p3)  ;;  %v185_v1 = vld [vmem:[%s140_s23 + $0x18] sm:$0xff] (%p42_p3)  ;;  %v187_v2 = vld [vmem:[%s140_s23 + $0x30] sm:$0xff] (%p42_p3) }
  0x10   : > { %184 = vst [vmem:[%s135_s24] sm:$0xff] (%p42_p3), %v183_v0  ;;  %186 = vst [vmem:[%s135_s24 + $0x8] sm:$0xff] (%p42_p3), %v185_v1  ;;  %v189_v3 = vld [vmem:[%s140_s23 + $0x48] sm:$0xff] (%p42_p3)  ;;  %v191_v4 = vld [vmem:[%s140_s23 + $0x60] sm:$0xff] (%p42_p3) }
  0x11   : > { %188 = vst [vmem:[%s135_s24 + $0x10] sm:$0xff] %v187_v2  ;;  %v193_v5 = vld [vmem:[%s140_s23 + $0x78] sm:$0xff]  ;;  %190 = vst [vmem:[%s135_s24 + $0x18] sm:$0xff] %v189_v3  ;;  %v195_v6 = vld [vmem:[%s140_s23 + $0x90] sm:$0xff] }
  0x12   : > { %192 = vst [vmem:[%s135_s24 + $0x20] sm:$0xff] %v191_v4  ;;  %194 = vst [vmem:[%s135_s24 + $0x28] sm:$0xff] %v193_v5  ;;  %v197_v7 = vld [vmem:[%s140_s23 + $0xa8] sm:$0xff] }
  0x13   : > { %196 = vst [vmem:[%s135_s24 + $0x30] sm:$0xff] %v195_v6  ;;  %198 = vst [vmem:[%s135_s24 + $0x38] sm:$0xff] %v197_v7 }
  0x14 PF: > { %p5922_p6 = scmp.ge.s32.totalorder %s6169_s13, 1  ;;  %p203_p7 = scmp.lt.s32.totalorder %s6169_s13, 4 }
  0x16   : > { %p204_p8 = pnand %p5922_p6, %p203_p7 }
  0x17   : > { %s210_s25 = sand.u32 (!%p204_p8), 1, %s6153_s9   ;;  %p5924_p9 = scmp.ne.s32.totalorder (!%p204_p8), %s6161_s11, 0 }
  0x18   : > { %207 = sbr.rel (%p204_p8) target bundleno = 7225 (0x1c39), region = 62  ;;  %s5923_s26 = sshll.u32 (!%p204_p8), %s210_s25, 6 }
  0x19   : > { %s6241_s27 = scalar_lea.vmem (!%p204_p8), [#allocation4], %s5923_s26 }
  0x1d   : > { %251 = sbr.rel (%p5924_p9) target bundleno = 36 (0x24), region = 70 }
  0x22   : > { %vm252_vm0 = vcmask 138240   ;;  %v6171_v8 = vmov inf  }
  0x23   : > { %253 = vst.msk [vmem:[#allocation2] sm:$0xff] %vm252_vm0, %v6171_v8 }
  0x24 PF: > { %v264_v9 = vld [vmem:[%s10022_s1 + $0x10] sm:$0x1]  ;;  %vm286_vm1 = vcmask 56320   ;;  %v267_v10 = vld [vmem:[%s10022_s1 + $0x28] sm:$0x1]  ;;  %v6172_v11 = vmov 0.0  }
  0x25   : > { %5994 = vmatprep.subr.mxu0 %v6172_v11  ;;  %6003 = vmatprep.subr.mxu1 %v6172_v11  ;;  %v263_v12 = vld [vmem:[%s10022_s1 + $0x8] sm:$0xff]  ;;  %v266_v13 = vld [vmem:[%s10022_s1 + $0x20] sm:$0xff]  ;;  %vm6173_vm2 = vmmov 0   ;;  %v265_v15 = vld [vmem:[%s10022_s1 + $0x18] sm:$0xff]  ;;  %vm1007_vm4 = vcmask 138240   ;;  %vm1069_vm0 = vcmask 1041409  }
  0x26   : > { %5995 = vmatpush3.xpose.msk.msra.mxu0 %vm286_vm1, %v264_v9  ;;  %6004 = vmatpush3.xpose.msk.msra.mxu1 %vm286_vm1, %v267_v10  ;;  %v262_v14 = vld [vmem:[%s10022_s1] sm:$0xff]  ;;  %v254_v16 = vld [vmem:[%s6241_s27] sm:$0xff]  ;;  %v255_v17 = vld [vmem:[%s6241_s27 + $0x8] sm:$0xff]  ;;  %s6175_s6 = smov 2   ;;  %s6176_s7 = smov 4  }
  0x27   : > { %5996 = vmatprep.subr.mxu0 %v6172_v11  ;;  %6005 = vmatprep.subr.mxu1 %v6172_v11  ;;  %v270_v18 = vld [vmem:[%s10022_s1 + $0x40] sm:$0x1]  ;;  %v273_v19 = vld [vmem:[%s10022_s1 + $0x58] sm:$0x1]  ;;  %v272_v21 = vld [vmem:[%s10022_s1 + $0x50] sm:$0xff]  ;;  %s6177_s8 = smov 8  }
  0x28   : > { %6000 = vmatprep.mubr.msk.f32.mxu0 %vm6173_vm2, %v6172_v11  ;;  %6009 = vmatprep.mubr.msk.f32.mxu1 %vm6173_vm2, %v6172_v11  ;;  %v269_v20 = vld [vmem:[%s10022_s1 + $0x38] sm:$0xff]  ;;  %v268_v22 = vld [vmem:[%s10022_s1 + $0x30] sm:$0xff]  ;;  %v271_v23 = vld [vmem:[%s10022_s1 + $0x48] sm:$0xff]  ;;  %s6178_s9 = smov 16   ;;  %s6485_s15 = sshll.u32 %s6161_s11, 3 }
  0x29   : > { %v256_v24 = vld [vmem:[%s6241_s27 + $0x10] sm:$0xff]  ;;  %v257_v25 = vld [vmem:[%s6241_s27 + $0x18] sm:$0xff]  ;;  %v276_v26 = vld [vmem:[%s10022_s1 + $0x70] sm:$0x1]  ;;  %p1026_p10 = scmp.eq.s32.totalorder %s6485_s15, 0  ;;  %p1587_p11 = scmp.lt.s32.totalorder %s6485_s15, 21 }
  0x2a   : > { %5997 = vmatpush3.xpose.msk.msra.mxu0 %vm286_vm1, %v263_v12  ;;  %6006 = vmatpush3.xpose.msk.msra.mxu1 %vm286_vm1, %v266_v13  ;;  %v279_v27 = vld [vmem:[%s10022_s1 + $0x88] sm:$0x1]  ;;  %v278_v29 = vld [vmem:[%s10022_s1 + $0x80] sm:$0xff]  ;;  %v277_v31 = vld [vmem:[%s10022_s1 + $0x78] sm:$0xff]  ;;  %s1614_s19 = sadd.s32 1, %s6485_s15  ;;  %s2212_s23 = sadd.s32 2, %s6485_s15 }
  0x2b   : > { %5998 = vmatprep.subr.mxu0 %v6172_v11  ;;  %6007 = vmatprep.subr.mxu1 %v6172_v11  ;;  %v275_v28 = vld [vmem:[%s10022_s1 + $0x68] sm:$0xff]  ;;  %v274_v30 = vld [vmem:[%s10022_s1 + $0x60] sm:$0xff]  ;;  %v259_v33 = vld [vmem:[%s6241_s27 + $0x28] sm:$0xff]  ;;  %s1027_s16 = scalar_select %p1026_p10, 0.0, inf }
  0x2c   : > { %v258_v32 = vld [vmem:[%s6241_s27 + $0x20] sm:$0xff]  ;;  %v282_v34 = vld [vmem:[%s10022_s1 + $0xa0] sm:$0x1]  ;;  %v285_v35 = vld [vmem:[%s10022_s1 + $0xb8] sm:$0x1]  ;;  %p1623_p12 = scmp.eq.s32.totalorder %s1614_s19, 0 }
  0x2d   : > { %v281_v36 = vld [vmem:[%s10022_s1 + $0x98] sm:$0xff]  ;;  %v284_v37 = vld [vmem:[%s10022_s1 + $0xb0] sm:$0xff]  ;;  %v283_v39 = vld [vmem:[%s10022_s1 + $0xa8] sm:$0xff]  ;;  %s1588_s18 = scalar_select %p1587_p11, 1, 0 }
  0x2e   : > { %5999 = vmatpush3.xpose.msk.msra.mxu0 %vm286_vm1, %v262_v14  ;;  %6008 = vmatpush3.xpose.msk.msra.mxu1 %vm286_vm1, %v265_v15  ;;  %v280_v38 = vld [vmem:[%s10022_s1 + $0x90] sm:$0xff]  ;;  %v260_v40 = vld [vmem:[%s6241_s27 + $0x30] sm:$0xff]  ;;  %v261_v41 = vld [vmem:[%s6241_s27 + $0x38] sm:$0xff]  ;;  %s6174_s27 = smov 1   ;;  %p7376_p13 = scmp.lt.s32.totalorder %s1614_s19, 21 }
  0x2f   : > { %6012 = vmatprep.subr.mxu0 %v6172_v11  ;;  %6021 = vmatprep.subr.mxu1 %v6172_v11  ;;  %s1624_s20 = scalar_select %p1623_p12, 0.0, inf }
  0x30   : > { %s2201_s22 = scalar_select %p7376_p13, 1, 0 }
  0x31   : > { %6001 = vmatmul.mubr.msk.f32.vlgmr.msra.gmra.mxu0 %vm286_vm1, %v254_v16  ;;  %6010 = vmatmul.mubr.msk.f32.vlgmr.msra.gmra.mxu1 %vm286_vm1, %v255_v17  ;;  %p2221_p0 = scmp.eq.s32.totalorder %s2212_s23, 0  ;;  %p7862_p1 = scmp.lt.s32.totalorder %s2212_s23, 21 }
  0x32   : > { %6013 = vmatpush3.xpose.msk.msra.mxu0 %vm286_vm1, %v270_v18  ;;  %6022 = vmatpush3.xpose.msk.msra.mxu1 %vm286_vm1, %v273_v19  ;;  %s2810_s28 = sadd.s32 3, %s6485_s15  ;;  %s3408_s4 = sadd.s32 4, %s6485_s15 }
  0x33   : > { %6014 = vmatprep.subr.mxu0 %v6172_v11  ;;  %6023 = vmatprep.subr.mxu1 %v6172_v11  ;;  %s2222_s24 = scalar_select %p2221_p0, 0.0, inf }
  0x34   : > { %6018 = vmatprep.mubr.msk.f32.mxu0 %vm6173_vm2, %v6172_v11  ;;  %6027 = vmatprep.mubr.msk.f32.mxu1 %vm6173_vm2, %v6172_v11  ;;  %s2799_s26 = scalar_select %p7862_p1, 1, 0 }
  0x35   : > { %p2819_p2 = scmp.eq.s32.totalorder %s2810_s28, 0  ;;  %p8348_p3 = scmp.lt.s32.totalorder %s2810_s28, 21 }
  0x36   : > { %6015 = vmatpush3.xpose.msk.msra.mxu0 %vm286_vm1, %v269_v20  ;;  %6024 = vmatpush3.xpose.msk.msra.mxu1 %vm286_vm1, %v272_v21  ;;  %p3417_p4 = scmp.eq.s32.totalorder %s3408_s4, 0  ;;  %p8834_p5 = scmp.lt.s32.totalorder %s3408_s4, 21 }
  0x37   : > { %6016 = vmatprep.subr.mxu0 %v6172_v11  ;;  %6025 = vmatprep.subr.mxu1 %v6172_v11  ;;  %s2820_s29 = scalar_select %p2819_p2, 0.0, inf }
  0x38   : > { %s3397_s3 = scalar_select %p8348_p3, 1, 0 }
  0x39   : > { %s3418_s5 = scalar_select %p3417_p4, 0.0, inf }
  0x3a   : > { %6017 = vmatpush3.xpose.msk.msra.mxu0 %vm286_vm1, %v268_v22  ;;  %6026 = vmatpush3.xpose.msk.msra.mxu1 %vm286_vm1, %v271_v23  ;;  %s4006_s19 = sadd.s32 5, %s6485_s15  ;;  %s4604_s23 = sadd.s32 6, %s6485_s15 }
  0x3b   : > { %6030 = vmatprep.subr.mxu0 %v6172_v11  ;;  %6039 = vmatprep.subr.mxu1 %v6172_v11  ;;  %p4015_p6 = scmp.eq.s32.totalorder %s4006_s19, 0  ;;  %p9320_p7 = scmp.lt.s32.totalorder %s4006_s19, 21 }
  0x3c   : > { %p4613_p8 = scmp.eq.s32.totalorder %s4604_s23, 0  ;;  %p9806_p9 = scmp.lt.s32.totalorder %s4604_s23, 21 }
  0x3d   : > { %6019 = vmatmul.mubr.msk.f32.vlgmr.msra.gmra.mxu0 %vm286_vm1, %v256_v24  ;;  %6028 = vmatmul.mubr.msk.f32.vlgmr.msra.gmra.mxu1 %vm286_vm1, %v257_v25  ;;  %s5202_s28 = sadd.s32 7, %s6485_s15  ;;  %p5958_p12 = scmp.ne.s32.totalorder %s6161_s11, 2 }
  0x3e   : > { %6031 = vmatpush3.xpose.msk.msra.mxu0 %vm286_vm1, %v276_v26  ;;  %6040 = vmatpush3.xpose.msk.msra.mxu1 %vm286_vm1, %v279_v27  ;;  %p5211_p10 = scmp.eq.s32.totalorder %s5202_s28, 0  ;;  %p5788_p11 = scmp.lt.s32.totalorder %s5202_s28, 21 }
  0x3f   : > { %6032 = vmatprep.subr.mxu0 %v6172_v11  ;;  %6041 = vmatprep.subr.mxu1 %v6172_v11 }
  0x40   : > { %6036 = vmatprep.mubr.msk.f32.mxu0 %vm6173_vm2, %v6172_v11  ;;  %6045 = vmatprep.mubr.msk.f32.mxu1 %vm6173_vm2, %v6172_v11 }
  0x42   : > { %6033 = vmatpush3.xpose.msk.msra.mxu0 %vm286_vm1, %v275_v28  ;;  %6042 = vmatpush3.xpose.msk.msra.mxu1 %vm286_vm1, %v278_v29 }
  0x43   : > { %6034 = vmatprep.subr.mxu0 %v6172_v11  ;;  %6043 = vmatprep.subr.mxu1 %v6172_v11 }
  0x46   : > { %6035 = vmatpush3.xpose.msk.msra.mxu0 %vm286_vm1, %v274_v30  ;;  %6044 = vmatpush3.xpose.msk.msra.mxu1 %vm286_vm1, %v277_v31 }
  0x47   : > { %6048 = vmatprep.subr.mxu0 %v6172_v11  ;;  %6057 = vmatprep.subr.mxu1 %v6172_v11 }
  0x49   : > { %6037 = vmatmul.mubr.msk.f32.vlgmr.msra.gmra.mxu0 %vm286_vm1, %v258_v32  ;;  %6046 = vmatmul.mubr.msk.f32.vlgmr.msra.gmra.mxu1 %vm286_vm1, %v259_v33 }
  0x4a   : > { %6049 = vmatpush3.xpose.msk.msra.mxu0 %vm286_vm1, %v282_v34  ;;  %6058 = vmatpush3.xpose.msk.msra.mxu1 %vm286_vm1, %v285_v35 }
  0x4b   : > { %6050 = vmatprep.subr.mxu0 %v6172_v11  ;;  %6059 = vmatprep.subr.mxu1 %v6172_v11 }
  0x4c   : > { %6054 = vmatprep.mubr.msk.f32.mxu0 %vm6173_vm2, %v6172_v11  ;;  %6063 = vmatprep.mubr.msk.f32.mxu1 %vm6173_vm2, %v6172_v11 }
  0x4e   : > { %6051 = vmatpush3.xpose.msk.msra.mxu0 %vm286_vm1, %v281_v36  ;;  %6060 = vmatpush3.xpose.msk.msra.mxu1 %vm286_vm1, %v284_v37 }
  0x4f   : > { %6052 = vmatprep.subr.mxu0 %v6172_v11  ;;  %6061 = vmatprep.subr.mxu1 %v6172_v11 }
  0x52   : > { %6053 = vmatpush3.xpose.msk.msra.mxu0 %vm286_vm1, %v280_v38  ;;  %6062 = vmatpush3.xpose.msk.msra.mxu1 %vm286_vm1, %v283_v39 }
  0x55   : > { %6055 = vmatmul.mubr.msk.f32.vlgmr.msra.gmra.mxu0 %vm286_vm1, %v260_v40  ;;  %6064 = vmatmul.mubr.msk.f32.vlgmr.msra.gmra.mxu1 %vm286_vm1, %v261_v41 }
  0xf1   : > { %v365_v42 = vpop.f32.mrf.mxu0  ;;  %v447_v43 = vpop.f32.mrf.mxu1 }
  0xf2   : > { %v943_v44 = vmax.f32 %v365_v42, 0.0  ;;  %v944_v45 = vmax.f32 %v447_v43, 0.0 }
  0xf3   : > { %v6002_v46 = vpop.f32.mrf.mxu0  ;;  %v6011_v47 = vpop.f32.mrf.mxu1 }
  0xf4   : > { %6115 = vrsqrt.f32 %v943_v44  ;;  %vm953_vm3 = vcmp.eq.f32.partialorder %v943_v44, inf  ;;  %v956_v57 = vand.u32 2147483648, %v943_v44  ;;  %vm955_vm5 = vcmp.eq.f32.partialorder %v943_v44, 0.0 }
  0xf5   : > { %6117 = vrsqrt.f32 %v944_v45  ;;  %vm960_vm6 = vcmp.eq.f32.partialorder %v944_v45, inf  ;;  %v963_v60 = vand.u32 2147483648, %v944_v45  ;;  %vm962_vm7 = vcmp.eq.f32.partialorder %v944_v45, 0.0 }
  0xfd   : > { %v529_v48 = vpop.f32.mrf.mxu0  ;;  %v611_v49 = vpop.f32.mrf.mxu1 }
  0xfe   : > { %v945_v50 = vmax.f32 %v529_v48, 0.0  ;;  %v946_v51 = vmax.f32 %v611_v49, 0.0 }
  0xff   : > { %v6020_v52 = vpop.f32.mrf.mxu0  ;;  %v6029_v53 = vpop.f32.mrf.mxu1 }
 0x100   : > { %6119 = vrsqrt.f32 %v945_v50  ;;  %vm967_vm8 = vcmp.eq.f32.partialorder %v945_v50, inf  ;;  %v970_v9 = vand.u32 2147483648, %v945_v50  ;;  %vm969_vm9 = vcmp.eq.f32.partialorder %v945_v50, 0.0 }
 0x101   : > { %v6116_v54 = vpop.eup %6115  ;;  %6121 = vrsqrt.f32 %v946_v51  ;;  %vm974_vm10 = vcmp.eq.f32.partialorder %v946_v51, inf  ;;  %v977_v12 = vand.u32 2147483648, %v946_v51  ;;  %vm976_vm11 = vcmp.eq.f32.partialorder %v946_v51, 0.0 }
 0x102   : > { %v6118_v55 = vpop.eup %6117  ;;  %v952_v56 = vmul.f32 %v6116_v54, %v943_v44 }
 0x103   : > { %v959_v58 = vmul.f32 %v6118_v55, %v944_v45 }
 0x104   : > { %v954_v59 = vsel %vm953_vm3, %v943_v44, %v952_v56 }
 0x105   : > { %v957_v61 = vsel %vm955_vm5, %v956_v57, %v954_v59  ;;  %v961_v62 = vsel %vm960_vm6, %v944_v45, %v959_v58  ;;  %vm1072_vm6 = vcmask 1042434  }
 0x106   : > { %1008 = vst.msk [vmem:[#allocation3] sm:$0xff] %vm1007_vm4, %v957_v61  ;;  %v964_v63 = vsel %vm962_vm7, %v963_v60, %v961_v62  ;;  %vm1075_vm7 = vcmask 1043459  }
 0x107   : > { %1009 = vst.msk [vmem:[#allocation3 + $0x8] sm:$0xff] %vm1007_vm4, %v964_v63 }
 0x109   : > { %v693_v0 = vpop.f32.mrf.mxu0  ;;  %v775_v1 = vpop.f32.mrf.mxu1 }
 0x10a   : > { %v947_v2 = vmax.f32 %v693_v0, 0.0  ;;  %v948_v3 = vmax.f32 %v775_v1, 0.0 }
 0x10b   : > { %v6038_v4 = vpop.f32.mrf.mxu0  ;;  %v6047_v5 = vpop.f32.mrf.mxu1 }
 0x10c   : > { %6123 = vrsqrt.f32 %v947_v2  ;;  %vm981_vm12 = vcmp.eq.f32.partialorder %v947_v2, inf  ;;  %v984_v25 = vand.u32 2147483648, %v947_v2  ;;  %vm983_vm13 = vcmp.eq.f32.partialorder %v947_v2, 0.0 }
 0x10d   : > { %v6120_v6 = vpop.eup %6119  ;;  %6125 = vrsqrt.f32 %v948_v3  ;;  %vm988_vm14 = vcmp.eq.f32.partialorder %v948_v3, inf  ;;  %v991_v28 = vand.u32 2147483648, %v948_v3  ;;  %vm990_vm15 = vcmp.eq.f32.partialorder %v948_v3, 0.0  ;;  %v6413_v48 = vld [vmem:[#allocation3] sm:$0x1] }
 0x10e   : > { %v6122_v7 = vpop.eup %6121  ;;  %v966_v8 = vmul.f32 %v6120_v6, %v945_v50  ;;  %v6402_v32 = vld [vmem:[#allocation3 + $0x8] sm:$0x1] }
 0x10f   : > { %v973_v10 = vmul.f32 %v6122_v7, %v946_v51  ;;  %v1068_v37 = vrot.slane %v6402_v32, 7 }
 0x110   : > { %v968_v11 = vsel %vm967_vm8, %v945_v50, %v966_v8  ;;  %vm1078_vm8 = vcmask 1044484  }
 0x111   : > { %v971_v13 = vsel %vm969_vm9, %v970_v9, %v968_v11  ;;  %v975_v14 = vsel %vm974_vm10, %v946_v51, %v973_v10  ;;  %v1070_v49 = vsel %vm1069_vm0, %v1068_v37, %v6413_v48  ;;  %vm1081_vm9 = vcmask 1045509  }
 0x112   : > { %1010 = vst.msk [vmem:[#allocation3 + $0x10] sm:$0xff] %vm1007_vm4, %v971_v13  ;;  %v978_v15 = vsel %vm976_vm11, %v977_v12, %v975_v14  ;;  %vm1084_vm10 = vcmask 1046534   ;;  %vm1087_vm11 = vcmask 1047559  }
 0x113   : > { %1011 = vst.msk [vmem:[#allocation3 + $0x18] sm:$0xff] %vm1007_vm4, %v978_v15 }
 0x115   : > { %v857_v16 = vpop.f32.mrf.mxu0  ;;  %v939_v17 = vpop.f32.mrf.mxu1 }
 0x116   : > { %v949_v18 = vmax.f32 %v857_v16, 0.0  ;;  %v950_v19 = vmax.f32 %v939_v17, 0.0 }
 0x117   : > { %v6056_v20 = vpop.f32.mrf.mxu0  ;;  %v6065_v21 = vpop.f32.mrf.mxu1 }
 0x118   : > { %6127 = vrsqrt.f32 %v949_v18  ;;  %vm995_vm1 = vcmp.eq.f32.partialorder %v949_v18, inf  ;;  %vm997_vm2 = vcmp.eq.f32.partialorder %v949_v18, 0.0  ;;  %v998_v38 = vand.u32 2147483648, %v949_v18 }
 0x119   : > { %v6124_v22 = vpop.eup %6123  ;;  %6129 = vrsqrt.f32 %v950_v19  ;;  %v6404_v34 = vld [vmem:[#allocation3 + $0x10] sm:$0x1]  ;;  %vm1002_vm3 = vcmp.eq.f32.partialorder %v950_v19, inf  ;;  %v1005_v41 = vand.u32 2147483648, %v950_v19  ;;  %vm1004_vm5 = vcmp.eq.f32.partialorder %v950_v19, 0.0 }
 0x11a   : > { %v6126_v23 = vpop.eup %6125  ;;  %v980_v24 = vmul.f32 %v6124_v22, %v947_v2  ;;  %v6407_v42 = vld [vmem:[#allocation3 + $0x18] sm:$0x1]  ;;  %v1071_v43 = vrot.slane %v6404_v34, 6 }
 0x11b   : > { %v987_v26 = vmul.f32 %v6126_v23, %v948_v3  ;;  %v1074_v50 = vrot.slane %v6407_v42, 5 }
 0x11c   : > { %v982_v27 = vsel %vm981_vm12, %v947_v2, %v980_v24  ;;  %v1073_v52 = vsel %vm1072_vm6, %v1071_v43, %v1070_v49  ;;  %vm1033_vm12 = vcmask 7168  }
 0x11d   : > { %v985_v29 = vsel %vm983_vm13, %v984_v25, %v982_v27  ;;  %v989_v30 = vsel %vm988_vm14, %v948_v3, %v987_v26  ;;  %v1076_v54 = vsel %vm1075_vm7, %v1074_v50, %v1073_v52  ;;  %vm1142_vm13 = vcmask 15360  }
 0x11e   : > { %1012 = vst.msk [vmem:[#allocation3 + $0x20] sm:$0xff] %vm1007_vm4, %v985_v29  ;;  %v992_v31 = vsel %vm990_vm15, %v991_v28, %v989_v30  ;;  %vm1193_vm14 = vcmask 31744   ;;  %vm1244_vm15 = vcmask 64512  }
 0x11f   : > { %1013 = vst.msk [vmem:[#allocation3 + $0x28] sm:$0xff] %vm1007_vm4, %v992_v31  ;;  %v6453_v31 = vld [vmem:[#allocation2] sm:$0xff] }
 0x125   : > { %v6128_v33 = vpop.eup %6127  ;;  %v6410_v46 = vld [vmem:[#allocation3 + $0x20] sm:$0x1] }
 0x126   : > { %v6130_v35 = vpop.eup %6129  ;;  %v994_v36 = vmul.f32 %v6128_v33, %v949_v18  ;;  %v6419_v51 = vld [vmem:[#allocation3 + $0x28] sm:$0x1]  ;;  %v1077_v53 = vrot.slane %v6410_v46, 4 }
 0x127   : > { %v1001_v39 = vmul.f32 %v6130_v35, %v950_v19  ;;  %v1080_v55 = vrot.slane %v6419_v51, 3 }
 0x128   : > { %v996_v40 = vsel %vm995_vm1, %v949_v18, %v994_v36  ;;  %v1079_v56 = vsel %vm1078_vm8, %v1077_v53, %v1076_v54  ;;  %vm1295_vm1 = vcmask 130048  }
 0x129   : > { %v999_v44 = vsel %vm997_vm2, %v998_v38, %v996_v40  ;;  %v1003_v45 = vsel %vm1002_vm3, %v950_v19, %v1001_v39  ;;  %v1082_v60 = vsel %vm1081_vm9, %v1080_v55, %v1079_v56 }
 0x12a   : > { %1014 = vst.msk [vmem:[#allocation3 + $0x30] sm:$0xff] %vm1007_vm4, %v999_v44  ;;  %v1006_v47 = vsel %vm1004_vm5, %v1005_v41, %v1003_v45 }
 0x12b   : > { %1015 = vst.msk [vmem:[#allocation3 + $0x38] sm:$0xff] %vm1007_vm4, %v1006_v47 }
 0x131   : > { %v6426_v57 = vld [vmem:[#allocation3 + $0x30] sm:$0x1] }
 0x132   : > { %v6428_v58 = vld [vmem:[#allocation3 + $0x38] sm:$0x1]  ;;  %v1083_v59 = vrot.slane %v6426_v57, 2 }
 0x133   : > { %v1086_v61 = vrot.slane %v6428_v58, 1 }
 0x134   : > { %v1085_v62 = vsel %vm1084_vm10, %v1083_v59, %v1082_v60 }
 0x135   : > { %v1088_v63 = vsel %vm1087_vm11, %v1086_v61, %v1085_v62 }
 0x136   : > { %1089 = vrot.lane.b32.xlu0 %v1088_v63, %s6174_s27 }
 0x1a8   : > { %v1090_v0 = vpop.permute.xlu0 %1089 }
 0x1a9   : > { %v1092_v1 = vsel %vm1033_vm12, 0.0, %v1090_v0 }
 0x1aa   : > { %v1094_v2 = vrot.slane %v1092_v1, 1  ;;  %v1095_v3 = vrot.slane %v1092_v1, 2  ;;  %v1096_v4 = vrot.slane %v1092_v1, 3  ;;  %v1097_v5 = vrot.slane %v1092_v1, 4 }
 0x1ab   : > { %v1098_v6 = vrot.slane %v1092_v1, 5  ;;  %v1099_v7 = vrot.slane %v1092_v1, 6  ;;  %v1100_v10 = vrot.slane %v1092_v1, 7  ;;  %v1109_v13 = vadd.f32 %v1092_v1, %v6413_v48 }
 0x1ac   : > { %v1110_v8 = vadd.f32 %v1094_v2, %v6402_v32  ;;  %v1111_v9 = vadd.f32 %v1095_v3, %v6404_v34  ;;  %v1112_v11 = vadd.f32 %v1096_v4, %v6407_v42  ;;  %v1113_v12 = vadd.f32 %v1097_v5, %v6410_v46 }
 0x1ad   : > { %v1114_v14 = vadd.f32 %v1098_v6, %v6419_v51  ;;  %v1115_v17 = vadd.f32 %v1099_v7, %v6426_v57  ;;  %v1116_v18 = vadd.f32 %v1100_v10, %v6428_v58 }
 0x1ae   : > { %v1125_v15 = vrot.slane %v1110_v8, 7  ;;  %v1127_v16 = vrot.slane %v1111_v9, 6  ;;  %v1129_v20 = vrot.slane %v1112_v11, 5  ;;  %v1131_v22 = vrot.slane %v1113_v12, 4 }
 0x1af   : > { %v1133_v24 = vrot.slane %v1114_v14, 3  ;;  %v1135_v26 = vrot.slane %v1115_v17, 2  ;;  %v1137_v28 = vrot.slane %v1116_v18, 1 }
 0x1b0   : > { %v1126_v19 = vsel %vm1069_vm0, %v1125_v15, %v1109_v13 }
 0x1b1   : > { %v1128_v21 = vsel %vm1072_vm6, %v1127_v16, %v1126_v19 }
 0x1b2   : > { %v1130_v23 = vsel %vm1075_vm7, %v1129_v20, %v1128_v21 }
 0x1b3   : > { %v1132_v25 = vsel %vm1078_vm8, %v1131_v22, %v1130_v23 }
 0x1b4   : > { %v1134_v27 = vsel %vm1081_vm9, %v1133_v24, %v1132_v25 }
 0x1b5   : > { %v1136_v29 = vsel %vm1084_vm10, %v1135_v26, %v1134_v27 }
 0x1b6   : > { %v1138_v30 = vsel %vm1087_vm11, %v1137_v28, %v1136_v29 }
 0x1b7   : > { %1139 = vrot.lane.b32.xlu0 %v1138_v30, %s6175_s6 }
 0x1bb   : > { %1030 = vrot.lane.b32.xlu0 %v6453_v31, %s6174_s27 }
 0x229   : > { %v1140_v33 = vpop.permute.xlu0 %1139 }
 0x22a   : > { %v1143_v35 = vsel %vm1142_vm13, 0.0, %v1140_v33 }
 0x22b   : > { %v1145_v36 = vrot.slane %v1143_v35, 1  ;;  %v1146_v37 = vrot.slane %v1143_v35, 2  ;;  %v1147_v38 = vrot.slane %v1143_v35, 3  ;;  %v1148_v39 = vrot.slane %v1143_v35, 4 }
 0x22c   : > { %v1149_v40 = vrot.slane %v1143_v35, 5  ;;  %v1150_v41 = vrot.slane %v1143_v35, 6  ;;  %v1151_v44 = vrot.slane %v1143_v35, 7  ;;  %v1160_v50 = vadd.f32 %v1143_v35, %v1109_v13 }
 0x22d   : > { %v1161_v43 = vadd.f32 %v1145_v36, %v1110_v8  ;;  %v1162_v45 = vadd.f32 %v1146_v37, %v1111_v9  ;;  %v1163_v47 = vadd.f32 %v1147_v38, %v1112_v11  ;;  %v1164_v49 = vadd.f32 %v1148_v39, %v1113_v12 }
 0x22e   : > { %v1165_v52 = vadd.f32 %v1149_v40, %v1114_v14  ;;  %v1166_v55 = vadd.f32 %v1150_v41, %v1115_v17  ;;  %v1167_v56 = vadd.f32 %v1151_v44, %v1116_v18 }
 0x22f   : > { %v1176_v53 = vrot.slane %v1161_v43, 7  ;;  %v1178_v54 = vrot.slane %v1162_v45, 6  ;;  %v1180_v60 = vrot.slane %v1163_v47, 5  ;;  %v1182_v62 = vrot.slane %v1164_v49, 4 }
 0x230   : > { %v1184_v0 = vrot.slane %v1165_v52, 3  ;;  %v1186_v2 = vrot.slane %v1166_v55, 2  ;;  %v1188_v4 = vrot.slane %v1167_v56, 1 }
 0x231   : > { %v1177_v59 = vsel %vm1069_vm0, %v1176_v53, %v1160_v50 }
 0x232   : > { %v1179_v61 = vsel %vm1072_vm6, %v1178_v54, %v1177_v59 }
 0x233   : > { %v1181_v63 = vsel %vm1075_vm7, %v1180_v60, %v1179_v61 }
 0x234   : > { %v1183_v1 = vsel %vm1078_vm8, %v1182_v62, %v1181_v63 }
 0x235   : > { %v1185_v3 = vsel %vm1081_vm9, %v1184_v0, %v1183_v1 }
 0x236   : > { %v1187_v5 = vsel %vm1084_vm10, %v1186_v2, %v1185_v3 }
 0x237   : > { %v1189_v6 = vsel %vm1087_vm11, %v1188_v4, %v1187_v5 }
 0x238   : > { %1190 = vrot.lane.b32.xlu1 %v1189_v6, %s6176_s7 }
 0x2aa   : > { %v1191_v7 = vpop.permute.xlu1 %1190 }
 0x2ab   : > { %v1194_v8 = vsel %vm1193_vm14, 0.0, %v1191_v7 }
 0x2ac   : > { %v1196_v9 = vrot.slane %v1194_v8, 1  ;;  %v1197_v10 = vrot.slane %v1194_v8, 2  ;;  %v1198_v11 = vrot.slane %v1194_v8, 3  ;;  %v1199_v12 = vrot.slane %v1194_v8, 4 }
 0x2ad   : > { %v1200_v13 = vrot.slane %v1194_v8, 5  ;;  %v1201_v14 = vrot.slane %v1194_v8, 6  ;;  %v1202_v17 = vrot.slane %v1194_v8, 7  ;;  %v1211_v20 = vadd.f32 %v1194_v8, %v1160_v50 }
 0x2ae   : > { %v1212_v15 = vadd.f32 %v1196_v9, %v1161_v43  ;;  %v1213_v16 = vadd.f32 %v1197_v10, %v1162_v45  ;;  %v1214_v18 = vadd.f32 %v1198_v11, %v1163_v47  ;;  %v1215_v19 = vadd.f32 %v1199_v12, %v1164_v49 }
 0x2af   : > { %v1216_v21 = vadd.f32 %v1200_v13, %v1165_v52  ;;  %v1217_v24 = vadd.f32 %v1201_v14, %v1166_v55  ;;  %v1218_v25 = vadd.f32 %v1202_v17, %v1167_v56  ;;  %v1028_v14 = vstv %s1027_s16 }
 0x2b0   : > { %v1227_v22 = vrot.slane %v1212_v15, 7  ;;  %v1229_v23 = vrot.slane %v1213_v16, 6  ;;  %v1231_v27 = vrot.slane %v1214_v18, 5  ;;  %v1233_v29 = vrot.slane %v1215_v19, 4 }
 0x2b1   : > { %v1235_v33 = vrot.slane %v1216_v21, 3  ;;  %v1237_v36 = vrot.slane %v1217_v24, 2  ;;  %v1239_v38 = vrot.slane %v1218_v25, 1 }
 0x2b2   : > { %v1228_v26 = vsel %vm1069_vm0, %v1227_v22, %v1211_v20 }
 0x2b3   : > { %v1230_v28 = vsel %vm1072_vm6, %v1229_v23, %v1228_v26 }
 0x2b4   : > { %v1232_v30 = vsel %vm1075_vm7, %v1231_v27, %v1230_v28 }
 0x2b5   : > { %v1234_v35 = vsel %vm1078_vm8, %v1233_v29, %v1232_v30 }
 0x2b6   : > { %v1236_v37 = vsel %vm1081_vm9, %v1235_v33, %v1234_v35 }
 0x2b7   : > { %v1238_v39 = vsel %vm1084_vm10, %v1237_v36, %v1236_v37 }
 0x2b8   : > { %v1240_v40 = vsel %vm1087_vm11, %v1239_v38, %v1238_v39 }
 0x2b9   : > { %1241 = vrot.lane.b32.xlu1 %v1240_v40, %s6177_s8 }
 0x32b   : > { %v1242_v41 = vpop.permute.xlu1 %1241 }
 0x32c   : > { %v1245_v43 = vsel %vm1244_vm15, 0.0, %v1242_v41 }
 0x32d   : > { %v1247_v44 = vrot.slane %v1245_v43, 1  ;;  %v1248_v45 = vrot.slane %v1245_v43, 2  ;;  %v1249_v47 = vrot.slane %v1245_v43, 3  ;;  %v1250_v49 = vrot.slane %v1245_v43, 4 }
 0x32e   : > { %v1251_v50 = vrot.slane %v1245_v43, 5  ;;  %v1252_v52 = vrot.slane %v1245_v43, 6  ;;  %v1253_v55 = vrot.slane %v1245_v43, 7  ;;  %v1262_v60 = vadd.f32 %v1245_v43, %v1211_v20 }
 0x32f   : > { %v1263_v53 = vadd.f32 %v1247_v44, %v1212_v15  ;;  %v1264_v54 = vadd.f32 %v1248_v45, %v1213_v16  ;;  %v1265_v56 = vadd.f32 %v1249_v47, %v1214_v18  ;;  %v1266_v59 = vadd.f32 %v1250_v49, %v1215_v19  ;;  %v1031_v15 = vpop.permute.xlu0 %1030  ;;  %v6490_v18 = vld [vmem:[#allocation3 + $0x9] sm:$0x1] }
 0x330   : > { %v1267_v61 = vadd.f32 %v1251_v50, %v1216_v21  ;;  %v1268_v0 = vadd.f32 %v1252_v52, %v1217_v24  ;;  %v1269_v1 = vadd.f32 %v1253_v55, %v1218_v25  ;;  %v1034_v16 = vsel %vm1033_vm12, %v1028_v14, %v1031_v15  ;;  %v6493_v21 = vld [vmem:[#allocation3 + $0x11] sm:$0x1]  ;;  %v6495_v24 = vld [vmem:[#allocation3 + $0x1] sm:$0x1] }
 0x331   : > { %v1278_v62 = vrot.slane %v1263_v53, 7  ;;  %v1280_v63 = vrot.slane %v1264_v54, 6  ;;  %v1282_v3 = vrot.slane %v1265_v56, 5  ;;  %v1284_v5 = vrot.slane %v1266_v59, 4 }
 0x332   : > { %v1286_v7 = vrot.slane %v1267_v61, 3  ;;  %v1288_v9 = vrot.slane %v1268_v0, 2  ;;  %v1290_v11 = vrot.slane %v1269_v1, 1  ;;  %v1035_v17 = vmin.f32 %v6453_v31, %v1034_v16 }
 0x333   : > { %v1279_v2 = vsel %vm1069_vm0, %v1278_v62, %v1262_v60  ;;  %v1692_v19 = vrot.slane %v6490_v18, 7  ;;  %v1694_v27 = vrot.slane %v6493_v21, 6 }
 0x334   : > { %v1281_v4 = vsel %vm1072_vm6, %v1280_v63, %v1279_v2  ;;  %v1037_v20 = vrot.slane %v1035_v17, 1  ;;  %v1038_v22 = vrot.slane %v1035_v17, 2  ;;  %v1039_v23 = vrot.slane %v1035_v17, 3 }
 0x335   : > { %v1283_v6 = vsel %vm1075_vm7, %v1282_v3, %v1281_v4  ;;  %v1052_v25 = vadd.f32 %v1035_v17, %v6413_v48  ;;  %v1693_v26 = vsel %vm1069_vm0, %v1692_v19, %v6495_v24  ;;  %v1040_v30 = vrot.slane %v1035_v17, 4 }
 0x336   : > { %v1285_v8 = vsel %vm1078_vm8, %v1284_v5, %v1283_v6  ;;  %v1053_v29 = vadd.f32 %v1037_v20, %v6402_v32  ;;  %v1041_v33 = vrot.slane %v1035_v17, 5  ;;  %v1042_v35 = vrot.slane %v1035_v17, 6 }
 0x337   : > { %v1287_v10 = vsel %vm1081_vm9, %v1286_v7, %v1285_v8  ;;  %v1043_v37 = vrot.slane %v1035_v17, 7  ;;  %v1054_v38 = vadd.f32 %v1038_v22, %v6404_v34  ;;  %v1055_v39 = vadd.f32 %v1039_v23, %v6407_v42  ;;  %v6515_v34 = vld [vmem:[#allocation3 + $0x19] sm:$0x1]  ;;  %v6537_v7 = vld [vmem:[#allocation3 + $0x29] sm:$0x1] }
 0x338   : > { %v1289_v12 = vsel %vm1084_vm10, %v1288_v9, %v1287_v10  ;;  %v1056_v42 = vadd.f32 %v1040_v30, %v6410_v46  ;;  %v1057_v62 = vadd.f32 %v1041_v33, %v6419_v51  ;;  %v1058_v3 = vadd.f32 %v1042_v35, %v6426_v57  ;;  %v6550_v22 = vld [vmem:[#allocation3 + $0x39] sm:$0x1] }
 0x339   : > { %v1291_v13 = vsel %vm1087_vm11, %v1290_v11, %v1289_v12  ;;  %v1059_v46 = vadd.f32 %v1043_v37, %v6428_v58  ;;  %v1695_v8 = vsel %vm1072_vm6, %v1694_v27, %v1693_v26  ;;  %v6543_v11 = vld [vmem:[#allocation3 + $0x31] sm:$0x1]  ;;  %v1700_v17 = vrot.slane %v6537_v7, 3 }
 0x33a   : > { %1292 = vrot.lane.b32.xlu1 %v1291_v13, %s6178_s9  ;;  %v1704_v33 = vrot.slane %v6550_v22, 1 }
 0x3ac   : > { %v1293_v28 = vpop.permute.xlu1 %1292 }
 0x3ad   : > { %v1296_v36 = vsel %vm1295_vm1, 0.0, %v1293_v28 }
 0x3ae   : > { %v1298_v40 = vrot.slane %v1296_v36, 1  ;;  %v1299_v48 = vrot.slane %v1296_v36, 2  ;;  %v1300_v41 = vrot.slane %v1296_v36, 3  ;;  %v1301_v43 = vrot.slane %v1296_v36, 4 }
 0x3af   : > { %v1302_v44 = vrot.slane %v1296_v36, 5  ;;  %v6505_v45 = vadd.f32 %v1296_v36, %v1262_v60  ;;  %v1303_v47 = vrot.slane %v1296_v36, 6  ;;  %v1304_v49 = vrot.slane %v1296_v36, 7 }
 0x3b0   : > { %v6507_v32 = vadd.f32 %v1298_v40, %v1263_v53  ;;  %v6509_v50 = vadd.f32 %v1299_v48, %v1264_v54  ;;  %v6511_v52 = vadd.f32 %v1300_v41, %v1265_v56  ;;  %v6513_v55 = vadd.f32 %v1301_v43, %v1266_v59  ;;  %v6528_v59 = vld [vmem:[#allocation3 + $0x21] sm:$0x1] }
 0x3b1   : > { %v6519_v63 = vadd.f32 %v1302_v44, %v1267_v61  ;;  %v6521_v60 = vadd.f32 %v1303_v47, %v1268_v0  ;;  %v6524_v53 = vadd.f32 %v1304_v49, %v1269_v1  ;;  %v1696_v61 = vrot.slane %v6515_v34, 5 }
 0x3b2   : > { %v1322_v2 = vsub.f32 %v1053_v29, %v6507_v32  ;;  %v1323_v54 = vsub.f32 %v1054_v38, %v6509_v50  ;;  %v1324_v56 = vsub.f32 %v1055_v39, %v6511_v52  ;;  %v1325_v51 = vsub.f32 %v1056_v42, %v6513_v55 }
 0x3b3   : > { %v1321_v0 = vsub.f32 %v1052_v25, %v6505_v45  ;;  %v1326_v4 = vsub.f32 %v1057_v62, %v6519_v63  ;;  %v1327_v6 = vsub.f32 %v1058_v3, %v6521_v60  ;;  %v1698_v57 = vrot.slane %v6528_v59, 4 }
 0x3b4   : > { %v1337_v1 = vrot.slane %v1322_v2, 7  ;;  %v1339_v5 = vrot.slane %v1323_v54, 6  ;;  %v1328_v58 = vsub.f32 %v1059_v46, %v6524_v53  ;;  %v1341_v10 = vrot.slane %v1324_v56, 5 }
 0x3b5   : > { %v1343_v13 = vrot.slane %v1325_v51, 4  ;;  %v1345_v15 = vrot.slane %v1326_v4, 3  ;;  %v1697_v16 = vsel %vm1075_vm7, %v1696_v61, %v1695_v8  ;;  %v1347_v20 = vrot.slane %v1327_v6, 2 }
 0x3b6   : > { %v1338_v9 = vsel %vm1069_vm0, %v1337_v1, %v1321_v0  ;;  %v1699_v23 = vsel %vm1078_vm8, %v1698_v57, %v1697_v16  ;;  %v1702_v25 = vrot.slane %v6543_v11, 2  ;;  %v1349_v27 = vrot.slane %v1328_v58, 1 }
 0x3b7   : > { %v1340_v12 = vsel %vm1072_vm6, %v1339_v5, %v1338_v9  ;;  %v1701_v30 = vsel %vm1081_vm9, %v1700_v17, %v1699_v23 }
 0x3b8   : > { %v1342_v14 = vsel %vm1075_vm7, %v1341_v10, %v1340_v12  ;;  %v1703_v35 = vsel %vm1084_vm10, %v1702_v25, %v1701_v30 }
 0x3b9   : > { %v1344_v19 = vsel %vm1078_vm8, %v1343_v13, %v1342_v14  ;;  %v1705_v36 = vsel %vm1087_vm11, %v1704_v33, %v1703_v35 }
 0x3ba   : > { %v1346_v26 = vsel %vm1081_vm9, %v1345_v15, %v1344_v19 }
 0x3bb   : > { %v1348_v28 = vsel %vm1084_vm10, %v1347_v20, %v1346_v26 }
 0x3bc   : > { %v1350_v29 = vsel %vm1087_vm11, %v1349_v27, %v1348_v28 }
 0x3bd   : > { %1351 = vrot.lane.b32.xlu0 %v1350_v29, %s6174_s27 }
 0x3c1   : > { %1706 = vrot.lane.b32.xlu0 %v1705_v36, %s6174_s27 }
 0x42f   : > { %v1352_v37 = vpop.permute.xlu0 %1351 }
 0x430   : > { %v1354_v38 = vsel %vm1033_vm12, inf, %v1352_v37 }
 0x431   : > { %v1356_v39 = vrot.slane %v1354_v38, 1  ;;  %v1357_v40 = vrot.slane %v1354_v38, 2  ;;  %v1358_v48 = vrot.slane %v1354_v38, 3  ;;  %v1359_v41 = vrot.slane %v1354_v38, 4 }
 0x432   : > { %v1360_v43 = vrot.slane %v1354_v38, 5  ;;  %v1361_v44 = vrot.slane %v1354_v38, 6  ;;  %v1362_v47 = vrot.slane %v1354_v38, 7  ;;  %v6572_v61 = vmin.f32 %v1321_v0, %v1354_v38 }
 0x433   : > { %v6564_v49 = vmin.f32 %v1322_v2, %v1356_v39  ;;  %v6566_v42 = vmin.f32 %v1323_v54, %v1357_v40  ;;  %v1707_v62 = vpop.permute.xlu0 %1706  ;;  %v6568_v3 = vmin.f32 %v1324_v56, %v1358_v48  ;;  %v6570_v46 = vmin.f32 %v1325_v51, %v1359_v41 }
 0x434   : > { %v1709_v1 = vsel %vm1033_vm12, 0.0, %v1707_v62  ;;  %v6575_v5 = vmin.f32 %v1326_v4, %v1360_v43  ;;  %v6577_v8 = vmin.f32 %v1327_v6, %v1361_v44  ;;  %v6579_v2 = vmin.f32 %v1328_v58, %v1362_v47 }
 0x435   : > { %v1711_v57 = vrot.slane %v1709_v1, 1  ;;  %v1712_v9 = vrot.slane %v1709_v1, 2  ;;  %v1713_v10 = vrot.slane %v1709_v1, 3  ;;  %v1714_v54 = vrot.slane %v1709_v1, 4 }
 0x436   : > { %v6582_v12 = vadd.f32 %v1709_v1, %v6495_v24  ;;  %v1387_v56 = vrot.slane %v6564_v49, 7  ;;  %v1389_v51 = vrot.slane %v6566_v42, 6  ;;  %v1391_v6 = vrot.slane %v6568_v3, 5 }
 0x437   : > { %v6587_v0 = vadd.f32 %v1711_v57, %v6490_v18  ;;  %v6590_v4 = vadd.f32 %v1712_v9, %v6493_v21  ;;  %v1393_v13 = vrot.slane %v6570_v46, 4  ;;  %v1395_v14 = vrot.slane %v6575_v5, 3 }
 0x438   : > { %v1388_v58 = vsel %vm1069_vm0, %v1387_v56, %v6572_v61  ;;  %v1397_v15 = vrot.slane %v6577_v8, 2  ;;  %v1715_v16 = vrot.slane %v1709_v1, 5  ;;  %v1716_v19 = vrot.slane %v1709_v1, 6 }
 0x439   : > { %v1390_v17 = vsel %vm1072_vm6, %v1389_v51, %v1388_v58  ;;  %v1717_v20 = vrot.slane %v1709_v1, 7  ;;  %v6600_v23 = vadd.f32 %v1713_v10, %v6515_v34  ;;  %v6604_v26 = vadd.f32 %v1714_v54, %v6528_v59 }
 0x43a   : > { %v1392_v25 = vsel %vm1075_vm7, %v1391_v6, %v1390_v17  ;;  %v6607_v27 = vadd.f32 %v1715_v16, %v6537_v7  ;;  %v1742_v28 = vrot.slane %v6587_v0, 7  ;;  %v1399_v30 = vrot.slane %v6579_v2, 1 }
 0x43b   : > { %v1394_v29 = vsel %vm1078_vm8, %v1393_v13, %v1392_v25  ;;  %v6613_v33 = vadd.f32 %v1716_v19, %v6543_v11  ;;  %v1744_v35 = vrot.slane %v6590_v4, 6  ;;  %v6618_v37 = vadd.f32 %v1717_v20, %v6550_v22 }
 0x43c   : > { %v1396_v36 = vsel %vm1081_vm9, %v1395_v14, %v1394_v29  ;;  %v1743_v38 = vsel %vm1069_vm0, %v1742_v28, %v6582_v12  ;;  %v1746_v39 = vrot.slane %v6600_v23, 5  ;;  %v1748_v41 = vrot.slane %v6604_v26, 4 }
 0x43d   : > { %v1398_v40 = vsel %vm1084_vm10, %v1397_v15, %v1396_v36  ;;  %v1745_v48 = vsel %vm1072_vm6, %v1744_v35, %v1743_v38  ;;  %v1750_v47 = vrot.slane %v6607_v27, 3  ;;  %v1752_v1 = vrot.slane %v6613_v33, 2 }
 0x43e   : > { %v1400_v43 = vsel %vm1087_vm11, %v1399_v30, %v1398_v40  ;;  %v1747_v44 = vsel %vm1075_vm7, %v1746_v39, %v1745_v48  ;;  %v1754_v9 = vrot.slane %v6618_v37, 1 }
 0x43f   : > { %1401 = vrot.lane.b32.xlu1 %v1400_v43, %s6175_s6  ;;  %v1749_v62 = vsel %vm1078_vm8, %v1748_v41, %v1747_v44 }
 0x440   : > { %v1751_v57 = vsel %vm1081_vm9, %v1750_v47, %v1749_v62 }
 0x441   : > { %v1753_v10 = vsel %vm1084_vm10, %v1752_v1, %v1751_v57 }
 0x442   : > { %v1755_v54 = vsel %vm1087_vm11, %v1754_v9, %v1753_v10 }
 0x443   : > { %1756 = vrot.lane.b32.xlu0 %v1755_v54, %s6175_s6 }
 0x4b1   : > { %v1402_v56 = vpop.permute.xlu1 %1401 }
 0x4b2   : > { %v1404_v51 = vsel %vm1142_vm13, inf, %v1402_v56 }
 0x4b3   : > { %v1406_v6 = vrot.slane %v1404_v51, 1  ;;  %v1407_v13 = vrot.slane %v1404_v51, 2  ;;  %v1408_v58 = vrot.slane %v1404_v51, 3  ;;  %v1409_v14 = vrot.slane %v1404_v51, 4 }
 0x4b4   : > { %v1410_v15 = vrot.slane %v1404_v51, 5  ;;  %v1411_v16 = vrot.slane %v1404_v51, 6  ;;  %v1412_v17 = vrot.slane %v1404_v51, 7  ;;  %v6651_v30 = vmin.f32 %v6572_v61, %v1404_v51 }
 0x4b5   : > { %v6639_v19 = vmin.f32 %v6564_v49, %v1406_v6  ;;  %v6642_v20 = vmin.f32 %v6566_v42, %v1407_v13  ;;  %v1757_v25 = vpop.permute.xlu0 %1756  ;;  %v6645_v28 = vmin.f32 %v6568_v3, %v1408_v58  ;;  %v6648_v29 = vmin.f32 %v6570_v46, %v1409_v14 }
 0x4b6   : > { %v1759_v35 = vsel %vm1142_vm13, 0.0, %v1757_v25  ;;  %v6655_v36 = vmin.f32 %v6575_v5, %v1410_v15  ;;  %v6658_v49 = vmin.f32 %v6577_v8, %v1411_v16  ;;  %v6661_v3 = vmin.f32 %v6579_v2, %v1412_v17 }
 0x4b7   : > { %v1761_v42 = vrot.slane %v1759_v35, 1  ;;  %v1762_v38 = vrot.slane %v1759_v35, 2  ;;  %v1763_v39 = vrot.slane %v1759_v35, 3  ;;  %v1764_v40 = vrot.slane %v1759_v35, 4 }
 0x4b8   : > { %v6664_v46 = vadd.f32 %v1759_v35, %v6582_v12  ;;  %v1437_v61 = vrot.slane %v6639_v19, 7  ;;  %v1439_v48 = vrot.slane %v6642_v20, 6  ;;  %v1441_v41 = vrot.slane %v6645_v28, 5 }
 0x4b9   : > { %v6669_v5 = vadd.f32 %v1761_v42, %v6587_v0  ;;  %v6672_v8 = vadd.f32 %v1762_v38, %v6590_v4  ;;  %v1443_v43 = vrot.slane %v6648_v29, 4  ;;  %v1445_v12 = vrot.slane %v6655_v36, 3 }
 0x4ba   : > { %v1438_v2 = vsel %vm1069_vm0, %v1437_v61, %v6651_v30  ;;  %v1447_v44 = vrot.slane %v6658_v49, 2  ;;  %v1765_v47 = vrot.slane %v1759_v35, 5  ;;  %v1766_v1 = vrot.slane %v1759_v35, 6 }
 0x4bb   : > { %v1440_v62 = vsel %vm1072_vm6, %v1439_v48, %v1438_v2  ;;  %v1767_v0 = vrot.slane %v1759_v35, 7  ;;  %v6682_v57 = vadd.f32 %v1763_v39, %v6600_v23  ;;  %v6686_v9 = vadd.f32 %v1764_v40, %v6604_v26 }
 0x4bc   : > { %v1442_v4 = vsel %vm1075_vm7, %v1441_v41, %v1440_v62  ;;  %v6689_v10 = vadd.f32 %v1765_v47, %v6607_v27  ;;  %v1792_v54 = vrot.slane %v6669_v5, 7  ;;  %v1449_v51 = vrot.slane %v6661_v3, 1 }
 0x4bd   : > { %v1444_v56 = vsel %vm1078_vm8, %v1443_v43, %v1442_v4  ;;  %v6695_v6 = vadd.f32 %v1766_v1, %v6613_v33  ;;  %v1794_v23 = vrot.slane %v6672_v8, 6  ;;  %v6700_v58 = vadd.f32 %v1767_v0, %v6618_v37 }
 0x4be   : > { %v1446_v13 = vsel %vm1081_vm9, %v1445_v12, %v1444_v56  ;;  %v1793_v26 = vsel %vm1069_vm0, %v1792_v54, %v6664_v46  ;;  %v1796_v27 = vrot.slane %v6682_v57, 5  ;;  %v1798_v16 = vrot.slane %v6686_v9, 4 }
 0x4bf   : > { %v1448_v14 = vsel %vm1084_vm10, %v1447_v44, %v1446_v13  ;;  %v1795_v15 = vsel %vm1072_vm6, %v1794_v23, %v1793_v26  ;;  %v1800_v25 = vrot.slane %v6689_v10, 3  ;;  %v1802_v35 = vrot.slane %v6695_v6, 2 }
 0x4c0   : > { %v1450_v33 = vsel %vm1087_vm11, %v1449_v51, %v1448_v14  ;;  %v1797_v17 = vsel %vm1075_vm7, %v1796_v27, %v1795_v15  ;;  %v1804_v38 = vrot.slane %v6700_v58, 1 }
 0x4c1   : > { %1451 = vrot.lane.b32.xlu1 %v1450_v33, %s6176_s7  ;;  %v1799_v37 = vsel %vm1078_vm8, %v1798_v16, %v1797_v17 }
 0x4c2   : > { %v1801_v42 = vsel %vm1081_vm9, %v1800_v25, %v1799_v37 }
 0x4c3   : > { %v1803_v39 = vsel %vm1084_vm10, %v1802_v35, %v1801_v42 }
 0x4c4   : > { %v1805_v40 = vsel %vm1087_vm11, %v1804_v38, %v1803_v39 }
 0x4c5   : > { %1806 = vrot.lane.b32.xlu0 %v1805_v40, %s6176_s7 }
 0x533   : > { %v1452_v61 = vpop.permute.xlu1 %1451 }
 0x534   : > { %v1454_v48 = vsel %vm1193_vm14, inf, %v1452_v61 }
 0x535   : > { %v1456_v41 = vrot.slane %v1454_v48, 1  ;;  %v1457_v43 = vrot.slane %v1454_v48, 2  ;;  %v1458_v2 = vrot.slane %v1454_v48, 3  ;;  %v1459_v12 = vrot.slane %v1454_v48, 4 }
 0x536   : > { %v1460_v44 = vrot.slane %v1454_v48, 5  ;;  %v1461_v47 = vrot.slane %v1454_v48, 6  ;;  %v1462_v62 = vrot.slane %v1454_v48, 7  ;;  %v6733_v51 = vmin.f32 %v6651_v30, %v1454_v48 }
 0x537   : > { %v6721_v1 = vmin.f32 %v6639_v19, %v1456_v41  ;;  %v6724_v0 = vmin.f32 %v6642_v20, %v1457_v43  ;;  %v1807_v4 = vpop.permute.xlu0 %1806  ;;  %v6727_v54 = vmin.f32 %v6645_v28, %v1458_v2  ;;  %v6730_v56 = vmin.f32 %v6648_v29, %v1459_v12 }
 0x538   : > { %v1809_v23 = vsel %vm1193_vm14, 0.0, %v1807_v4  ;;  %v6737_v13 = vmin.f32 %v6655_v36, %v1460_v44  ;;  %v6740_v19 = vmin.f32 %v6658_v49, %v1461_v47  ;;  %v6743_v28 = vmin.f32 %v6661_v3, %v1462_v62 }
 0x539   : > { %v1811_v20 = vrot.slane %v1809_v23, 1  ;;  %v1812_v26 = vrot.slane %v1809_v23, 2  ;;  %v1813_v27 = vrot.slane %v1809_v23, 3  ;;  %v1814_v14 = vrot.slane %v1809_v23, 4 }
 0x53a   : > { %v6746_v29 = vadd.f32 %v1809_v23, %v6664_v46  ;;  %v1487_v30 = vrot.slane %v6721_v1, 7  ;;  %v1489_v15 = vrot.slane %v6724_v0, 6  ;;  %v1491_v16 = vrot.slane %v6727_v54, 5 }
 0x53b   : > { %v6751_v36 = vadd.f32 %v1811_v20, %v6669_v5  ;;  %v6754_v49 = vadd.f32 %v1812_v26, %v6672_v8  ;;  %v1493_v33 = vrot.slane %v6730_v56, 4  ;;  %v1495_v46 = vrot.slane %v6737_v13, 3 }
 0x53c   : > { %v1488_v3 = vsel %vm1069_vm0, %v1487_v30, %v6733_v51  ;;  %v1497_v17 = vrot.slane %v6740_v19, 2  ;;  %v1815_v25 = vrot.slane %v1809_v23, 5  ;;  %v1816_v35 = vrot.slane %v1809_v23, 6 }
 0x53d   : > { %v1490_v37 = vsel %vm1072_vm6, %v1489_v15, %v1488_v3  ;;  %v1817_v5 = vrot.slane %v1809_v23, 7  ;;  %v6764_v42 = vadd.f32 %v1813_v27, %v6682_v57  ;;  %v6768_v38 = vadd.f32 %v1814_v14, %v6686_v9 }
 0x53e   : > { %v1492_v8 = vsel %vm1075_vm7, %v1491_v16, %v1490_v37  ;;  %v6771_v39 = vadd.f32 %v1815_v25, %v6689_v10  ;;  %v1842_v40 = vrot.slane %v6751_v36, 7  ;;  %v1499_v48 = vrot.slane %v6743_v28, 1 }
 0x53f   : > { %v1494_v61 = vsel %vm1078_vm8, %v1493_v33, %v1492_v8  ;;  %v6777_v41 = vadd.f32 %v1816_v35, %v6695_v6  ;;  %v1844_v57 = vrot.slane %v6754_v49, 6  ;;  %v6782_v2 = vadd.f32 %v1817_v5, %v6700_v58 }
 0x540   : > { %v1496_v43 = vsel %vm1081_vm9, %v1495_v46, %v1494_v61  ;;  %v1843_v9 = vsel %vm1069_vm0, %v1842_v40, %v6746_v29  ;;  %v1846_v10 = vrot.slane %v6764_v42, 5  ;;  %v1848_v47 = vrot.slane %v6768_v38, 4 }
 0x541   : > { %v1498_v12 = vsel %vm1084_vm10, %v1497_v17, %v1496_v43  ;;  %v1845_v44 = vsel %vm1072_vm6, %v1844_v57, %v1843_v9  ;;  %v1850_v4 = vrot.slane %v6771_v39, 3  ;;  %v1852_v23 = vrot.slane %v6777_v41, 2 }
 0x542   : > { %v1500_v6 = vsel %vm1087_vm11, %v1499_v48, %v1498_v12  ;;  %v1847_v62 = vsel %vm1075_vm7, %v1846_v10, %v1845_v44  ;;  %v1854_v26 = vrot.slane %v6782_v2, 1 }
 0x543   : > { %1501 = vrot.lane.b32.xlu1 %v1500_v6, %s6177_s8  ;;  %v1849_v58 = vsel %vm1078_vm8, %v1848_v47, %v1847_v62 }
 0x544   : > { %v1851_v20 = vsel %vm1081_vm9, %v1850_v4, %v1849_v58 }
 0x545   : > { %v1853_v27 = vsel %vm1084_vm10, %v1852_v23, %v1851_v20 }
 0x546   : > { %v1855_v14 = vsel %vm1087_vm11, %v1854_v26, %v1853_v27 }
 0x547   : > { %1856 = vrot.lane.b32.xlu0 %v1855_v14, %s6177_s8 }
 0x5b5   : > { %v1502_v30 = vpop.permute.xlu1 %1501 }
 0x5b6   : > { %v1504_v15 = vsel %vm1244_vm15, inf, %v1502_v30 }
 0x5b7   : > { %v1506_v16 = vrot.slane %v1504_v15, 1  ;;  %v1507_v33 = vrot.slane %v1504_v15, 2  ;;  %v1508_v3 = vrot.slane %v1504_v15, 3  ;;  %v1509_v46 = vrot.slane %v1504_v15, 4 }
 0x5b8   : > { %v1510_v17 = vrot.slane %v1504_v15, 5  ;;  %v1511_v25 = vrot.slane %v1504_v15, 6  ;;  %v1512_v37 = vrot.slane %v1504_v15, 7  ;;  %v6815_v48 = vmin.f32 %v6733_v51, %v1504_v15 }
 0x5b9   : > { %v6803_v35 = vmin.f32 %v6721_v1, %v1506_v16  ;;  %v6806_v5 = vmin.f32 %v6724_v0, %v1507_v33  ;;  %v1857_v8 = vpop.permute.xlu0 %1856  ;;  %v6809_v40 = vmin.f32 %v6727_v54, %v1508_v3  ;;  %v6812_v61 = vmin.f32 %v6730_v56, %v1509_v46 }
 0x5ba   : > { %v1859_v57 = vsel %vm1244_vm15, 0.0, %v1857_v8  ;;  %v6819_v43 = vmin.f32 %v6737_v13, %v1510_v17  ;;  %v6822_v1 = vmin.f32 %v6740_v19, %v1511_v25  ;;  %v6825_v54 = vmin.f32 %v6743_v28, %v1512_v37 }
 0x5bb   : > { %v1861_v0 = vrot.slane %v1859_v57, 1  ;;  %v1862_v9 = vrot.slane %v1859_v57, 2  ;;  %v1863_v10 = vrot.slane %v1859_v57, 3  ;;  %v1864_v12 = vrot.slane %v1859_v57, 4 }
 0x5bc   : > { %v6828_v56 = vadd.f32 %v1859_v57, %v6746_v29  ;;  %v1537_v51 = vrot.slane %v6803_v35, 7  ;;  %v1539_v44 = vrot.slane %v6806_v5, 6  ;;  %v1541_v47 = vrot.slane %v6809_v40, 5 }
 0x5bd   : > { %v6833_v13 = vadd.f32 %v1861_v0, %v6751_v36  ;;  %v6836_v19 = vadd.f32 %v1862_v9, %v6754_v49  ;;  %v1543_v6 = vrot.slane %v6812_v61, 4  ;;  %v1545_v29 = vrot.slane %v6819_v43, 3 }
 0x5be   : > { %v1538_v28 = vsel %vm1069_vm0, %v1537_v51, %v6815_v48  ;;  %v1547_v62 = vrot.slane %v6822_v1, 2  ;;  %v1865_v4 = vrot.slane %v1859_v57, 5  ;;  %v1866_v23 = vrot.slane %v1859_v57, 6 }
 0x5bf   : > { %v1540_v58 = vsel %vm1072_vm6, %v1539_v44, %v1538_v28  ;;  %v1867_v36 = vrot.slane %v1859_v57, 7  ;;  %v6846_v20 = vadd.f32 %v1863_v10, %v6764_v42  ;;  %v6850_v26 = vadd.f32 %v1864_v12, %v6768_v38 }
 0x5c0   : > { %v1542_v49 = vsel %vm1075_vm7, %v1541_v47, %v1540_v58  ;;  %v6853_v27 = vadd.f32 %v1865_v4, %v6771_v39  ;;  %v1892_v14 = vrot.slane %v6833_v13, 7  ;;  %v1549_v15 = vrot.slane %v6825_v54, 1 }
 0x5c1   : > { %v1544_v30 = vsel %vm1078_vm8, %v1543_v6, %v1542_v49  ;;  %v6859_v16 = vadd.f32 %v1866_v23, %v6777_v41  ;;  %v1894_v42 = vrot.slane %v6836_v19, 6  ;;  %v6864_v3 = vadd.f32 %v1867_v36, %v6782_v2 }
 0x5c2   : > { %v1546_v33 = vsel %vm1081_vm9, %v1545_v29, %v1544_v30  ;;  %v1893_v38 = vsel %vm1069_vm0, %v1892_v14, %v6828_v56  ;;  %v1896_v39 = vrot.slane %v6846_v20, 5  ;;  %v1898_v41 = vrot.slane %v6850_v26, 4 }
 0x5c3   : > { %v1548_v46 = vsel %vm1084_vm10, %v1547_v62, %v1546_v33  ;;  %v1895_v17 = vsel %vm1072_vm6, %v1894_v42, %v1893_v38  ;;  %v1900_v8 = vrot.slane %v6853_v27, 3  ;;  %v1902_v57 = vrot.slane %v6859_v16, 2 }
 0x5c4   : > { %v1550_v25 = vsel %vm1087_vm11, %v1549_v15, %v1548_v46  ;;  %v1897_v37 = vsel %vm1075_vm7, %v1896_v39, %v1895_v17  ;;  %v1904_v9 = vrot.slane %v6864_v3, 1  ;;  %v1589_v42 = vstv %s1588_s18  ;;  %s3995_s18 = scalar_select %p8834_p5, 1, 0 }
 0x5c5   : > { %1551 = vrot.lane.b32.xlu1 %v1550_v25, %s6178_s9  ;;  %v1899_v2 = vsel %vm1078_vm8, %v1898_v41, %v1897_v37  ;;  %v1591_v33 = vrot.slane %v6453_v31, 1  ;;  %vm6903_vm2 = vcmp.eq.s32.totalorder %v1589_v42, 1  ;;  %v1596_v41 = vrot.slane %v6453_v31, 6 }
 0x5c6   : > { %v1901_v0 = vsel %vm1081_vm9, %v1900_v8, %v1899_v2 }
 0x5c7   : > { %v1903_v10 = vsel %vm1084_vm10, %v1902_v57, %v1901_v0 }
 0x5c8   : > { %v1905_v12 = vsel %vm1087_vm11, %v1904_v9, %v1903_v10 }
 0x5c9   : > { %1906 = vrot.lane.b32.xlu0 %v1905_v12, %s6178_s9 }
 0x637   : > { %v1552_v51 = vpop.permute.xlu1 %1551 }
 0x638   : > { %v1554_v44 = vsel %vm1295_vm1, inf, %v1552_v51 }
 0x639   : > { %v1556_v47 = vrot.slane %v1554_v44, 1  ;;  %v1557_v6 = vrot.slane %v1554_v44, 2  ;;  %v1558_v28 = vrot.slane %v1554_v44, 3  ;;  %v1559_v29 = vrot.slane %v1554_v44, 4 }
 0x63a   : > { %v1560_v62 = vrot.slane %v1554_v44, 5  ;;  %v1561_v4 = vrot.slane %v1554_v44, 6  ;;  %v1562_v58 = vrot.slane %v1554_v44, 7  ;;  %v1571_v30 = vmin.f32 %v6815_v48, %v1554_v44 }
 0x63b   : > { %v1572_v23 = vmin.f32 %v6803_v35, %v1556_v47  ;;  %v1573_v36 = vmin.f32 %v6806_v5, %v1557_v6  ;;  %v1574_v49 = vmin.f32 %v6809_v40, %v1558_v28  ;;  %v1575_v14 = vmin.f32 %v6812_v61, %v1559_v29 }
 0x63c   : > { %v1576_v15 = vmin.f32 %v6819_v43, %v1560_v62  ;;  %v1577_v46 = vmin.f32 %v6822_v1, %v1561_v4  ;;  %v1592_v35 = vrot.slane %v6453_v31, 2  ;;  %v1593_v40 = vrot.slane %v6453_v31, 3 }
 0x63d   : > { %v1580_v38 = vadd.f32 %v1572_v23, %v6507_v32  ;;  %v1581_v39 = vadd.f32 %v1573_v36, %v6509_v50  ;;  %v1582_v5 = vadd.f32 %v1574_v49, %v6511_v52  ;;  %v1578_v61 = vmin.f32 %v6825_v54, %v1562_v58  ;;  %v1907_v58 = vpop.permute.xlu0 %1906  ;;  %v6964_v23 = vld [vmem:[#allocation3 + $0xa] sm:$0x1] }
 0x63e   : > { %v1583_v48 = vadd.f32 %v1575_v14, %v6513_v55  ;;  %v1594_v43 = vrot.slane %v6453_v31, 4  ;;  %v1579_v17 = vadd.f32 %v1571_v30, %v6505_v45  ;;  %v1584_v32 = vadd.f32 %v1576_v15, %v6519_v63  ;;  %v6968_v15 = vld [vmem:[#allocation3 + $0x12] sm:$0x1] }
 0x63f   : > { %v1595_v1 = vrot.slane %v6453_v31, 5  ;;  %v1585_v52 = vadd.f32 %v1577_v46, %v6521_v60  ;;  %v6912_v54 = vsel %vm6903_vm2, %v1580_v38, %v1591_v33  ;;  %v6916_v55 = vsel %vm6903_vm2, %v1581_v39, %v1592_v35  ;;  %v6970_v38 = vld [vmem:[#allocation3 + $0x2] sm:$0x1] }
 0x640   : > { %v1586_v45 = vadd.f32 %v1578_v61, %v6524_v53  ;;  %v1597_v63 = vrot.slane %v6453_v31, 7  ;;  %v6922_v25 = vsel %vm6903_vm2, %v1582_v5, %v1593_v40  ;;  %v6926_v60 = vsel %vm6903_vm2, %v1583_v48, %v1594_v43 }
 0x641   : > { %v1634_v37 = vrot.slane %v6912_v54, 7  ;;  %v1636_v8 = vrot.slane %v6916_v55, 6  ;;  %v6933_v2 = vsel %vm6903_vm2, %v1579_v17, %v6453_v31  ;;  %v6937_v53 = vsel %vm6903_vm2, %v1584_v32, %v1595_v1 }
 0x642   : > { %v6941_v57 = vsel %vm6903_vm2, %v1585_v52, %v1596_v41  ;;  %v1638_v9 = vrot.slane %v6922_v25, 5  ;;  %v6948_v10 = vsel %vm6903_vm2, %v1586_v45, %v1597_v63  ;;  %v1640_v12 = vrot.slane %v6926_v60, 4 }
 0x643   : > { %v1635_v0 = vsel %vm1069_vm0, %v1634_v37, %v6933_v2  ;;  %v1642_v44 = vrot.slane %v6937_v53, 3  ;;  %v1644_v6 = vrot.slane %v6941_v57, 2  ;;  %v1646_v29 = vrot.slane %v6948_v10, 1 }
 0x644   : > { %v1637_v31 = vsel %vm1072_vm6, %v1636_v8, %v1635_v0  ;;  %v1909_v36 = vsel %vm1295_vm1, 0.0, %v1907_v58  ;;  %v2290_v49 = vrot.slane %v6964_v23, 7  ;;  %v1625_v33 = vstv %s1624_s20  ;;  %s4016_s20 = scalar_select %p4015_p6, 0.0, inf }
 0x645   : > { %v1639_v51 = vsel %vm1075_vm7, %v1638_v9, %v1637_v31  ;;  %v1911_v14 = vrot.slane %v1909_v36, 1  ;;  %v1912_v30 = vrot.slane %v1909_v36, 2  ;;  %v1913_v42 = vrot.slane %v1909_v36, 3 }
 0x646   : > { %v1641_v47 = vsel %vm1078_vm8, %v1640_v12, %v1639_v51  ;;  %v1914_v39 = vrot.slane %v1909_v36, 4  ;;  %v2291_v46 = vsel %vm1069_vm0, %v2290_v49, %v6970_v38  ;;  %v2292_v35 = vrot.slane %v6968_v15, 6  ;;  %v7015_v49 = vld [vmem:[#allocation3 + $0x22] sm:$0x1] }
 0x647   : > { %v1643_v28 = vsel %vm1081_vm9, %v1642_v44, %v1641_v47  ;;  %v1915_v5 = vrot.slane %v1909_v36, 5  ;;  %v6976_v40 = vadd.f32 %v1909_v36, %v6828_v56  ;;  %v6979_v61 = vadd.f32 %v1911_v14, %v6833_v13 }
 0x648   : > { %v1645_v62 = vsel %vm1084_vm10, %v1644_v6, %v1643_v28  ;;  %v6982_v48 = vadd.f32 %v1912_v30, %v6836_v19  ;;  %v6985_v17 = vadd.f32 %v1913_v42, %v6846_v20  ;;  %v1916_v50 = vrot.slane %v1909_v36, 6 }
 0x649   : > { %v1647_v4 = vsel %vm1087_vm11, %v1646_v29, %v1645_v62  ;;  %v1917_v1 = vrot.slane %v1909_v36, 7  ;;  %v7001_v62 = vld [vmem:[#allocation3 + $0x1a] sm:$0x1]  ;;  %v7006_v58 = vadd.f32 %v1914_v39, %v6850_v26  ;;  %v7009_v36 = vadd.f32 %v1915_v5, %v6853_v27  ;;  %v7028_v39 = vld [vmem:[#allocation3 + $0x2a] sm:$0x1] }
 0x64a   : > { %1648 = vrot.lane.b32.xlu1 %v1647_v4, %s6174_s27  ;;  %v2294_v27 = vrot.slane %v7001_v62, 5  ;;  %v2296_v5 = vrot.slane %v7015_v49, 4 }
 0x6bc   : > { %v1649_v43 = vpop.permute.xlu1 %1648 }
 0x6bd   : > { %v1651_v32 = vsel %vm1033_vm12, %v1625_v33, %v1649_v43 }
 0x6be   : > { %v1653_v52 = vrot.slane %v1651_v32, 1  ;;  %v1654_v41 = vrot.slane %v1651_v32, 2  ;;  %v1655_v45 = vrot.slane %v1651_v32, 3  ;;  %v1656_v63 = vrot.slane %v1651_v32, 4 }
 0x6bf   : > { %v1657_v56 = vrot.slane %v1651_v32, 5  ;;  %v1668_v37 = vmin.f32 %v6933_v2, %v1651_v32  ;;  %v1658_v13 = vrot.slane %v1651_v32, 6  ;;  %v1659_v8 = vrot.slane %v1651_v32, 7 }
 0x6c0   : > { %v1669_v19 = vmin.f32 %v6912_v54, %v1653_v52  ;;  %v1670_v0 = vmin.f32 %v6916_v55, %v1654_v41  ;;  %v1671_v20 = vmin.f32 %v6922_v25, %v1655_v45  ;;  %v1672_v9 = vmin.f32 %v6926_v60, %v1656_v63 }
 0x6c1   : > { %v1676_v31 = vadd.f32 %v1668_v37, %v6495_v24  ;;  %v1673_v12 = vmin.f32 %v6937_v53, %v1657_v56  ;;  %v1674_v51 = vmin.f32 %v6941_v57, %v1658_v13  ;;  %v1675_v44 = vmin.f32 %v6948_v10, %v1659_v8  ;;  %v7041_v37 = vld [vmem:[#allocation3 + $0x3a] sm:$0x1] }
 0x6c2   : > { %v1677_v47 = vadd.f32 %v1669_v19, %v6490_v18  ;;  %v1678_v6 = vadd.f32 %v1670_v0, %v6493_v21  ;;  %v1679_v28 = vadd.f32 %v1671_v20, %v6515_v34  ;;  %v1680_v29 = vadd.f32 %v1672_v9, %v6528_v59 }
 0x6c3   : > { %v1681_v4 = vadd.f32 %v1673_v12, %v6537_v7  ;;  %v1682_v24 = vadd.f32 %v1674_v51, %v6543_v11  ;;  %v1683_v18 = vadd.f32 %v1675_v44, %v6550_v22  ;;  %v7018_v7 = vadd.f32 %v1916_v50, %v6859_v16  ;;  %v7034_v50 = vld [vmem:[#allocation3 + $0x32] sm:$0x1] }
 0x6c4   : > { %v1935_v21 = vsub.f32 %v1677_v47, %v6979_v61  ;;  %v1936_v34 = vsub.f32 %v1678_v6, %v6982_v48  ;;  %v1937_v59 = vsub.f32 %v1679_v28, %v6985_v17  ;;  %v7021_v11 = vadd.f32 %v1917_v1, %v6864_v3 }
 0x6c5   : > { %v1938_v26 = vsub.f32 %v1680_v29, %v7006_v58  ;;  %v1934_v22 = vsub.f32 %v1676_v31, %v6976_v40  ;;  %v1939_v14 = vsub.f32 %v1681_v4, %v7009_v36  ;;  %v1940_v33 = vsub.f32 %v1682_v24, %v7018_v7 }
 0x6c6   : > { %v1950_v30 = vrot.slane %v1935_v21, 7  ;;  %v1952_v42 = vrot.slane %v1936_v34, 6  ;;  %v2293_v16 = vsel %vm1072_vm6, %v2292_v35, %v2291_v46  ;;  %v1941_v3 = vsub.f32 %v1683_v18, %v7021_v11 }
 0x6c7   : > { %v1954_v32 = vrot.slane %v1937_v59, 5  ;;  %v1956_v52 = vrot.slane %v1938_v26, 4  ;;  %v1958_v45 = vrot.slane %v1939_v14, 3  ;;  %v2295_v63 = vsel %vm1075_vm7, %v2294_v27, %v2293_v16 }
 0x6c8   : > { %v1951_v43 = vsel %vm1069_vm0, %v1950_v30, %v1934_v22  ;;  %v2298_v56 = vrot.slane %v7028_v39, 3  ;;  %v1960_v35 = vrot.slane %v1940_v33, 2  ;;  %v2297_v13 = vsel %vm1078_vm8, %v2296_v5, %v2295_v63 }
 0x6c9   : > { %v1953_v1 = vsel %vm1072_vm6, %v1952_v42, %v1951_v43  ;;  %v2300_v8 = vrot.slane %v7034_v50, 2  ;;  %v1962_v0 = vrot.slane %v1941_v3, 1  ;;  %v2302_v12 = vrot.slane %v7041_v37, 1 }
 0x6ca   : > { %v1955_v41 = vsel %vm1075_vm7, %v1954_v32, %v1953_v1  ;;  %v2299_v31 = vsel %vm1081_vm9, %v2298_v56, %v2297_v13 }
 0x6cb   : > { %v1957_v46 = vsel %vm1078_vm8, %v1956_v52, %v1955_v41  ;;  %v2301_v51 = vsel %vm1084_vm10, %v2300_v8, %v2299_v31 }
 0x6cc   : > { %v1959_v19 = vsel %vm1081_vm9, %v1958_v45, %v1957_v46  ;;  %v2303_v44 = vsel %vm1087_vm11, %v2302_v12, %v2301_v51 }
 0x6cd   : > { %v1961_v20 = vsel %vm1084_vm10, %v1960_v35, %v1959_v19 }
 0x6ce   : > { %v1963_v9 = vsel %vm1087_vm11, %v1962_v0, %v1961_v20 }
 0x6cf   : > { %1964 = vrot.lane.b32.xlu1 %v1963_v9, %s6174_s27 }
 0x6d3   : > { %2304 = vrot.lane.b32.xlu1 %v2303_v44, %s6174_s27 }
 0x741   : > { %v1965_v47 = vpop.permute.xlu1 %1964 }
 0x742   : > { %v1967_v6 = vsel %vm1033_vm12, inf, %v1965_v47 }
 0x743   : > { %v1969_v28 = vrot.slane %v1967_v6, 1  ;;  %v1970_v29 = vrot.slane %v1967_v6, 2  ;;  %v1971_v4 = vrot.slane %v1967_v6, 3  ;;  %v1972_v24 = vrot.slane %v1967_v6, 4 }
 0x744   : > { %v1973_v18 = vrot.slane %v1967_v6, 5  ;;  %v1974_v27 = vrot.slane %v1967_v6, 6  ;;  %v1975_v30 = vrot.slane %v1967_v6, 7  ;;  %v7063_v1 = vmin.f32 %v1934_v22, %v1967_v6 }
 0x745   : > { %v7055_v42 = vmin.f32 %v1935_v21, %v1969_v28  ;;  %v7057_v16 = vmin.f32 %v1936_v34, %v1970_v29  ;;  %v2305_v5 = vpop.permute.xlu1 %2304  ;;  %v7059_v43 = vmin.f32 %v1937_v59, %v1971_v4  ;;  %v7061_v32 = vmin.f32 %v1938_v26, %v1972_v24 }
 0x746   : > { %v2307_v52 = vsel %vm1033_vm12, 0.0, %v2305_v5  ;;  %v7066_v41 = vmin.f32 %v1939_v14, %v1973_v18  ;;  %v7068_v45 = vmin.f32 %v1940_v33, %v1974_v27  ;;  %v7070_v21 = vmin.f32 %v1941_v3, %v1975_v30 }
 0x747   : > { %v2309_v63 = vrot.slane %v2307_v52, 1  ;;  %v2310_v56 = vrot.slane %v2307_v52, 2  ;;  %v2311_v46 = vrot.slane %v2307_v52, 3  ;;  %v2312_v34 = vrot.slane %v2307_v52, 4 }
 0x748   : > { %v7073_v35 = vadd.f32 %v2307_v52, %v6970_v38  ;;  %v2000_v59 = vrot.slane %v7055_v42, 7  ;;  %v2002_v26 = vrot.slane %v7057_v16, 6  ;;  %v2004_v33 = vrot.slane %v7059_v43, 5 }
 0x749   : > { %v7078_v22 = vadd.f32 %v2309_v63, %v6964_v23  ;;  %v7081_v14 = vadd.f32 %v2310_v56, %v6968_v15  ;;  %v2006_v13 = vrot.slane %v7061_v32, 4  ;;  %v2008_v8 = vrot.slane %v7066_v41, 3 }
 0x74a   : > { %v2001_v3 = vsel %vm1069_vm0, %v2000_v59, %v7063_v1  ;;  %v2010_v19 = vrot.slane %v7068_v45, 2  ;;  %v2313_v0 = vrot.slane %v2307_v52, 5  ;;  %v2314_v9 = vrot.slane %v2307_v52, 6 }
 0x74b   : > { %v2003_v20 = vsel %vm1072_vm6, %v2002_v26, %v2001_v3  ;;  %v2315_v31 = vrot.slane %v2307_v52, 7  ;;  %v7091_v12 = vadd.f32 %v2311_v46, %v7001_v62  ;;  %v7095_v44 = vadd.f32 %v2312_v34, %v7015_v49 }
 0x74c   : > { %v2005_v51 = vsel %vm1075_vm7, %v2004_v33, %v2003_v20  ;;  %v7098_v47 = vadd.f32 %v2313_v0, %v7028_v39  ;;  %v2340_v6 = vrot.slane %v7078_v22, 7  ;;  %v2012_v29 = vrot.slane %v7070_v21, 1 }
 0x74d   : > { %v2007_v28 = vsel %vm1078_vm8, %v2006_v13, %v2005_v51  ;;  %v7104_v4 = vadd.f32 %v2314_v9, %v7034_v50  ;;  %v2342_v24 = vrot.slane %v7081_v14, 6  ;;  %v7109_v27 = vadd.f32 %v2315_v31, %v7041_v37 }
 0x74e   : > { %v2009_v18 = vsel %vm1081_vm9, %v2008_v8, %v2007_v28  ;;  %v2341_v30 = vsel %vm1069_vm0, %v2340_v6, %v7073_v35  ;;  %v2344_v5 = vrot.slane %v7091_v12, 5  ;;  %v2346_v56 = vrot.slane %v7095_v44, 4 }
 0x74f   : > { %v2011_v52 = vsel %vm1084_vm10, %v2010_v19, %v2009_v18  ;;  %v2343_v63 = vsel %vm1072_vm6, %v2342_v24, %v2341_v30  ;;  %v2348_v59 = vrot.slane %v7098_v47, 3  ;;  %v2350_v33 = vrot.slane %v7104_v4, 2 }
 0x750   : > { %v2013_v46 = vsel %vm1087_vm11, %v2012_v29, %v2011_v52  ;;  %v2345_v34 = vsel %vm1075_vm7, %v2344_v5, %v2343_v63  ;;  %v2352_v3 = vrot.slane %v7109_v27, 1 }
 0x751   : > { %2014 = vrot.lane.b32.xlu0 %v2013_v46, %s6175_s6  ;;  %v2347_v26 = vsel %vm1078_vm8, %v2346_v56, %v2345_v34 }
 0x752   : > { %v2349_v13 = vsel %vm1081_vm9, %v2348_v59, %v2347_v26 }
 0x753   : > { %v2351_v8 = vsel %vm1084_vm10, %v2350_v33, %v2349_v13 }
 0x754   : > { %v2353_v19 = vsel %vm1087_vm11, %v2352_v3, %v2351_v8 }
 0x755   : > { %2354 = vrot.lane.b32.xlu1 %v2353_v19, %s6175_s6 }
 0x7c3   : > { %v2015_v0 = vpop.permute.xlu0 %2014 }
 0x7c4   : > { %v2017_v20 = vsel %vm1142_vm13, inf, %v2015_v0 }
 0x7c5   : > { %v2019_v9 = vrot.slane %v2017_v20, 1  ;;  %v2020_v31 = vrot.slane %v2017_v20, 2  ;;  %v2021_v51 = vrot.slane %v2017_v20, 3  ;;  %v2022_v6 = vrot.slane %v2017_v20, 4 }
 0x7c6   : > { %v2023_v28 = vrot.slane %v2017_v20, 5  ;;  %v2024_v29 = vrot.slane %v2017_v20, 6  ;;  %v2025_v24 = vrot.slane %v2017_v20, 7  ;;  %v7142_v56 = vmin.f32 %v7063_v1, %v2017_v20 }
 0x7c7   : > { %v7130_v18 = vmin.f32 %v7055_v42, %v2019_v9  ;;  %v7133_v30 = vmin.f32 %v7057_v16, %v2020_v31  ;;  %v2355_v5 = vpop.permute.xlu1 %2354  ;;  %v7136_v52 = vmin.f32 %v7059_v43, %v2021_v51  ;;  %v7139_v63 = vmin.f32 %v7061_v32, %v2022_v6 }
 0x7c8   : > { %v2357_v46 = vsel %vm1142_vm13, 0.0, %v2355_v5  ;;  %v7146_v34 = vmin.f32 %v7066_v41, %v2023_v28  ;;  %v7149_v42 = vmin.f32 %v7068_v45, %v2024_v29  ;;  %v7152_v43 = vmin.f32 %v7070_v21, %v2025_v24 }
 0x7c9   : > { %v2359_v16 = vrot.slane %v2357_v46, 1  ;;  %v2360_v59 = vrot.slane %v2357_v46, 2  ;;  %v2361_v26 = vrot.slane %v2357_v46, 3  ;;  %v2362_v33 = vrot.slane %v2357_v46, 4 }
 0x7ca   : > { %v7155_v32 = vadd.f32 %v2357_v46, %v7073_v35  ;;  %v2050_v1 = vrot.slane %v7130_v18, 7  ;;  %v2052_v13 = vrot.slane %v7133_v30, 6  ;;  %v2054_v3 = vrot.slane %v7136_v52, 5 }
 0x7cb   : > { %v7160_v41 = vadd.f32 %v2359_v16, %v7078_v22  ;;  %v7163_v45 = vadd.f32 %v2360_v59, %v7081_v14  ;;  %v2056_v8 = vrot.slane %v7139_v63, 4  ;;  %v2058_v35 = vrot.slane %v7146_v34, 3 }
 0x7cc   : > { %v2051_v21 = vsel %vm1069_vm0, %v2050_v1, %v7142_v56  ;;  %v2060_v19 = vrot.slane %v7149_v42, 2  ;;  %v2363_v0 = vrot.slane %v2357_v46, 5  ;;  %v2364_v9 = vrot.slane %v2357_v46, 6 }
 0x7cd   : > { %v2053_v20 = vsel %vm1072_vm6, %v2052_v13, %v2051_v21  ;;  %v2365_v22 = vrot.slane %v2357_v46, 7  ;;  %v7173_v31 = vadd.f32 %v2361_v26, %v7091_v12  ;;  %v7177_v51 = vadd.f32 %v2362_v33, %v7095_v44 }
 0x7ce   : > { %v2055_v14 = vsel %vm1075_vm7, %v2054_v3, %v2053_v20  ;;  %v7180_v6 = vadd.f32 %v2363_v0, %v7098_v47  ;;  %v2390_v28 = vrot.slane %v7160_v41, 7  ;;  %v2062_v24 = vrot.slane %v7152_v43, 1 }
 0x7cf   : > { %v2057_v29 = vsel %vm1078_vm8, %v2056_v8, %v2055_v14  ;;  %v7186_v5 = vadd.f32 %v2364_v9, %v7104_v4  ;;  %v2392_v12 = vrot.slane %v7163_v45, 6  ;;  %v7191_v16 = vadd.f32 %v2365_v22, %v7109_v27 }
 0x7d0   : > { %v2059_v46 = vsel %vm1081_vm9, %v2058_v35, %v2057_v29  ;;  %v2391_v44 = vsel %vm1069_vm0, %v2390_v28, %v7155_v32  ;;  %v2394_v47 = vrot.slane %v7173_v31, 5  ;;  %v2396_v33 = vrot.slane %v7177_v51, 4 }
 0x7d1   : > { %v2061_v59 = vsel %vm1084_vm10, %v2060_v19, %v2059_v46  ;;  %v2393_v26 = vsel %vm1072_vm6, %v2392_v12, %v2391_v44  ;;  %v2398_v13 = vrot.slane %v7180_v6, 3  ;;  %v2400_v3 = vrot.slane %v7186_v5, 2 }
 0x7d2   : > { %v2063_v4 = vsel %vm1087_vm11, %v2062_v24, %v2061_v59  ;;  %v2395_v1 = vsel %vm1075_vm7, %v2394_v47, %v2393_v26  ;;  %v2402_v21 = vrot.slane %v7191_v16, 1 }
 0x7d3   : > { %2064 = vrot.lane.b32.xlu0 %v2063_v4, %s6176_s7  ;;  %v2397_v27 = vsel %vm1078_vm8, %v2396_v33, %v2395_v1 }
 0x7d4   : > { %v2399_v8 = vsel %vm1081_vm9, %v2398_v13, %v2397_v27 }
 0x7d5   : > { %v2401_v35 = vsel %vm1084_vm10, %v2400_v3, %v2399_v8 }
 0x7d6   : > { %v2403_v19 = vsel %vm1087_vm11, %v2402_v21, %v2401_v35 }
 0x7d7   : > { %2404 = vrot.lane.b32.xlu1 %v2403_v19, %s6176_s7 }
 0x845   : > { %v2065_v0 = vpop.permute.xlu0 %2064 }
 0x846   : > { %v2067_v20 = vsel %vm1193_vm14, inf, %v2065_v0 }
 0x847   : > { %v2069_v9 = vrot.slane %v2067_v20, 1  ;;  %v2070_v22 = vrot.slane %v2067_v20, 2  ;;  %v2071_v14 = vrot.slane %v2067_v20, 3  ;;  %v2072_v28 = vrot.slane %v2067_v20, 4 }
 0x848   : > { %v2073_v29 = vrot.slane %v2067_v20, 5  ;;  %v2074_v24 = vrot.slane %v2067_v20, 6  ;;  %v2075_v12 = vrot.slane %v2067_v20, 7  ;;  %v7224_v33 = vmin.f32 %v7142_v56, %v2067_v20 }
 0x849   : > { %v7212_v46 = vmin.f32 %v7130_v18, %v2069_v9  ;;  %v7215_v44 = vmin.f32 %v7133_v30, %v2070_v22  ;;  %v2405_v47 = vpop.permute.xlu1 %2404  ;;  %v7218_v59 = vmin.f32 %v7136_v52, %v2071_v14  ;;  %v7221_v26 = vmin.f32 %v7139_v63, %v2072_v28 }
 0x84a   : > { %v2407_v4 = vsel %vm1193_vm14, 0.0, %v2405_v47  ;;  %v7228_v1 = vmin.f32 %v7146_v34, %v2073_v29  ;;  %v7231_v18 = vmin.f32 %v7149_v42, %v2074_v24  ;;  %v7234_v52 = vmin.f32 %v7152_v43, %v2075_v12 }
 0x84b   : > { %v2409_v30 = vrot.slane %v2407_v4, 1  ;;  %v2410_v13 = vrot.slane %v2407_v4, 2  ;;  %v2411_v27 = vrot.slane %v2407_v4, 3  ;;  %v2412_v3 = vrot.slane %v2407_v4, 4 }
 0x84c   : > { %v7237_v63 = vadd.f32 %v2407_v4, %v7155_v32  ;;  %v2100_v56 = vrot.slane %v7212_v46, 7  ;;  %v2102_v8 = vrot.slane %v7215_v44, 6  ;;  %v2104_v21 = vrot.slane %v7218_v59, 5 }
 0x84d   : > { %v7242_v34 = vadd.f32 %v2409_v30, %v7160_v41  ;;  %v7245_v42 = vadd.f32 %v2410_v13, %v7163_v45  ;;  %v2106_v35 = vrot.slane %v7221_v26, 4  ;;  %v2108_v32 = vrot.slane %v7228_v1, 3 }
 0x84e   : > { %v2101_v43 = vsel %vm1069_vm0, %v2100_v56, %v7224_v33  ;;  %v2110_v19 = vrot.slane %v7231_v18, 2  ;;  %v2413_v0 = vrot.slane %v2407_v4, 5  ;;  %v2414_v9 = vrot.slane %v2407_v4, 6 }
 0x84f   : > { %v2103_v20 = vsel %vm1072_vm6, %v2102_v8, %v2101_v43  ;;  %v2415_v41 = vrot.slane %v2407_v4, 7  ;;  %v7255_v22 = vadd.f32 %v2411_v27, %v7173_v31  ;;  %v7259_v14 = vadd.f32 %v2412_v3, %v7177_v51 }
 0x850   : > { %v2105_v45 = vsel %vm1075_vm7, %v2104_v21, %v2103_v20  ;;  %v7262_v28 = vadd.f32 %v2413_v0, %v7180_v6  ;;  %v2440_v29 = vrot.slane %v7242_v34, 7  ;;  %v2112_v12 = vrot.slane %v7234_v52, 1 }
 0x851   : > { %v2107_v24 = vsel %vm1078_vm8, %v2106_v35, %v2105_v45  ;;  %v7268_v47 = vadd.f32 %v2414_v9, %v7186_v5  ;;  %v2442_v31 = vrot.slane %v7245_v42, 6  ;;  %v7273_v30 = vadd.f32 %v2415_v41, %v7191_v16 }
 0x852   : > { %v2109_v4 = vsel %vm1081_vm9, %v2108_v32, %v2107_v24  ;;  %v2441_v51 = vsel %vm1069_vm0, %v2440_v29, %v7237_v63  ;;  %v2444_v6 = vrot.slane %v7255_v22, 5  ;;  %v2446_v3 = vrot.slane %v7259_v14, 4 }
 0x853   : > { %v2111_v13 = vsel %vm1084_vm10, %v2110_v19, %v2109_v4  ;;  %v2443_v27 = vsel %vm1072_vm6, %v2442_v31, %v2441_v51  ;;  %v2448_v8 = vrot.slane %v7262_v28, 3  ;;  %v2450_v21 = vrot.slane %v7268_v47, 2 }
 0x854   : > { %v2113_v5 = vsel %vm1087_vm11, %v2112_v12, %v2111_v13  ;;  %v2445_v56 = vsel %vm1075_vm7, %v2444_v6, %v2443_v27  ;;  %v2452_v43 = vrot.slane %v7273_v30, 1 }
 0x855   : > { %2114 = vrot.lane.b32.xlu0 %v2113_v5, %s6177_s8  ;;  %v2447_v16 = vsel %vm1078_vm8, %v2446_v3, %v2445_v56 }
 0x856   : > { %v2449_v35 = vsel %vm1081_vm9, %v2448_v8, %v2447_v16 }
 0x857   : > { %v2451_v32 = vsel %vm1084_vm10, %v2450_v21, %v2449_v35 }
 0x858   : > { %v2453_v19 = vsel %vm1087_vm11, %v2452_v43, %v2451_v32 }
 0x859   : > { %2454 = vrot.lane.b32.xlu1 %v2453_v19, %s6177_s8 }
 0x8c7   : > { %v2115_v0 = vpop.permute.xlu0 %2114 }
 0x8c8   : > { %v2117_v20 = vsel %vm1244_vm15, inf, %v2115_v0 }
 0x8c9   : > { %v2119_v9 = vrot.slane %v2117_v20, 1  ;;  %v2120_v41 = vrot.slane %v2117_v20, 2  ;;  %v2121_v45 = vrot.slane %v2117_v20, 3  ;;  %v2122_v29 = vrot.slane %v2117_v20, 4 }
 0x8ca   : > { %v2123_v24 = vrot.slane %v2117_v20, 5  ;;  %v2124_v12 = vrot.slane %v2117_v20, 6  ;;  %v2125_v31 = vrot.slane %v2117_v20, 7  ;;  %v7306_v3 = vmin.f32 %v7224_v33, %v2117_v20 }
 0x8cb   : > { %v7294_v4 = vmin.f32 %v7212_v46, %v2119_v9  ;;  %v7297_v51 = vmin.f32 %v7215_v44, %v2120_v41  ;;  %v2455_v6 = vpop.permute.xlu1 %2454  ;;  %v7300_v13 = vmin.f32 %v7218_v59, %v2121_v45  ;;  %v7303_v27 = vmin.f32 %v7221_v26, %v2122_v29 }
 0x8cc   : > { %v2457_v5 = vsel %vm1244_vm15, 0.0, %v2455_v6  ;;  %v7310_v56 = vmin.f32 %v7228_v1, %v2123_v24  ;;  %v7313_v46 = vmin.f32 %v7231_v18, %v2124_v12  ;;  %v7316_v59 = vmin.f32 %v7234_v52, %v2125_v31 }
 0x8cd   : > { %v2459_v44 = vrot.slane %v2457_v5, 1  ;;  %v2460_v8 = vrot.slane %v2457_v5, 2  ;;  %v2461_v16 = vrot.slane %v2457_v5, 3  ;;  %v2462_v21 = vrot.slane %v2457_v5, 4 }
 0x8ce   : > { %v7319_v26 = vadd.f32 %v2457_v5, %v7237_v63  ;;  %v2150_v33 = vrot.slane %v7294_v4, 7  ;;  %v2152_v35 = vrot.slane %v7297_v51, 6  ;;  %v2154_v43 = vrot.slane %v7300_v13, 5 }
 0x8cf   : > { %v7324_v1 = vadd.f32 %v2459_v44, %v7242_v34  ;;  %v7327_v18 = vadd.f32 %v2460_v8, %v7245_v42  ;;  %v2156_v32 = vrot.slane %v7303_v27, 4  ;;  %v2158_v63 = vrot.slane %v7310_v56, 3 }
 0x8d0   : > { %v2151_v52 = vsel %vm1069_vm0, %v2150_v33, %v7306_v3  ;;  %v2160_v19 = vrot.slane %v7313_v46, 2  ;;  %v2463_v0 = vrot.slane %v2457_v5, 5  ;;  %v2464_v9 = vrot.slane %v2457_v5, 6 }
 0x8d1   : > { %v2153_v20 = vsel %vm1072_vm6, %v2152_v35, %v2151_v52  ;;  %v2465_v34 = vrot.slane %v2457_v5, 7  ;;  %v7337_v41 = vadd.f32 %v2461_v16, %v7255_v22  ;;  %v7341_v45 = vadd.f32 %v2462_v21, %v7259_v14 }
 0x8d2   : > { %v2155_v42 = vsel %vm1075_vm7, %v2154_v43, %v2153_v20  ;;  %v7344_v29 = vadd.f32 %v2463_v0, %v7262_v28  ;;  %v2490_v24 = vrot.slane %v7324_v1, 7  ;;  %v2162_v31 = vrot.slane %v7316_v59, 1 }
 0x8d3   : > { %v2157_v12 = vsel %vm1078_vm8, %v2156_v32, %v2155_v42  ;;  %v7350_v6 = vadd.f32 %v2464_v9, %v7268_v47  ;;  %v2492_v22 = vrot.slane %v7327_v18, 6  ;;  %v7355_v44 = vadd.f32 %v2465_v34, %v7273_v30 }
 0x8d4   : > { %v2159_v5 = vsel %vm1081_vm9, %v2158_v63, %v2157_v12  ;;  %v2491_v14 = vsel %vm1069_vm0, %v2490_v24, %v7319_v26  ;;  %v2494_v28 = vrot.slane %v7337_v41, 5  ;;  %v2496_v47 = vrot.slane %v7341_v45, 4 }
 0x8d5   : > { %v2161_v8 = vsel %vm1084_vm10, %v2160_v19, %v2159_v5  ;;  %v2493_v16 = vsel %vm1072_vm6, %v2492_v22, %v2491_v14  ;;  %v2498_v35 = vrot.slane %v7344_v29, 3  ;;  %v2500_v43 = vrot.slane %v7350_v6, 2 }
 0x8d6   : > { %v2163_v21 = vsel %vm1087_vm11, %v2162_v31, %v2161_v8  ;;  %v2495_v33 = vsel %vm1075_vm7, %v2494_v28, %v2493_v16  ;;  %v2502_v52 = vrot.slane %v7355_v44, 1 }
 0x8d7   : > { %2164 = vrot.lane.b32.xlu0 %v2163_v21, %s6178_s9  ;;  %v2497_v30 = vsel %vm1078_vm8, %v2496_v47, %v2495_v33  ;;  %v2202_v21 = vstv %s2201_s22  ;;  %s4593_s22 = scalar_select %p9320_p7, 1, 0 }
 0x8d8   : > { %v2499_v32 = vsel %vm1081_vm9, %v2498_v35, %v2497_v30  ;;  %vm2203_vm3 = vcmp.eq.s32.totalorder %v2202_v21, 1 }
 0x8d9   : > { %v2501_v63 = vsel %vm1084_vm10, %v2500_v43, %v2499_v32 }
 0x8da   : > { %v2503_v19 = vsel %vm1087_vm11, %v2502_v52, %v2501_v63 }
 0x8db   : > { %2504 = vrot.lane.b32.xlu1 %v2503_v19, %s6178_s9 }
 0x949   : > { %v2165_v0 = vpop.permute.xlu0 %2164 }
 0x94a   : > { %v2167_v20 = vsel %vm1295_vm1, inf, %v2165_v0 }
 0x94b   : > { %v2169_v9 = vrot.slane %v2167_v20, 1  ;;  %v2170_v34 = vrot.slane %v2167_v20, 2  ;;  %v2171_v42 = vrot.slane %v2167_v20, 3  ;;  %v2172_v24 = vrot.slane %v2167_v20, 4 }
 0x94c   : > { %v2173_v12 = vrot.slane %v2167_v20, 5  ;;  %v2174_v31 = vrot.slane %v2167_v20, 6  ;;  %v2175_v22 = vrot.slane %v2167_v20, 7  ;;  %v2184_v16 = vmin.f32 %v7306_v3, %v2167_v20  ;;  %v7450_v20 = vld [vmem:[#allocation3 + $0xb] sm:$0x1] }
 0x94d   : > { %v2185_v5 = vmin.f32 %v7294_v4, %v2169_v9  ;;  %v2186_v14 = vmin.f32 %v7297_v51, %v2170_v34  ;;  %v2187_v28 = vmin.f32 %v7300_v13, %v2171_v42  ;;  %v2188_v8 = vmin.f32 %v7303_v27, %v2172_v24  ;;  %v2505_v0 = vpop.permute.xlu1 %2504 }
 0x94e   : > { %v2189_v47 = vmin.f32 %v7310_v56, %v2173_v12  ;;  %v2190_v30 = vmin.f32 %v7313_v46, %v2174_v31  ;;  %v2191_v4 = vmin.f32 %v7316_v59, %v2175_v22  ;;  %v2192_v13 = vadd.f32 %v2184_v16, %v6976_v40  ;;  %v7454_v12 = vld [vmem:[#allocation3 + $0x13] sm:$0x1] }
 0x94f   : > { %v2193_v33 = vadd.f32 %v2185_v5, %v6979_v61  ;;  %v2194_v35 = vadd.f32 %v2186_v14, %v6982_v48  ;;  %v2195_v43 = vadd.f32 %v2187_v28, %v6985_v17  ;;  %v2196_v51 = vadd.f32 %v2188_v8, %v7006_v58  ;;  %v7456_v5 = vld [vmem:[#allocation3 + $0x3] sm:$0x1] }
 0x950   : > { %v2197_v27 = vadd.f32 %v2189_v47, %v7009_v36  ;;  %v2198_v3 = vadd.f32 %v2190_v30, %v7018_v7  ;;  %v2199_v17 = vadd.f32 %v2191_v4, %v7021_v11  ;;  %v2507_v9 = vsel %vm1295_vm1, 0.0, %v2505_v0 }
 0x951   : > { %v7400_v61 = vsel %vm2203_vm3, %v2193_v33, %v6912_v54  ;;  %v7404_v48 = vsel %vm2203_vm3, %v2194_v35, %v6916_v55  ;;  %v7409_v58 = vsel %vm2203_vm3, %v2195_v43, %v6922_v25  ;;  %v7413_v40 = vsel %vm2203_vm3, %v2196_v51, %v6926_v60 }
 0x952   : > { %v2232_v36 = vrot.slane %v7400_v61, 7  ;;  %v2234_v7 = vrot.slane %v7404_v48, 6  ;;  %v7419_v54 = vsel %vm2203_vm3, %v2192_v13, %v6933_v2  ;;  %v7423_v55 = vsel %vm2203_vm3, %v2197_v27, %v6937_v53 }
 0x953   : > { %v7427_v25 = vsel %vm2203_vm3, %v2198_v3, %v6941_v57  ;;  %v2236_v11 = vrot.slane %v7409_v58, 5  ;;  %v7434_v56 = vsel %vm2203_vm3, %v2199_v17, %v6948_v10  ;;  %v2238_v53 = vrot.slane %v7413_v40, 4 }
 0x954   : > { %v2233_v60 = vsel %vm1069_vm0, %v2232_v36, %v7419_v54  ;;  %v2240_v59 = vrot.slane %v7423_v55, 3  ;;  %v2242_v32 = vrot.slane %v7427_v25, 2  ;;  %v2244_v63 = vrot.slane %v7434_v56, 1 }
 0x955   : > { %v2235_v2 = vsel %vm1072_vm6, %v2234_v7, %v2233_v60  ;;  %v2888_v34 = vrot.slane %v7450_v20, 7  ;;  %v2509_v42 = vrot.slane %v2507_v9, 1  ;;  %v2510_v24 = vrot.slane %v2507_v9, 2 }
 0x956   : > { %v2237_v46 = vsel %vm1075_vm7, %v2236_v11, %v2235_v2  ;;  %v2511_v31 = vrot.slane %v2507_v9, 3  ;;  %v2223_v22 = vstv %s2222_s24  ;;  %v2512_v14 = vrot.slane %v2507_v9, 4  ;;  %s4614_s24 = scalar_select %p4613_p8, 0.0, inf }
 0x957   : > { %v2239_v57 = vsel %vm1078_vm8, %v2238_v53, %v2237_v46  ;;  %v2889_v28 = vsel %vm1069_vm0, %v2888_v34, %v7456_v5  ;;  %v2890_v8 = vrot.slane %v7454_v12, 6  ;;  %v2513_v16 = vrot.slane %v2507_v9, 5  ;;  %v7501_v34 = vld [vmem:[#allocation3 + $0x23] sm:$0x1] }
 0x958   : > { %v2241_v52 = vsel %vm1081_vm9, %v2240_v59, %v2239_v57  ;;  %v7462_v47 = vadd.f32 %v2507_v9, %v7319_v26  ;;  %v7465_v21 = vadd.f32 %v2509_v42, %v7324_v1  ;;  %v7468_v33 = vadd.f32 %v2510_v24, %v7327_v18 }
 0x959   : > { %v2243_v19 = vsel %vm1084_vm10, %v2242_v32, %v2241_v52  ;;  %v7471_v30 = vadd.f32 %v2511_v31, %v7337_v41  ;;  %v2514_v4 = vrot.slane %v2507_v9, 6  ;;  %v2515_v51 = vrot.slane %v2507_v9, 7 }
 0x95a   : > { %v2245_v10 = vsel %vm1087_vm11, %v2244_v63, %v2243_v19  ;;  %v7487_v19 = vld [vmem:[#allocation3 + $0x1b] sm:$0x1]  ;;  %v7492_v0 = vadd.f32 %v2512_v14, %v7341_v45  ;;  %v7495_v9 = vadd.f32 %v2513_v16, %v7344_v29  ;;  %v7514_v14 = vld [vmem:[#allocation3 + $0x2b] sm:$0x1]  ;;  %v2894_v16 = vrot.slane %v7501_v34, 4 }
 0x95b   : > { %2246 = vrot.lane.b32.xlu0 %v2245_v10, %s6174_s27  ;;  %v2892_v29 = vrot.slane %v7487_v19, 5 }
 0x9cd   : > { %v2247_v35 = vpop.permute.xlu0 %2246 }
 0x9ce   : > { %v2249_v43 = vsel %vm1033_vm12, %v2223_v22, %v2247_v35 }
 0x9cf   : > { %v2251_v13 = vrot.slane %v2249_v43, 1  ;;  %v2252_v27 = vrot.slane %v2249_v43, 2  ;;  %v2253_v3 = vrot.slane %v2249_v43, 3  ;;  %v2254_v17 = vrot.slane %v2249_v43, 4 }
 0x9d0   : > { %v2255_v26 = vrot.slane %v2249_v43, 5  ;;  %v2266_v36 = vmin.f32 %v7419_v54, %v2249_v43  ;;  %v2256_v1 = vrot.slane %v2249_v43, 6  ;;  %v2257_v7 = vrot.slane %v2249_v43, 7 }
 0x9d1   : > { %v2267_v18 = vmin.f32 %v7400_v61, %v2251_v13  ;;  %v2268_v60 = vmin.f32 %v7404_v48, %v2252_v27  ;;  %v2269_v41 = vmin.f32 %v7409_v58, %v2253_v3  ;;  %v2270_v11 = vmin.f32 %v7413_v40, %v2254_v17 }
 0x9d2   : > { %v2274_v2 = vadd.f32 %v2266_v36, %v6970_v38  ;;  %v2271_v53 = vmin.f32 %v7423_v55, %v2255_v26  ;;  %v2272_v46 = vmin.f32 %v7427_v25, %v2256_v1  ;;  %v2273_v59 = vmin.f32 %v7434_v56, %v2257_v7  ;;  %v7527_v36 = vld [vmem:[#allocation3 + $0x3b] sm:$0x1] }
 0x9d3   : > { %v2275_v57 = vadd.f32 %v2267_v18, %v6964_v23  ;;  %v2276_v32 = vadd.f32 %v2268_v60, %v6968_v15  ;;  %v2277_v52 = vadd.f32 %v2269_v41, %v7001_v62  ;;  %v2278_v63 = vadd.f32 %v2270_v11, %v7015_v49 }
 0x9d4   : > { %v2279_v10 = vadd.f32 %v2271_v53, %v7028_v39  ;;  %v2280_v38 = vadd.f32 %v2272_v46, %v7034_v50  ;;  %v2281_v23 = vadd.f32 %v2273_v59, %v7041_v37  ;;  %v7504_v39 = vadd.f32 %v2514_v4, %v7350_v6  ;;  %v7520_v4 = vld [vmem:[#allocation3 + $0x33] sm:$0x1] }
 0x9d5   : > { %v2533_v15 = vsub.f32 %v2275_v57, %v7465_v21  ;;  %v2534_v62 = vsub.f32 %v2276_v32, %v7468_v33  ;;  %v2535_v49 = vsub.f32 %v2277_v52, %v7471_v30  ;;  %v7507_v50 = vadd.f32 %v2515_v51, %v7355_v44 }
 0x9d6   : > { %v2536_v45 = vsub.f32 %v2278_v63, %v7492_v0  ;;  %v2532_v37 = vsub.f32 %v2274_v2, %v7462_v47  ;;  %v2537_v42 = vsub.f32 %v2279_v10, %v7495_v9  ;;  %v2538_v22 = vsub.f32 %v2280_v38, %v7504_v39 }
 0x9d7   : > { %v2548_v24 = vrot.slane %v2533_v15, 7  ;;  %v2550_v31 = vrot.slane %v2534_v62, 6  ;;  %v2891_v6 = vsel %vm1072_vm6, %v2890_v8, %v2889_v28  ;;  %v2539_v44 = vsub.f32 %v2281_v23, %v7507_v50 }
 0x9d8   : > { %v2552_v43 = vrot.slane %v2535_v49, 5  ;;  %v2554_v13 = vrot.slane %v2536_v45, 4  ;;  %v2556_v3 = vrot.slane %v2537_v42, 3  ;;  %v2893_v17 = vsel %vm1075_vm7, %v2892_v29, %v2891_v6 }
 0x9d9   : > { %v2549_v35 = vsel %vm1069_vm0, %v2548_v24, %v2532_v37  ;;  %v2896_v26 = vrot.slane %v7514_v14, 3  ;;  %v2558_v8 = vrot.slane %v2538_v22, 2  ;;  %v2895_v1 = vsel %vm1078_vm8, %v2894_v16, %v2893_v17 }
 0x9da   : > { %v2551_v51 = vsel %vm1072_vm6, %v2550_v31, %v2549_v35  ;;  %v2898_v7 = vrot.slane %v7520_v4, 2  ;;  %v2560_v60 = vrot.slane %v2539_v44, 1  ;;  %v2900_v53 = vrot.slane %v7527_v36, 1 }
 0x9db   : > { %v2553_v27 = vsel %vm1075_vm7, %v2552_v43, %v2551_v51  ;;  %v2897_v2 = vsel %vm1081_vm9, %v2896_v26, %v2895_v1 }
 0x9dc   : > { %v2555_v28 = vsel %vm1078_vm8, %v2554_v13, %v2553_v27  ;;  %v2899_v46 = vsel %vm1084_vm10, %v2898_v7, %v2897_v2 }
 0x9dd   : > { %v2557_v18 = vsel %vm1081_vm9, %v2556_v3, %v2555_v28  ;;  %v2901_v59 = vsel %vm1087_vm11, %v2900_v53, %v2899_v46 }
 0x9de   : > { %v2559_v41 = vsel %vm1084_vm10, %v2558_v8, %v2557_v18 }
 0x9df   : > { %v2561_v11 = vsel %vm1087_vm11, %v2560_v60, %v2559_v41 }
 0x9e0   : > { %2562 = vrot.lane.b32.xlu0 %v2561_v11, %s6174_s27 }
 0x9e4   : > { %2902 = vrot.lane.b32.xlu0 %v2901_v59, %s6174_s27 }
 0xa52   : > { %v2563_v57 = vpop.permute.xlu0 %2562 }
 0xa53   : > { %v2565_v32 = vsel %vm1033_vm12, inf, %v2563_v57 }
 0xa54   : > { %v2567_v52 = vrot.slane %v2565_v32, 1  ;;  %v2568_v63 = vrot.slane %v2565_v32, 2  ;;  %v2569_v10 = vrot.slane %v2565_v32, 3  ;;  %v2570_v38 = vrot.slane %v2565_v32, 4 }
 0xa55   : > { %v2571_v23 = vrot.slane %v2565_v32, 5  ;;  %v2572_v29 = vrot.slane %v2565_v32, 6  ;;  %v2573_v24 = vrot.slane %v2565_v32, 7  ;;  %v7549_v51 = vmin.f32 %v2532_v37, %v2565_v32 }
 0xa56   : > { %v7541_v31 = vmin.f32 %v2533_v15, %v2567_v52  ;;  %v7543_v6 = vmin.f32 %v2534_v62, %v2568_v63  ;;  %v2903_v16 = vpop.permute.xlu0 %2902  ;;  %v7545_v35 = vmin.f32 %v2535_v49, %v2569_v10  ;;  %v7547_v43 = vmin.f32 %v2536_v45, %v2570_v38 }
 0xa57   : > { %v2905_v13 = vsel %vm1033_vm12, 0.0, %v2903_v16  ;;  %v7552_v27 = vmin.f32 %v2537_v42, %v2571_v23  ;;  %v7554_v3 = vmin.f32 %v2538_v22, %v2572_v29  ;;  %v7556_v15 = vmin.f32 %v2539_v44, %v2573_v24 }
 0xa58   : > { %v2907_v17 = vrot.slane %v2905_v13, 1  ;;  %v2908_v26 = vrot.slane %v2905_v13, 2  ;;  %v2909_v28 = vrot.slane %v2905_v13, 3  ;;  %v2910_v62 = vrot.slane %v2905_v13, 4 }
 0xa59   : > { %v7559_v8 = vadd.f32 %v2905_v13, %v7456_v5  ;;  %v2598_v49 = vrot.slane %v7541_v31, 7  ;;  %v2600_v45 = vrot.slane %v7543_v6, 6  ;;  %v2602_v22 = vrot.slane %v7545_v35, 5 }
 0xa5a   : > { %v7564_v37 = vadd.f32 %v2907_v17, %v7450_v20  ;;  %v7567_v42 = vadd.f32 %v2908_v26, %v7454_v12  ;;  %v2604_v1 = vrot.slane %v7547_v43, 4  ;;  %v2606_v7 = vrot.slane %v7552_v27, 3 }
 0xa5b   : > { %v2599_v44 = vsel %vm1069_vm0, %v2598_v49, %v7549_v51  ;;  %v2608_v18 = vrot.slane %v7554_v3, 2  ;;  %v2911_v60 = vrot.slane %v2905_v13, 5  ;;  %v2912_v11 = vrot.slane %v2905_v13, 6 }
 0xa5c   : > { %v2601_v41 = vsel %vm1072_vm6, %v2600_v45, %v2599_v44  ;;  %v2913_v2 = vrot.slane %v2905_v13, 7  ;;  %v7577_v53 = vadd.f32 %v2909_v28, %v7487_v19  ;;  %v7581_v59 = vadd.f32 %v2910_v62, %v7501_v34 }
 0xa5d   : > { %v2603_v46 = vsel %vm1075_vm7, %v2602_v22, %v2601_v41  ;;  %v7584_v57 = vadd.f32 %v2911_v60, %v7514_v14  ;;  %v2938_v32 = vrot.slane %v7564_v37, 7  ;;  %v2610_v63 = vrot.slane %v7556_v15, 1 }
 0xa5e   : > { %v2605_v52 = vsel %vm1078_vm8, %v2604_v1, %v2603_v46  ;;  %v7590_v10 = vadd.f32 %v2912_v11, %v7520_v4  ;;  %v2940_v38 = vrot.slane %v7567_v42, 6  ;;  %v7595_v29 = vadd.f32 %v2913_v2, %v7527_v36 }
 0xa5f   : > { %v2607_v23 = vsel %vm1081_vm9, %v2606_v7, %v2605_v52  ;;  %v2939_v24 = vsel %vm1069_vm0, %v2938_v32, %v7559_v8  ;;  %v2942_v16 = vrot.slane %v7577_v53, 5  ;;  %v2944_v26 = vrot.slane %v7581_v59, 4 }
 0xa60   : > { %v2609_v13 = vsel %vm1084_vm10, %v2608_v18, %v2607_v23  ;;  %v2941_v17 = vsel %vm1072_vm6, %v2940_v38, %v2939_v24  ;;  %v2946_v49 = vrot.slane %v7584_v57, 3  ;;  %v2948_v22 = vrot.slane %v7590_v10, 2 }
 0xa61   : > { %v2611_v28 = vsel %vm1087_vm11, %v2610_v63, %v2609_v13  ;;  %v2943_v62 = vsel %vm1075_vm7, %v2942_v16, %v2941_v17  ;;  %v2950_v44 = vrot.slane %v7595_v29, 1 }
 0xa62   : > { %2612 = vrot.lane.b32.xlu1 %v2611_v28, %s6175_s6  ;;  %v2945_v45 = vsel %vm1078_vm8, %v2944_v26, %v2943_v62 }
 0xa63   : > { %v2947_v1 = vsel %vm1081_vm9, %v2946_v49, %v2945_v45 }
 0xa64   : > { %v2949_v7 = vsel %vm1084_vm10, %v2948_v22, %v2947_v1 }
 0xa65   : > { %v2951_v18 = vsel %vm1087_vm11, %v2950_v44, %v2949_v7 }
 0xa66   : > { %2952 = vrot.lane.b32.xlu0 %v2951_v18, %s6175_s6 }
 0xad4   : > { %v2613_v60 = vpop.permute.xlu1 %2612 }
 0xad5   : > { %v2615_v41 = vsel %vm1142_vm13, inf, %v2613_v60 }
 0xad6   : > { %v2617_v11 = vrot.slane %v2615_v41, 1  ;;  %v2618_v2 = vrot.slane %v2615_v41, 2  ;;  %v2619_v46 = vrot.slane %v2615_v41, 3  ;;  %v2620_v32 = vrot.slane %v2615_v41, 4 }
 0xad7   : > { %v2621_v52 = vrot.slane %v2615_v41, 5  ;;  %v2622_v63 = vrot.slane %v2615_v41, 6  ;;  %v2623_v38 = vrot.slane %v2615_v41, 7  ;;  %v7628_v26 = vmin.f32 %v7549_v51, %v2615_v41 }
 0xad8   : > { %v7616_v23 = vmin.f32 %v7541_v31, %v2617_v11  ;;  %v7619_v24 = vmin.f32 %v7543_v6, %v2618_v2  ;;  %v2953_v16 = vpop.permute.xlu0 %2952  ;;  %v7622_v13 = vmin.f32 %v7545_v35, %v2619_v46  ;;  %v7625_v17 = vmin.f32 %v7547_v43, %v2620_v32 }
 0xad9   : > { %v2955_v28 = vsel %vm1142_vm13, 0.0, %v2953_v16  ;;  %v7632_v62 = vmin.f32 %v7552_v27, %v2621_v52  ;;  %v7635_v31 = vmin.f32 %v7554_v3, %v2622_v63  ;;  %v7638_v35 = vmin.f32 %v7556_v15, %v2623_v38 }
 0xada   : > { %v2957_v6 = vrot.slane %v2955_v28, 1  ;;  %v2958_v49 = vrot.slane %v2955_v28, 2  ;;  %v2959_v45 = vrot.slane %v2955_v28, 3  ;;  %v2960_v22 = vrot.slane %v2955_v28, 4 }
 0xadb   : > { %v7641_v43 = vadd.f32 %v2955_v28, %v7559_v8  ;;  %v2648_v51 = vrot.slane %v7616_v23, 7  ;;  %v2650_v1 = vrot.slane %v7619_v24, 6  ;;  %v2652_v44 = vrot.slane %v7622_v13, 5 }
 0xadc   : > { %v7646_v27 = vadd.f32 %v2957_v6, %v7564_v37  ;;  %v7649_v3 = vadd.f32 %v2958_v49, %v7567_v42  ;;  %v2654_v7 = vrot.slane %v7625_v17, 4  ;;  %v2656_v8 = vrot.slane %v7632_v62, 3 }
 0xadd   : > { %v2649_v15 = vsel %vm1069_vm0, %v2648_v51, %v7628_v26  ;;  %v2658_v18 = vrot.slane %v7635_v31, 2  ;;  %v2961_v60 = vrot.slane %v2955_v28, 5  ;;  %v2962_v11 = vrot.slane %v2955_v28, 6 }
 0xade   : > { %v2651_v41 = vsel %vm1072_vm6, %v2650_v1, %v2649_v15  ;;  %v2963_v37 = vrot.slane %v2955_v28, 7  ;;  %v7659_v2 = vadd.f32 %v2959_v45, %v7577_v53  ;;  %v7663_v46 = vadd.f32 %v2960_v22, %v7581_v59 }
 0xadf   : > { %v2653_v42 = vsel %vm1075_vm7, %v2652_v44, %v2651_v41  ;;  %v7666_v32 = vadd.f32 %v2961_v60, %v7584_v57  ;;  %v2988_v52 = vrot.slane %v7646_v27, 7  ;;  %v2660_v38 = vrot.slane %v7638_v35, 1 }
 0xae0   : > { %v2655_v63 = vsel %vm1078_vm8, %v2654_v7, %v2653_v42  ;;  %v7672_v16 = vadd.f32 %v2962_v11, %v7590_v10  ;;  %v2990_v53 = vrot.slane %v7649_v3, 6  ;;  %v7677_v6 = vadd.f32 %v2963_v37, %v7595_v29 }
 0xae1   : > { %v2657_v28 = vsel %vm1081_vm9, %v2656_v8, %v2655_v63  ;;  %v2989_v59 = vsel %vm1069_vm0, %v2988_v52, %v7641_v43  ;;  %v2992_v57 = vrot.slane %v7659_v2, 5  ;;  %v2994_v22 = vrot.slane %v7663_v46, 4 }
 0xae2   : > { %v2659_v49 = vsel %vm1084_vm10, %v2658_v18, %v2657_v28  ;;  %v2991_v45 = vsel %vm1072_vm6, %v2990_v53, %v2989_v59  ;;  %v2996_v1 = vrot.slane %v7666_v32, 3  ;;  %v2998_v44 = vrot.slane %v7672_v16, 2 }
 0xae3   : > { %v2661_v10 = vsel %vm1087_vm11, %v2660_v38, %v2659_v49  ;;  %v2993_v51 = vsel %vm1075_vm7, %v2992_v57, %v2991_v45  ;;  %v3000_v15 = vrot.slane %v7677_v6, 1 }
 0xae4   : > { %2662 = vrot.lane.b32.xlu1 %v2661_v10, %s6176_s7  ;;  %v2995_v29 = vsel %vm1078_vm8, %v2994_v22, %v2993_v51 }
 0xae5   : > { %v2997_v7 = vsel %vm1081_vm9, %v2996_v1, %v2995_v29 }
 0xae6   : > { %v2999_v8 = vsel %vm1084_vm10, %v2998_v44, %v2997_v7 }
 0xae7   : > { %v3001_v18 = vsel %vm1087_vm11, %v3000_v15, %v2999_v8 }
 0xae8   : > { %3002 = vrot.lane.b32.xlu0 %v3001_v18, %s6176_s7 }
 0xb56   : > { %v2663_v60 = vpop.permute.xlu1 %2662 }
 0xb57   : > { %v2665_v41 = vsel %vm1193_vm14, inf, %v2663_v60 }
 0xb58   : > { %v2667_v11 = vrot.slane %v2665_v41, 1  ;;  %v2668_v37 = vrot.slane %v2665_v41, 2  ;;  %v2669_v42 = vrot.slane %v2665_v41, 3  ;;  %v2670_v52 = vrot.slane %v2665_v41, 4 }
 0xb59   : > { %v2671_v63 = vrot.slane %v2665_v41, 5  ;;  %v2672_v38 = vrot.slane %v2665_v41, 6  ;;  %v2673_v53 = vrot.slane %v2665_v41, 7  ;;  %v7710_v22 = vmin.f32 %v7628_v26, %v2665_v41 }
 0xb5a   : > { %v7698_v28 = vmin.f32 %v7616_v23, %v2667_v11  ;;  %v7701_v59 = vmin.f32 %v7619_v24, %v2668_v37  ;;  %v3003_v57 = vpop.permute.xlu0 %3002  ;;  %v7704_v49 = vmin.f32 %v7622_v13, %v2669_v42  ;;  %v7707_v45 = vmin.f32 %v7625_v17, %v2670_v52 }
 0xb5b   : > { %v3005_v10 = vsel %vm1193_vm14, 0.0, %v3003_v57  ;;  %v7714_v51 = vmin.f32 %v7632_v62, %v2671_v63  ;;  %v7717_v23 = vmin.f32 %v7635_v31, %v2672_v38  ;;  %v7720_v13 = vmin.f32 %v7638_v35, %v2673_v53 }
 0xb5c   : > { %v3007_v24 = vrot.slane %v3005_v10, 1  ;;  %v3008_v1 = vrot.slane %v3005_v10, 2  ;;  %v3009_v29 = vrot.slane %v3005_v10, 3  ;;  %v3010_v44 = vrot.slane %v3005_v10, 4 }
 0xb5d   : > { %v7723_v17 = vadd.f32 %v3005_v10, %v7641_v43  ;;  %v2698_v26 = vrot.slane %v7698_v28, 7  ;;  %v2700_v7 = vrot.slane %v7701_v59, 6  ;;  %v2702_v15 = vrot.slane %v7704_v49, 5 }
 0xb5e   : > { %v7728_v62 = vadd.f32 %v3007_v24, %v7646_v27  ;;  %v7731_v31 = vadd.f32 %v3008_v1, %v7649_v3  ;;  %v2704_v8 = vrot.slane %v7707_v45, 4  ;;  %v2706_v43 = vrot.slane %v7714_v51, 3 }
 0xb5f   : > { %v2699_v35 = vsel %vm1069_vm0, %v2698_v26, %v7710_v22  ;;  %v2708_v18 = vrot.slane %v7717_v23, 2  ;;  %v3011_v60 = vrot.slane %v3005_v10, 5  ;;  %v3012_v11 = vrot.slane %v3005_v10, 6 }
 0xb60   : > { %v2701_v41 = vsel %vm1072_vm6, %v2700_v7, %v2699_v35  ;;  %v3013_v27 = vrot.slane %v3005_v10, 7  ;;  %v7741_v37 = vadd.f32 %v3009_v29, %v7659_v2  ;;  %v7745_v42 = vadd.f32 %v3010_v44, %v7663_v46 }
 0xb61   : > { %v2703_v3 = vsel %vm1075_vm7, %v2702_v15, %v2701_v41  ;;  %v7748_v52 = vadd.f32 %v3011_v60, %v7666_v32  ;;  %v3038_v63 = vrot.slane %v7728_v62, 7  ;;  %v2710_v53 = vrot.slane %v7720_v13, 1 }
 0xb62   : > { %v2705_v38 = vsel %vm1078_vm8, %v2704_v8, %v2703_v3  ;;  %v7754_v57 = vadd.f32 %v3012_v11, %v7672_v16  ;;  %v3040_v2 = vrot.slane %v7731_v31, 6  ;;  %v7759_v24 = vadd.f32 %v3013_v27, %v7677_v6 }
 0xb63   : > { %v2707_v10 = vsel %vm1081_vm9, %v2706_v43, %v2705_v38  ;;  %v3039_v46 = vsel %vm1069_vm0, %v3038_v63, %v7723_v17  ;;  %v3042_v32 = vrot.slane %v7741_v37, 5  ;;  %v3044_v44 = vrot.slane %v7745_v42, 4 }
 0xb64   : > { %v2709_v1 = vsel %vm1084_vm10, %v2708_v18, %v2707_v10  ;;  %v3041_v29 = vsel %vm1072_vm6, %v3040_v2, %v3039_v46  ;;  %v3046_v7 = vrot.slane %v7748_v52, 3  ;;  %v3048_v15 = vrot.slane %v7754_v57, 2 }
 0xb65   : > { %v2711_v16 = vsel %vm1087_vm11, %v2710_v53, %v2709_v1  ;;  %v3043_v26 = vsel %vm1075_vm7, %v3042_v32, %v3041_v29  ;;  %v3050_v35 = vrot.slane %v7759_v24, 1 }
 0xb66   : > { %2712 = vrot.lane.b32.xlu1 %v2711_v16, %s6177_s8  ;;  %v3045_v6 = vsel %vm1078_vm8, %v3044_v44, %v3043_v26 }
 0xb67   : > { %v3047_v8 = vsel %vm1081_vm9, %v3046_v7, %v3045_v6 }
 0xb68   : > { %v3049_v43 = vsel %vm1084_vm10, %v3048_v15, %v3047_v8 }
 0xb69   : > { %v3051_v18 = vsel %vm1087_vm11, %v3050_v35, %v3049_v43 }
 0xb6a   : > { %3052 = vrot.lane.b32.xlu0 %v3051_v18, %s6177_s8 }
 0xbd8   : > { %v2713_v60 = vpop.permute.xlu1 %2712 }
 0xbd9   : > { %v2715_v41 = vsel %vm1244_vm15, inf, %v2713_v60 }
 0xbda   : > { %v2717_v11 = vrot.slane %v2715_v41, 1  ;;  %v2718_v27 = vrot.slane %v2715_v41, 2  ;;  %v2719_v3 = vrot.slane %v2715_v41, 3  ;;  %v2720_v63 = vrot.slane %v2715_v41, 4 }
 0xbdb   : > { %v2721_v38 = vrot.slane %v2715_v41, 5  ;;  %v2722_v53 = vrot.slane %v2715_v41, 6  ;;  %v2723_v2 = vrot.slane %v2715_v41, 7  ;;  %v7792_v44 = vmin.f32 %v7710_v22, %v2715_v41 }
 0xbdc   : > { %v7780_v10 = vmin.f32 %v7698_v28, %v2717_v11  ;;  %v7783_v46 = vmin.f32 %v7701_v59, %v2718_v27  ;;  %v3053_v32 = vpop.permute.xlu0 %3052  ;;  %v7786_v1 = vmin.f32 %v7704_v49, %v2719_v3  ;;  %v7789_v29 = vmin.f32 %v7707_v45, %v2720_v63 }
 0xbdd   : > { %v3055_v16 = vsel %vm1244_vm15, 0.0, %v3053_v32  ;;  %v7796_v26 = vmin.f32 %v7714_v51, %v2721_v38  ;;  %v7799_v28 = vmin.f32 %v7717_v23, %v2722_v53  ;;  %v7802_v49 = vmin.f32 %v7720_v13, %v2723_v2 }
 0xbde   : > { %v3057_v59 = vrot.slane %v3055_v16, 1  ;;  %v3058_v7 = vrot.slane %v3055_v16, 2  ;;  %v3059_v6 = vrot.slane %v3055_v16, 3  ;;  %v3060_v15 = vrot.slane %v3055_v16, 4 }
 0xbdf   : > { %v7805_v45 = vadd.f32 %v3055_v16, %v7723_v17  ;;  %v2748_v22 = vrot.slane %v7780_v10, 7  ;;  %v2750_v8 = vrot.slane %v7783_v46, 6  ;;  %v2752_v35 = vrot.slane %v7786_v1, 5 }
 0xbe0   : > { %v7810_v51 = vadd.f32 %v3057_v59, %v7728_v62  ;;  %v7813_v23 = vadd.f32 %v3058_v7, %v7731_v31  ;;  %v2754_v43 = vrot.slane %v7789_v29, 4  ;;  %v2756_v17 = vrot.slane %v7796_v26, 3 }
 0xbe1   : > { %v2749_v13 = vsel %vm1069_vm0, %v2748_v22, %v7792_v44  ;;  %v2758_v18 = vrot.slane %v7799_v28, 2  ;;  %v3061_v60 = vrot.slane %v3055_v16, 5  ;;  %v3062_v11 = vrot.slane %v3055_v16, 6 }
 0xbe2   : > { %v2751_v41 = vsel %vm1072_vm6, %v2750_v8, %v2749_v13  ;;  %v3063_v62 = vrot.slane %v3055_v16, 7  ;;  %v7823_v27 = vadd.f32 %v3059_v6, %v7741_v37  ;;  %v7827_v3 = vadd.f32 %v3060_v15, %v7745_v42 }
 0xbe3   : > { %v2753_v31 = vsel %vm1075_vm7, %v2752_v35, %v2751_v41  ;;  %v7830_v63 = vadd.f32 %v3061_v60, %v7748_v52  ;;  %v3088_v38 = vrot.slane %v7810_v51, 7  ;;  %v2760_v2 = vrot.slane %v7802_v49, 1 }
 0xbe4   : > { %v2755_v53 = vsel %vm1078_vm8, %v2754_v43, %v2753_v31  ;;  %v7836_v32 = vadd.f32 %v3062_v11, %v7754_v57  ;;  %v3090_v37 = vrot.slane %v7813_v23, 6  ;;  %v7841_v59 = vadd.f32 %v3063_v62, %v7759_v24 }
 0xbe5   : > { %v2757_v16 = vsel %vm1081_vm9, %v2756_v17, %v2755_v53  ;;  %v3089_v42 = vsel %vm1069_vm0, %v3088_v38, %v7805_v45  ;;  %v3092_v52 = vrot.slane %v7823_v27, 5  ;;  %v3094_v57 = vrot.slane %v7827_v3, 4 }
 0xbe6   : > { %v2759_v7 = vsel %vm1084_vm10, %v2758_v18, %v2757_v16  ;;  %v3091_v6 = vsel %vm1072_vm6, %v3090_v37, %v3089_v42  ;;  %v3096_v8 = vrot.slane %v7830_v63, 3  ;;  %v3098_v35 = vrot.slane %v7836_v32, 2 }
 0xbe7   : > { %v2761_v15 = vsel %vm1087_vm11, %v2760_v2, %v2759_v7  ;;  %v3093_v22 = vsel %vm1075_vm7, %v3092_v52, %v3091_v6  ;;  %v3100_v13 = vrot.slane %v7841_v59, 1 }
 0xbe8   : > { %2762 = vrot.lane.b32.xlu1 %v2761_v15, %s6178_s9  ;;  %v3095_v24 = vsel %vm1078_vm8, %v3094_v57, %v3093_v22  ;;  %v2800_v15 = vstv %s2799_s26  ;;  %s5191_s26 = scalar_select %p9806_p9, 1, 0 }
 0xbe9   : > { %v3097_v43 = vsel %vm1081_vm9, %v3096_v8, %v3095_v24  ;;  %vm2801_vm5 = vcmp.eq.s32.totalorder %v2800_v15, 1 }
 0xbea   : > { %v3099_v17 = vsel %vm1084_vm10, %v3098_v35, %v3097_v43 }
 0xbeb   : > { %v3101_v18 = vsel %vm1087_vm11, %v3100_v13, %v3099_v17 }
 0xbec   : > { %3102 = vrot.lane.b32.xlu0 %v3101_v18, %s6178_s9 }
 0xc5a   : > { %v2763_v60 = vpop.permute.xlu1 %2762 }
 0xc5b   : > { %v2765_v41 = vsel %vm1295_vm1, inf, %v2763_v60 }
 0xc5c   : > { %v2767_v11 = vrot.slane %v2765_v41, 1  ;;  %v2768_v62 = vrot.slane %v2765_v41, 2  ;;  %v2769_v31 = vrot.slane %v2765_v41, 3  ;;  %v2770_v38 = vrot.slane %v2765_v41, 4 }
 0xc5d   : > { %v2771_v53 = vrot.slane %v2765_v41, 5  ;;  %v2772_v2 = vrot.slane %v2765_v41, 6  ;;  %v2773_v37 = vrot.slane %v2765_v41, 7  ;;  %v2782_v6 = vmin.f32 %v7792_v44, %v2765_v41  ;;  %v7936_v41 = vld [vmem:[#allocation3 + $0xc] sm:$0x1] }
 0xc5e   : > { %v2783_v16 = vmin.f32 %v7780_v10, %v2767_v11  ;;  %v2784_v42 = vmin.f32 %v7783_v46, %v2768_v62  ;;  %v2785_v52 = vmin.f32 %v7786_v1, %v2769_v31  ;;  %v2786_v7 = vmin.f32 %v7789_v29, %v2770_v38  ;;  %v3103_v60 = vpop.permute.xlu0 %3102 }
 0xc5f   : > { %v2787_v57 = vmin.f32 %v7796_v26, %v2771_v53  ;;  %v2788_v24 = vmin.f32 %v7799_v28, %v2772_v2  ;;  %v2789_v10 = vmin.f32 %v7802_v49, %v2773_v37  ;;  %v2790_v1 = vadd.f32 %v2782_v6, %v7462_v47  ;;  %v7940_v53 = vld [vmem:[#allocation3 + $0x14] sm:$0x1] }
 0xc60   : > { %v2791_v22 = vadd.f32 %v2783_v16, %v7465_v21  ;;  %v2792_v8 = vadd.f32 %v2784_v42, %v7468_v33  ;;  %v2793_v35 = vadd.f32 %v2785_v52, %v7471_v30  ;;  %v2794_v46 = vadd.f32 %v2786_v7, %v7492_v0  ;;  %v7942_v16 = vld [vmem:[#allocation3 + $0x4] sm:$0x1] }
 0xc61   : > { %v2795_v29 = vadd.f32 %v2787_v57, %v7495_v9  ;;  %v2796_v44 = vadd.f32 %v2788_v24, %v7504_v39  ;;  %v2797_v30 = vadd.f32 %v2789_v10, %v7507_v50  ;;  %v3105_v11 = vsel %vm1295_vm1, 0.0, %v3103_v60 }
 0xc62   : > { %v7886_v21 = vsel %vm2801_vm5, %v2791_v22, %v7400_v61  ;;  %v7890_v33 = vsel %vm2801_vm5, %v2792_v8, %v7404_v48  ;;  %v7895_v0 = vsel %vm2801_vm5, %v2793_v35, %v7409_v58  ;;  %v7899_v47 = vsel %vm2801_vm5, %v2794_v46, %v7413_v40 }
 0xc63   : > { %v2830_v9 = vrot.slane %v7886_v21, 7  ;;  %v2832_v39 = vrot.slane %v7890_v33, 6  ;;  %v7905_v61 = vsel %vm2801_vm5, %v2790_v1, %v7419_v54  ;;  %v7909_v48 = vsel %vm2801_vm5, %v2795_v29, %v7423_v55 }
 0xc64   : > { %v7913_v58 = vsel %vm2801_vm5, %v2796_v44, %v7427_v25  ;;  %v2834_v50 = vrot.slane %v7895_v0, 5  ;;  %v7920_v26 = vsel %vm2801_vm5, %v2797_v30, %v7434_v56  ;;  %v2836_v55 = vrot.slane %v7899_v47, 4 }
 0xc65   : > { %v2831_v40 = vsel %vm1069_vm0, %v2830_v9, %v7905_v61  ;;  %v2838_v49 = vrot.slane %v7909_v48, 3  ;;  %v2840_v43 = vrot.slane %v7913_v58, 2  ;;  %v2842_v17 = vrot.slane %v7920_v26, 1 }
 0xc66   : > { %v2833_v54 = vsel %vm1072_vm6, %v2832_v39, %v2831_v40  ;;  %v3486_v62 = vrot.slane %v7936_v41, 7  ;;  %v3107_v31 = vrot.slane %v3105_v11, 1  ;;  %v3108_v38 = vrot.slane %v3105_v11, 2 }
 0xc67   : > { %v2835_v28 = vsel %vm1075_vm7, %v2834_v50, %v2833_v54  ;;  %v3109_v2 = vrot.slane %v3105_v11, 3  ;;  %v2821_v37 = vstv %s2820_s29  ;;  %v3110_v42 = vrot.slane %v3105_v11, 4  ;;  %s5212_s29 = scalar_select %p5211_p10, 0.0, inf }
 0xc68   : > { %v2837_v25 = vsel %vm1078_vm8, %v2836_v55, %v2835_v28  ;;  %v3487_v52 = vsel %vm1069_vm0, %v3486_v62, %v7942_v16  ;;  %v3488_v7 = vrot.slane %v7940_v53, 6  ;;  %v3111_v6 = vrot.slane %v3105_v11, 5  ;;  %v7987_v62 = vld [vmem:[#allocation3 + $0x24] sm:$0x1] }
 0xc69   : > { %v2839_v13 = vsel %vm1081_vm9, %v2838_v49, %v2837_v25  ;;  %v7948_v57 = vadd.f32 %v3105_v11, %v7805_v45  ;;  %v7951_v15 = vadd.f32 %v3107_v31, %v7810_v51  ;;  %v7954_v22 = vadd.f32 %v3108_v38, %v7813_v23 }
 0xc6a   : > { %v2841_v18 = vsel %vm1084_vm10, %v2840_v43, %v2839_v13  ;;  %v7957_v24 = vadd.f32 %v3109_v2, %v7823_v27  ;;  %v3112_v10 = vrot.slane %v3105_v11, 6  ;;  %v3113_v46 = vrot.slane %v3105_v11, 7 }
 0xc6b   : > { %v2843_v56 = vsel %vm1087_vm11, %v2842_v17, %v2841_v18  ;;  %v7973_v18 = vld [vmem:[#allocation3 + $0x1c] sm:$0x1]  ;;  %v7978_v60 = vadd.f32 %v3110_v42, %v7827_v3  ;;  %v7981_v11 = vadd.f32 %v3111_v6, %v7830_v63  ;;  %v8000_v42 = vld [vmem:[#allocation3 + $0x2c] sm:$0x1]  ;;  %v3492_v6 = vrot.slane %v7987_v62, 4 }
 0xc6c   : > { %2844 = vrot.lane.b32.xlu1 %v2843_v56, %s6174_s27  ;;  %v3490_v63 = vrot.slane %v7973_v18, 5 }
 0xcde   : > { %v2845_v8 = vpop.permute.xlu1 %2844 }
 0xcdf   : > { %v2847_v35 = vsel %vm1033_vm12, %v2821_v37, %v2845_v8 }
 0xce0   : > { %v2849_v1 = vrot.slane %v2847_v35, 1  ;;  %v2850_v29 = vrot.slane %v2847_v35, 2  ;;  %v2851_v44 = vrot.slane %v2847_v35, 3  ;;  %v2852_v30 = vrot.slane %v2847_v35, 4 }
 0xce1   : > { %v2853_v45 = vrot.slane %v2847_v35, 5  ;;  %v2864_v9 = vmin.f32 %v7905_v61, %v2847_v35  ;;  %v2854_v51 = vrot.slane %v2847_v35, 6  ;;  %v2855_v39 = vrot.slane %v2847_v35, 7 }
 0xce2   : > { %v2865_v23 = vmin.f32 %v7886_v21, %v2849_v1  ;;  %v2866_v40 = vmin.f32 %v7890_v33, %v2850_v29  ;;  %v2867_v27 = vmin.f32 %v7895_v0, %v2851_v44  ;;  %v2868_v50 = vmin.f32 %v7899_v47, %v2852_v30 }
 0xce3   : > { %v2872_v54 = vadd.f32 %v2864_v9, %v7456_v5  ;;  %v2869_v55 = vmin.f32 %v7909_v48, %v2853_v45  ;;  %v2870_v28 = vmin.f32 %v7913_v58, %v2854_v51  ;;  %v2871_v49 = vmin.f32 %v7920_v26, %v2855_v39  ;;  %v8013_v9 = vld [vmem:[#allocation3 + $0x3c] sm:$0x1] }
 0xce4   : > { %v2873_v25 = vadd.f32 %v2865_v23, %v7450_v20  ;;  %v2874_v43 = vadd.f32 %v2866_v40, %v7454_v12  ;;  %v2875_v13 = vadd.f32 %v2867_v27, %v7487_v19  ;;  %v2876_v17 = vadd.f32 %v2868_v50, %v7501_v34 }
 0xce5   : > { %v2877_v56 = vadd.f32 %v2869_v55, %v7514_v14  ;;  %v2878_v5 = vadd.f32 %v2870_v28, %v7520_v4  ;;  %v2879_v20 = vadd.f32 %v2871_v49, %v7527_v36  ;;  %v7990_v14 = vadd.f32 %v3112_v10, %v7836_v32  ;;  %v8006_v10 = vld [vmem:[#allocation3 + $0x34] sm:$0x1] }
 0xce6   : > { %v3131_v12 = vsub.f32 %v2873_v25, %v7951_v15  ;;  %v3132_v19 = vsub.f32 %v2874_v43, %v7954_v22  ;;  %v3133_v34 = vsub.f32 %v2875_v13, %v7957_v24  ;;  %v7993_v4 = vadd.f32 %v3113_v46, %v7841_v59 }
 0xce7   : > { %v3134_v3 = vsub.f32 %v2876_v17, %v7978_v60  ;;  %v3130_v36 = vsub.f32 %v2872_v54, %v7948_v57  ;;  %v3135_v31 = vsub.f32 %v2877_v56, %v7981_v11  ;;  %v3136_v37 = vsub.f32 %v2878_v5, %v7990_v14 }
 0xce8   : > { %v3146_v38 = vrot.slane %v3131_v12, 7  ;;  %v3148_v2 = vrot.slane %v3132_v19, 6  ;;  %v3489_v32 = vsel %vm1072_vm6, %v3488_v7, %v3487_v52  ;;  %v3137_v59 = vsub.f32 %v2879_v20, %v7993_v4 }
 0xce9   : > { %v3150_v35 = vrot.slane %v3133_v34, 5  ;;  %v3152_v1 = vrot.slane %v3134_v3, 4  ;;  %v3154_v44 = vrot.slane %v3135_v31, 3  ;;  %v3491_v30 = vsel %vm1075_vm7, %v3490_v63, %v3489_v32 }
 0xcea   : > { %v3147_v8 = vsel %vm1069_vm0, %v3146_v38, %v3130_v36  ;;  %v3494_v45 = vrot.slane %v8000_v42, 3  ;;  %v3156_v7 = vrot.slane %v3136_v37, 2  ;;  %v3493_v51 = vsel %vm1078_vm8, %v3492_v6, %v3491_v30 }
 0xceb   : > { %v3149_v46 = vsel %vm1072_vm6, %v3148_v2, %v3147_v8  ;;  %v3496_v39 = vrot.slane %v8006_v10, 2  ;;  %v3158_v40 = vrot.slane %v3137_v59, 1  ;;  %v3498_v55 = vrot.slane %v8013_v9, 1 }
 0xcec   : > { %v3151_v29 = vsel %vm1075_vm7, %v3150_v35, %v3149_v46  ;;  %v3495_v54 = vsel %vm1081_vm9, %v3494_v45, %v3493_v51 }
 0xced   : > { %v3153_v52 = vsel %vm1078_vm8, %v3152_v1, %v3151_v29  ;;  %v3497_v28 = vsel %vm1084_vm10, %v3496_v39, %v3495_v54 }
 0xcee   : > { %v3155_v23 = vsel %vm1081_vm9, %v3154_v44, %v3153_v52  ;;  %v3499_v49 = vsel %vm1087_vm11, %v3498_v55, %v3497_v28 }
 0xcef   : > { %v3157_v27 = vsel %vm1084_vm10, %v3156_v7, %v3155_v23 }
 0xcf0   : > { %v3159_v50 = vsel %vm1087_vm11, %v3158_v40, %v3157_v27 }
 0xcf1   : > { %3160 = vrot.lane.b32.xlu1 %v3159_v50, %s6174_s27 }
 0xcf5   : > { %3500 = vrot.lane.b32.xlu1 %v3499_v49, %s6174_s27 }
 0xd63   : > { %v3161_v25 = vpop.permute.xlu1 %3160 }
 0xd64   : > { %v3163_v43 = vsel %vm1033_vm12, inf, %v3161_v25 }
 0xd65   : > { %v3165_v13 = vrot.slane %v3163_v43, 1  ;;  %v3166_v17 = vrot.slane %v3163_v43, 2  ;;  %v3167_v56 = vrot.slane %v3163_v43, 3  ;;  %v3168_v5 = vrot.slane %v3163_v43, 4 }
 0xd66   : > { %v3169_v20 = vrot.slane %v3163_v43, 5  ;;  %v3170_v63 = vrot.slane %v3163_v43, 6  ;;  %v3171_v38 = vrot.slane %v3163_v43, 7  ;;  %v8035_v46 = vmin.f32 %v3130_v36, %v3163_v43 }
 0xd67   : > { %v8027_v2 = vmin.f32 %v3131_v12, %v3165_v13  ;;  %v8029_v32 = vmin.f32 %v3132_v19, %v3166_v17  ;;  %v3501_v6 = vpop.permute.xlu1 %3500  ;;  %v8031_v8 = vmin.f32 %v3133_v34, %v3167_v56  ;;  %v8033_v35 = vmin.f32 %v3134_v3, %v3168_v5 }
 0xd68   : > { %v3503_v1 = vsel %vm1033_vm12, 0.0, %v3501_v6  ;;  %v8038_v29 = vmin.f32 %v3135_v31, %v3169_v20  ;;  %v8040_v44 = vmin.f32 %v3136_v37, %v3170_v63  ;;  %v8042_v12 = vmin.f32 %v3137_v59, %v3171_v38 }
 0xd69   : > { %v3505_v30 = vrot.slane %v3503_v1, 1  ;;  %v3506_v45 = vrot.slane %v3503_v1, 2  ;;  %v3507_v52 = vrot.slane %v3503_v1, 3  ;;  %v3508_v19 = vrot.slane %v3503_v1, 4 }
 0xd6a   : > { %v8045_v7 = vadd.f32 %v3503_v1, %v7942_v16  ;;  %v3196_v34 = vrot.slane %v8027_v2, 7  ;;  %v3198_v3 = vrot.slane %v8029_v32, 6  ;;  %v3200_v37 = vrot.slane %v8031_v8, 5 }
 0xd6b   : > { %v8050_v36 = vadd.f32 %v3505_v30, %v7936_v41  ;;  %v8053_v31 = vadd.f32 %v3506_v45, %v7940_v53  ;;  %v3202_v51 = vrot.slane %v8033_v35, 4  ;;  %v3204_v39 = vrot.slane %v8038_v29, 3 }
 0xd6c   : > { %v3197_v59 = vsel %vm1069_vm0, %v3196_v34, %v8035_v46  ;;  %v3206_v23 = vrot.slane %v8040_v44, 2  ;;  %v3509_v40 = vrot.slane %v3503_v1, 5  ;;  %v3510_v50 = vrot.slane %v3503_v1, 6 }
 0xd6d   : > { %v3199_v27 = vsel %vm1072_vm6, %v3198_v3, %v3197_v59  ;;  %v3511_v54 = vrot.slane %v3503_v1, 7  ;;  %v8063_v55 = vadd.f32 %v3507_v52, %v7973_v18  ;;  %v8067_v49 = vadd.f32 %v3508_v19, %v7987_v62 }
 0xd6e   : > { %v3201_v28 = vsel %vm1075_vm7, %v3200_v37, %v3199_v27  ;;  %v8070_v25 = vadd.f32 %v3509_v40, %v8000_v42  ;;  %v3536_v43 = vrot.slane %v8050_v36, 7  ;;  %v3208_v17 = vrot.slane %v8042_v12, 1 }
 0xd6f   : > { %v3203_v13 = vsel %vm1078_vm8, %v3202_v51, %v3201_v28  ;;  %v8076_v56 = vadd.f32 %v3510_v50, %v8006_v10  ;;  %v3538_v5 = vrot.slane %v8053_v31, 6  ;;  %v8081_v63 = vadd.f32 %v3511_v54, %v8013_v9 }
 0xd70   : > { %v3205_v20 = vsel %vm1081_vm9, %v3204_v39, %v3203_v13  ;;  %v3537_v38 = vsel %vm1069_vm0, %v3536_v43, %v8045_v7  ;;  %v3540_v6 = vrot.slane %v8063_v55, 5  ;;  %v3542_v45 = vrot.slane %v8067_v49, 4 }
 0xd71   : > { %v3207_v1 = vsel %vm1084_vm10, %v3206_v23, %v3205_v20  ;;  %v3539_v30 = vsel %vm1072_vm6, %v3538_v5, %v3537_v38  ;;  %v3544_v34 = vrot.slane %v8070_v25, 3  ;;  %v3546_v37 = vrot.slane %v8076_v56, 2 }
 0xd72   : > { %v3209_v52 = vsel %vm1087_vm11, %v3208_v17, %v3207_v1  ;;  %v3541_v19 = vsel %vm1075_vm7, %v3540_v6, %v3539_v30  ;;  %v3548_v59 = vrot.slane %v8081_v63, 1 }
 0xd73   : > { %3210 = vrot.lane.b32.xlu0 %v3209_v52, %s6175_s6  ;;  %v3543_v3 = vsel %vm1078_vm8, %v3542_v45, %v3541_v19 }
 0xd74   : > { %v3545_v51 = vsel %vm1081_vm9, %v3544_v34, %v3543_v3 }
 0xd75   : > { %v3547_v39 = vsel %vm1084_vm10, %v3546_v37, %v3545_v51 }
 0xd76   : > { %v3549_v23 = vsel %vm1087_vm11, %v3548_v59, %v3547_v39 }
 0xd77   : > { %3550 = vrot.lane.b32.xlu1 %v3549_v23, %s6175_s6 }
 0xde5   : > { %v3211_v40 = vpop.permute.xlu0 %3210 }
 0xde6   : > { %v3213_v27 = vsel %vm1142_vm13, inf, %v3211_v40 }
 0xde7   : > { %v3215_v50 = vrot.slane %v3213_v27, 1  ;;  %v3216_v54 = vrot.slane %v3213_v27, 2  ;;  %v3217_v28 = vrot.slane %v3213_v27, 3  ;;  %v3218_v43 = vrot.slane %v3213_v27, 4 }
 0xde8   : > { %v3219_v13 = vrot.slane %v3213_v27, 5  ;;  %v3220_v17 = vrot.slane %v3213_v27, 6  ;;  %v3221_v5 = vrot.slane %v3213_v27, 7  ;;  %v8114_v45 = vmin.f32 %v8035_v46, %v3213_v27 }
 0xde9   : > { %v8102_v20 = vmin.f32 %v8027_v2, %v3215_v50  ;;  %v8105_v38 = vmin.f32 %v8029_v32, %v3216_v54  ;;  %v3551_v6 = vpop.permute.xlu1 %3550  ;;  %v8108_v1 = vmin.f32 %v8031_v8, %v3217_v28  ;;  %v8111_v30 = vmin.f32 %v8033_v35, %v3218_v43 }
 0xdea   : > { %v3553_v52 = vsel %vm1142_vm13, 0.0, %v3551_v6  ;;  %v8118_v19 = vmin.f32 %v8038_v29, %v3219_v13  ;;  %v8121_v2 = vmin.f32 %v8040_v44, %v3220_v17  ;;  %v8124_v8 = vmin.f32 %v8042_v12, %v3221_v5 }
 0xdeb   : > { %v3555_v32 = vrot.slane %v3553_v52, 1  ;;  %v3556_v34 = vrot.slane %v3553_v52, 2  ;;  %v3557_v3 = vrot.slane %v3553_v52, 3  ;;  %v3558_v37 = vrot.slane %v3553_v52, 4 }
 0xdec   : > { %v8127_v35 = vadd.f32 %v3553_v52, %v8045_v7  ;;  %v3246_v46 = vrot.slane %v8102_v20, 7  ;;  %v3248_v51 = vrot.slane %v8105_v38, 6  ;;  %v3250_v59 = vrot.slane %v8108_v1, 5 }
 0xded   : > { %v8132_v29 = vadd.f32 %v3555_v32, %v8050_v36  ;;  %v8135_v44 = vadd.f32 %v3556_v34, %v8053_v31  ;;  %v3252_v39 = vrot.slane %v8111_v30, 4  ;;  %v3254_v7 = vrot.slane %v8118_v19, 3 }
 0xdee   : > { %v3247_v12 = vsel %vm1069_vm0, %v3246_v46, %v8114_v45  ;;  %v3256_v23 = vrot.slane %v8121_v2, 2  ;;  %v3559_v40 = vrot.slane %v3553_v52, 5  ;;  %v3560_v50 = vrot.slane %v3553_v52, 6 }
 0xdef   : > { %v3249_v27 = vsel %vm1072_vm6, %v3248_v51, %v3247_v12  ;;  %v3561_v36 = vrot.slane %v3553_v52, 7  ;;  %v8145_v54 = vadd.f32 %v3557_v3, %v8063_v55  ;;  %v8149_v28 = vadd.f32 %v3558_v37, %v8067_v49 }
 0xdf0   : > { %v3251_v31 = vsel %vm1075_vm7, %v3250_v59, %v3249_v27  ;;  %v8152_v43 = vadd.f32 %v3559_v40, %v8070_v25  ;;  %v3586_v13 = vrot.slane %v8132_v29, 7  ;;  %v3258_v5 = vrot.slane %v8124_v8, 1 }
 0xdf1   : > { %v3253_v17 = vsel %vm1078_vm8, %v3252_v39, %v3251_v31  ;;  %v8158_v6 = vadd.f32 %v3560_v50, %v8076_v56  ;;  %v3588_v55 = vrot.slane %v8135_v44, 6  ;;  %v8163_v32 = vadd.f32 %v3561_v36, %v8081_v63 }
 0xdf2   : > { %v3255_v52 = vsel %vm1081_vm9, %v3254_v7, %v3253_v17  ;;  %v3587_v49 = vsel %vm1069_vm0, %v3586_v13, %v8127_v35  ;;  %v3590_v25 = vrot.slane %v8145_v54, 5  ;;  %v3592_v37 = vrot.slane %v8149_v28, 4 }
 0xdf3   : > { %v3257_v34 = vsel %vm1084_vm10, %v3256_v23, %v3255_v52  ;;  %v3589_v3 = vsel %vm1072_vm6, %v3588_v55, %v3587_v49  ;;  %v3594_v51 = vrot.slane %v8152_v43, 3  ;;  %v3596_v59 = vrot.slane %v8158_v6, 2 }
 0xdf4   : > { %v3259_v56 = vsel %vm1087_vm11, %v3258_v5, %v3257_v34  ;;  %v3591_v46 = vsel %vm1075_vm7, %v3590_v25, %v3589_v3  ;;  %v3598_v12 = vrot.slane %v8163_v32, 1 }
 0xdf5   : > { %3260 = vrot.lane.b32.xlu0 %v3259_v56, %s6176_s7  ;;  %v3593_v63 = vsel %vm1078_vm8, %v3592_v37, %v3591_v46 }
 0xdf6   : > { %v3595_v39 = vsel %vm1081_vm9, %v3594_v51, %v3593_v63 }
 0xdf7   : > { %v3597_v7 = vsel %vm1084_vm10, %v3596_v59, %v3595_v39 }
 0xdf8   : > { %v3599_v23 = vsel %vm1087_vm11, %v3598_v12, %v3597_v7 }
 0xdf9   : > { %3600 = vrot.lane.b32.xlu1 %v3599_v23, %s6176_s7 }
 0xe67   : > { %v3261_v40 = vpop.permute.xlu0 %3260 }
 0xe68   : > { %v3263_v27 = vsel %vm1193_vm14, inf, %v3261_v40 }
 0xe69   : > { %v3265_v50 = vrot.slane %v3263_v27, 1  ;;  %v3266_v36 = vrot.slane %v3263_v27, 2  ;;  %v3267_v31 = vrot.slane %v3263_v27, 3  ;;  %v3268_v13 = vrot.slane %v3263_v27, 4 }
 0xe6a   : > { %v3269_v17 = vrot.slane %v3263_v27, 5  ;;  %v3270_v5 = vrot.slane %v3263_v27, 6  ;;  %v3271_v55 = vrot.slane %v3263_v27, 7  ;;  %v8196_v37 = vmin.f32 %v8114_v45, %v3263_v27 }
 0xe6b   : > { %v8184_v52 = vmin.f32 %v8102_v20, %v3265_v50  ;;  %v8187_v49 = vmin.f32 %v8105_v38, %v3266_v36  ;;  %v3601_v25 = vpop.permute.xlu1 %3600  ;;  %v8190_v34 = vmin.f32 %v8108_v1, %v3267_v31  ;;  %v8193_v3 = vmin.f32 %v8111_v30, %v3268_v13 }
 0xe6c   : > { %v3603_v56 = vsel %vm1193_vm14, 0.0, %v3601_v25  ;;  %v8200_v46 = vmin.f32 %v8118_v19, %v3269_v17  ;;  %v8203_v20 = vmin.f32 %v8121_v2, %v3270_v5  ;;  %v8206_v1 = vmin.f32 %v8124_v8, %v3271_v55 }
 0xe6d   : > { %v3605_v38 = vrot.slane %v3603_v56, 1  ;;  %v3606_v51 = vrot.slane %v3603_v56, 2  ;;  %v3607_v63 = vrot.slane %v3603_v56, 3  ;;  %v3608_v59 = vrot.slane %v3603_v56, 4 }
 0xe6e   : > { %v8209_v30 = vadd.f32 %v3603_v56, %v8127_v35  ;;  %v3296_v45 = vrot.slane %v8184_v52, 7  ;;  %v3298_v39 = vrot.slane %v8187_v49, 6  ;;  %v3300_v12 = vrot.slane %v8190_v34, 5 }
 0xe6f   : > { %v8214_v19 = vadd.f32 %v3605_v38, %v8132_v29  ;;  %v8217_v2 = vadd.f32 %v3606_v51, %v8135_v44  ;;  %v3302_v7 = vrot.slane %v8193_v3, 4  ;;  %v3304_v35 = vrot.slane %v8200_v46, 3 }
 0xe70   : > { %v3297_v8 = vsel %vm1069_vm0, %v3296_v45, %v8196_v37  ;;  %v3306_v23 = vrot.slane %v8203_v20, 2  ;;  %v3609_v40 = vrot.slane %v3603_v56, 5  ;;  %v3610_v50 = vrot.slane %v3603_v56, 6 }
 0xe71   : > { %v3299_v27 = vsel %vm1072_vm6, %v3298_v39, %v3297_v8  ;;  %v3611_v29 = vrot.slane %v3603_v56, 7  ;;  %v8227_v36 = vadd.f32 %v3607_v63, %v8145_v54  ;;  %v8231_v31 = vadd.f32 %v3608_v59, %v8149_v28 }
 0xe72   : > { %v3301_v44 = vsel %vm1075_vm7, %v3300_v12, %v3299_v27  ;;  %v8234_v13 = vadd.f32 %v3609_v40, %v8152_v43  ;;  %v3636_v17 = vrot.slane %v8214_v19, 7  ;;  %v3308_v55 = vrot.slane %v8206_v1, 1 }
 0xe73   : > { %v3303_v5 = vsel %vm1078_vm8, %v3302_v7, %v3301_v44  ;;  %v8240_v25 = vadd.f32 %v3610_v50, %v8158_v6  ;;  %v3638_v54 = vrot.slane %v8217_v2, 6  ;;  %v8245_v38 = vadd.f32 %v3611_v29, %v8163_v32 }
 0xe74   : > { %v3305_v56 = vsel %vm1081_vm9, %v3304_v35, %v3303_v5  ;;  %v3637_v28 = vsel %vm1069_vm0, %v3636_v17, %v8209_v30  ;;  %v3640_v43 = vrot.slane %v8227_v36, 5  ;;  %v3642_v59 = vrot.slane %v8231_v31, 4 }
 0xe75   : > { %v3307_v51 = vsel %vm1084_vm10, %v3306_v23, %v3305_v56  ;;  %v3639_v63 = vsel %vm1072_vm6, %v3638_v54, %v3637_v28  ;;  %v3644_v39 = vrot.slane %v8234_v13, 3  ;;  %v3646_v12 = vrot.slane %v8240_v25, 2 }
 0xe76   : > { %v3309_v6 = vsel %vm1087_vm11, %v3308_v55, %v3307_v51  ;;  %v3641_v45 = vsel %vm1075_vm7, %v3640_v43, %v3639_v63  ;;  %v3648_v8 = vrot.slane %v8245_v38, 1 }
 0xe77   : > { %3310 = vrot.lane.b32.xlu0 %v3309_v6, %s6177_s8  ;;  %v3643_v32 = vsel %vm1078_vm8, %v3642_v59, %v3641_v45 }
 0xe78   : > { %v3645_v7 = vsel %vm1081_vm9, %v3644_v39, %v3643_v32 }
 0xe79   : > { %v3647_v35 = vsel %vm1084_vm10, %v3646_v12, %v3645_v7 }
 0xe7a   : > { %v3649_v23 = vsel %vm1087_vm11, %v3648_v8, %v3647_v35 }
 0xe7b   : > { %3650 = vrot.lane.b32.xlu1 %v3649_v23, %s6177_s8 }
 0xee9   : > { %v3311_v40 = vpop.permute.xlu0 %3310 }
 0xeea   : > { %v3313_v27 = vsel %vm1244_vm15, inf, %v3311_v40 }
 0xeeb   : > { %v3315_v50 = vrot.slane %v3313_v27, 1  ;;  %v3316_v29 = vrot.slane %v3313_v27, 2  ;;  %v3317_v44 = vrot.slane %v3313_v27, 3  ;;  %v3318_v17 = vrot.slane %v3313_v27, 4 }
 0xeec   : > { %v3319_v5 = vrot.slane %v3313_v27, 5  ;;  %v3320_v55 = vrot.slane %v3313_v27, 6  ;;  %v3321_v54 = vrot.slane %v3313_v27, 7  ;;  %v8278_v59 = vmin.f32 %v8196_v37, %v3313_v27 }
 0xeed   : > { %v8266_v56 = vmin.f32 %v8184_v52, %v3315_v50  ;;  %v8269_v28 = vmin.f32 %v8187_v49, %v3316_v29  ;;  %v3651_v43 = vpop.permute.xlu1 %3650  ;;  %v8272_v51 = vmin.f32 %v8190_v34, %v3317_v44  ;;  %v8275_v63 = vmin.f32 %v8193_v3, %v3318_v17 }
 0xeee   : > { %v3653_v6 = vsel %vm1244_vm15, 0.0, %v3651_v43  ;;  %v8282_v45 = vmin.f32 %v8200_v46, %v3319_v5  ;;  %v8285_v52 = vmin.f32 %v8203_v20, %v3320_v55  ;;  %v8288_v34 = vmin.f32 %v8206_v1, %v3321_v54 }
 0xeef   : > { %v3655_v49 = vrot.slane %v3653_v6, 1  ;;  %v3656_v39 = vrot.slane %v3653_v6, 2  ;;  %v3657_v32 = vrot.slane %v3653_v6, 3  ;;  %v3658_v12 = vrot.slane %v3653_v6, 4 }
 0xef0   : > { %v8291_v3 = vadd.f32 %v3653_v6, %v8209_v30  ;;  %v3346_v37 = vrot.slane %v8266_v56, 7  ;;  %v3348_v7 = vrot.slane %v8269_v28, 6  ;;  %v3350_v8 = vrot.slane %v8272_v51, 5 }
 0xef1   : > { %v8296_v46 = vadd.f32 %v3655_v49, %v8214_v19  ;;  %v8299_v20 = vadd.f32 %v3656_v39, %v8217_v2  ;;  %v3352_v35 = vrot.slane %v8275_v63, 4  ;;  %v3354_v30 = vrot.slane %v8282_v45, 3 }
 0xef2   : > { %v3347_v1 = vsel %vm1069_vm0, %v3346_v37, %v8278_v59  ;;  %v3356_v23 = vrot.slane %v8285_v52, 2  ;;  %v3659_v40 = vrot.slane %v3653_v6, 5  ;;  %v3660_v50 = vrot.slane %v3653_v6, 6 }
 0xef3   : > { %v3349_v27 = vsel %vm1072_vm6, %v3348_v7, %v3347_v1  ;;  %v3661_v19 = vrot.slane %v3653_v6, 7  ;;  %v8309_v29 = vadd.f32 %v3657_v32, %v8227_v36  ;;  %v8313_v44 = vadd.f32 %v3658_v12, %v8231_v31 }
 0xef4   : > { %v3351_v2 = vsel %vm1075_vm7, %v3350_v8, %v3349_v27  ;;  %v8316_v17 = vadd.f32 %v3659_v40, %v8234_v13  ;;  %v3686_v5 = vrot.slane %v8296_v46, 7  ;;  %v3358_v54 = vrot.slane %v8288_v34, 1 }
 0xef5   : > { %v3353_v55 = vsel %vm1078_vm8, %v3352_v35, %v3351_v2  ;;  %v8322_v43 = vadd.f32 %v3660_v50, %v8240_v25  ;;  %v3688_v36 = vrot.slane %v8299_v20, 6  ;;  %v8327_v49 = vadd.f32 %v3661_v19, %v8245_v38 }
 0xef6   : > { %v3355_v6 = vsel %vm1081_vm9, %v3354_v30, %v3353_v55  ;;  %v3687_v31 = vsel %vm1069_vm0, %v3686_v5, %v8291_v3  ;;  %v3690_v13 = vrot.slane %v8309_v29, 5  ;;  %v3692_v25 = vrot.slane %v8313_v44, 4 }
 0xef7   : > { %v3357_v39 = vsel %vm1084_vm10, %v3356_v23, %v3355_v6  ;;  %v3689_v32 = vsel %vm1072_vm6, %v3688_v36, %v3687_v31  ;;  %v3694_v7 = vrot.slane %v8316_v17, 3  ;;  %v3696_v8 = vrot.slane %v8322_v43, 2 }
 0xef8   : > { %v3359_v12 = vsel %vm1087_vm11, %v3358_v54, %v3357_v39  ;;  %v3691_v37 = vsel %vm1075_vm7, %v3690_v13, %v3689_v32  ;;  %v3698_v1 = vrot.slane %v8327_v49, 1 }
 0xef9   : > { %3360 = vrot.lane.b32.xlu0 %v3359_v12, %s6178_s9  ;;  %v3693_v38 = vsel %vm1078_vm8, %v3692_v25, %v3691_v37  ;;  %v3398_v12 = vstv %s3397_s3 }
 0xefa   : > { %v3695_v35 = vsel %vm1081_vm9, %v3694_v7, %v3693_v38  ;;  %vm3399_vm2 = vcmp.eq.s32.totalorder %v3398_v12, 1 }
 0xefb   : > { %v3697_v30 = vsel %vm1084_vm10, %v3696_v8, %v3695_v35 }
 0xefc   : > { %v3699_v23 = vsel %vm1087_vm11, %v3698_v1, %v3697_v30 }
 0xefd   : > { %3700 = vrot.lane.b32.xlu1 %v3699_v23, %s6178_s9 }
 0xf6b   : > { %v3361_v40 = vpop.permute.xlu0 %3360 }
 0xf6c   : > { %v3363_v27 = vsel %vm1295_vm1, inf, %v3361_v40 }
 0xf6d   : > { %v3365_v50 = vrot.slane %v3363_v27, 1  ;;  %v3366_v19 = vrot.slane %v3363_v27, 2  ;;  %v3367_v2 = vrot.slane %v3363_v27, 3  ;;  %v3368_v5 = vrot.slane %v3363_v27, 4 }
 0xf6e   : > { %v3369_v55 = vrot.slane %v3363_v27, 5  ;;  %v3370_v54 = vrot.slane %v3363_v27, 6  ;;  %v3371_v36 = vrot.slane %v3363_v27, 7  ;;  %v3380_v32 = vmin.f32 %v8278_v59, %v3363_v27  ;;  %v8422_v27 = vld [vmem:[#allocation3 + $0xd] sm:$0x1] }
 0xf6f   : > { %v3381_v6 = vmin.f32 %v8266_v56, %v3365_v50  ;;  %v3382_v31 = vmin.f32 %v8269_v28, %v3366_v19  ;;  %v3383_v13 = vmin.f32 %v8272_v51, %v3367_v2  ;;  %v3384_v39 = vmin.f32 %v8275_v63, %v3368_v5  ;;  %v3701_v40 = vpop.permute.xlu1 %3700 }
 0xf70   : > { %v3385_v25 = vmin.f32 %v8282_v45, %v3369_v55  ;;  %v3386_v38 = vmin.f32 %v8285_v52, %v3370_v54  ;;  %v3387_v56 = vmin.f32 %v8288_v34, %v3371_v36  ;;  %v3388_v51 = vadd.f32 %v3380_v32, %v7948_v57  ;;  %v8426_v55 = vld [vmem:[#allocation3 + $0x15] sm:$0x1] }
 0xf71   : > { %v3389_v37 = vadd.f32 %v3381_v6, %v7951_v15  ;;  %v3390_v7 = vadd.f32 %v3382_v31, %v7954_v22  ;;  %v3391_v8 = vadd.f32 %v3383_v13, %v7957_v24  ;;  %v3392_v28 = vadd.f32 %v3384_v39, %v7978_v60  ;;  %v8428_v6 = vld [vmem:[#allocation3 + $0x5] sm:$0x1] }
 0xf72   : > { %v3393_v63 = vadd.f32 %v3385_v25, %v7981_v11  ;;  %v3394_v59 = vadd.f32 %v3386_v38, %v7990_v14  ;;  %v3395_v24 = vadd.f32 %v3387_v56, %v7993_v4  ;;  %v3703_v50 = vsel %vm1295_vm1, 0.0, %v3701_v40 }
 0xf73   : > { %v8372_v15 = vsel %vm3399_vm2, %v3389_v37, %v7886_v21  ;;  %v8376_v22 = vsel %vm3399_vm2, %v3390_v7, %v7890_v33  ;;  %v8381_v60 = vsel %vm3399_vm2, %v3391_v8, %v7895_v0  ;;  %v8385_v57 = vsel %vm3399_vm2, %v3392_v28, %v7899_v47 }
 0xf74   : > { %v3428_v11 = vrot.slane %v8372_v15, 7  ;;  %v3430_v14 = vrot.slane %v8376_v22, 6  ;;  %v8391_v21 = vsel %vm3399_vm2, %v3388_v51, %v7905_v61  ;;  %v8395_v33 = vsel %vm3399_vm2, %v3393_v63, %v7909_v48 }
 0xf75   : > { %v8399_v0 = vsel %vm3399_vm2, %v3394_v59, %v7913_v58  ;;  %v3432_v4 = vrot.slane %v8381_v60, 5  ;;  %v8406_v45 = vsel %vm3399_vm2, %v3395_v24, %v7920_v26  ;;  %v3434_v48 = vrot.slane %v8385_v57, 4 }
 0xf76   : > { %v3429_v47 = vsel %vm1069_vm0, %v3428_v11, %v8391_v21  ;;  %v3436_v34 = vrot.slane %v8395_v33, 3  ;;  %v3438_v35 = vrot.slane %v8399_v0, 2  ;;  %v3440_v30 = vrot.slane %v8406_v45, 1 }
 0xf77   : > { %v3431_v61 = vsel %vm1072_vm6, %v3430_v14, %v3429_v47  ;;  %v4084_v19 = vrot.slane %v8422_v27, 7  ;;  %v3705_v2 = vrot.slane %v3703_v50, 1  ;;  %v3706_v5 = vrot.slane %v3703_v50, 2 }
 0xf78   : > { %v3433_v52 = vsel %vm1075_vm7, %v3432_v4, %v3431_v61  ;;  %v3707_v54 = vrot.slane %v3703_v50, 3  ;;  %v3419_v36 = vstv %s3418_s5  ;;  %v3708_v31 = vrot.slane %v3703_v50, 4 }
 0xf79   : > { %v3435_v58 = vsel %vm1078_vm8, %v3434_v48, %v3433_v52  ;;  %v4085_v13 = vsel %vm1069_vm0, %v4084_v19, %v8428_v6  ;;  %v4086_v39 = vrot.slane %v8426_v55, 6  ;;  %v3709_v32 = vrot.slane %v3703_v50, 5  ;;  %v8473_v19 = vld [vmem:[#allocation3 + $0x25] sm:$0x1] }
 0xf7a   : > { %v3437_v1 = vsel %vm1081_vm9, %v3436_v34, %v3435_v58  ;;  %v8434_v25 = vadd.f32 %v3703_v50, %v8291_v3  ;;  %v8437_v12 = vadd.f32 %v3705_v2, %v8296_v46  ;;  %v8440_v37 = vadd.f32 %v3706_v5, %v8299_v20 }
 0xf7b   : > { %v3439_v23 = vsel %vm1084_vm10, %v3438_v35, %v3437_v1  ;;  %v8443_v38 = vadd.f32 %v3707_v54, %v8309_v29  ;;  %v3710_v56 = vrot.slane %v3703_v50, 6  ;;  %v3711_v28 = vrot.slane %v3703_v50, 7 }
 0xf7c   : > { %v3441_v26 = vsel %vm1087_vm11, %v3440_v30, %v3439_v23  ;;  %v8459_v23 = vld [vmem:[#allocation3 + $0x1d] sm:$0x1]  ;;  %v8464_v40 = vadd.f32 %v3708_v31, %v8313_v44  ;;  %v8467_v50 = vadd.f32 %v3709_v32, %v8316_v17  ;;  %v8486_v31 = vld [vmem:[#allocation3 + $0x2d] sm:$0x1]  ;;  %v4090_v32 = vrot.slane %v8473_v19, 4 }
 0xf7d   : > { %3442 = vrot.lane.b32.xlu0 %v3441_v26, %s6174_s27  ;;  %v4088_v17 = vrot.slane %v8459_v23, 5 }
 0xfef   : > { %v3443_v7 = vpop.permute.xlu0 %3442 }
 0xff0   : > { %v3445_v8 = vsel %vm1033_vm12, %v3419_v36, %v3443_v7 }
 0xff1   : > { %v3447_v51 = vrot.slane %v3445_v8, 1  ;;  %v3448_v63 = vrot.slane %v3445_v8, 2  ;;  %v3449_v59 = vrot.slane %v3445_v8, 3  ;;  %v3450_v24 = vrot.slane %v3445_v8, 4 }
 0xff2   : > { %v3451_v3 = vrot.slane %v3445_v8, 5  ;;  %v3462_v11 = vmin.f32 %v8391_v21, %v3445_v8  ;;  %v3452_v46 = vrot.slane %v3445_v8, 6  ;;  %v3453_v14 = vrot.slane %v3445_v8, 7 }
 0xff3   : > { %v3463_v20 = vmin.f32 %v8372_v15, %v3447_v51  ;;  %v3464_v47 = vmin.f32 %v8376_v22, %v3448_v63  ;;  %v3465_v29 = vmin.f32 %v8381_v60, %v3449_v59  ;;  %v3466_v4 = vmin.f32 %v8385_v57, %v3450_v24 }
 0xff4   : > { %v3470_v61 = vadd.f32 %v3462_v11, %v7942_v16  ;;  %v3467_v48 = vmin.f32 %v8395_v33, %v3451_v3  ;;  %v3468_v52 = vmin.f32 %v8399_v0, %v3452_v46  ;;  %v3469_v34 = vmin.f32 %v8406_v45, %v3453_v14  ;;  %v8499_v11 = vld [vmem:[#allocation3 + $0x3d] sm:$0x1] }
 0xff5   : > { %v3471_v58 = vadd.f32 %v3463_v20, %v7936_v41  ;;  %v3472_v35 = vadd.f32 %v3464_v47, %v7940_v53  ;;  %v3473_v1 = vadd.f32 %v3465_v29, %v7973_v18  ;;  %v3474_v30 = vadd.f32 %v3466_v4, %v7987_v62 }
 0xff6   : > { %v3475_v26 = vadd.f32 %v3467_v48, %v8000_v42  ;;  %v3476_v16 = vadd.f32 %v3468_v52, %v8006_v10  ;;  %v3477_v41 = vadd.f32 %v3469_v34, %v8013_v9  ;;  %v8476_v42 = vadd.f32 %v3710_v56, %v8322_v43  ;;  %v8492_v56 = vld [vmem:[#allocation3 + $0x35] sm:$0x1] }
 0xff7   : > { %v3729_v53 = vsub.f32 %v3471_v58, %v8437_v12  ;;  %v3730_v18 = vsub.f32 %v3472_v35, %v8440_v37  ;;  %v3731_v62 = vsub.f32 %v3473_v1, %v8443_v38  ;;  %v8479_v10 = vadd.f32 %v3711_v28, %v8327_v49 }
 0xff8   : > { %v3732_v44 = vsub.f32 %v3474_v30, %v8464_v40  ;;  %v3728_v9 = vsub.f32 %v3470_v61, %v8434_v25  ;;  %v3733_v2 = vsub.f32 %v3475_v26, %v8467_v50  ;;  %v3734_v36 = vsub.f32 %v3476_v16, %v8476_v42 }
 0xff9   : > { %v3744_v5 = vrot.slane %v3729_v53, 7  ;;  %v3746_v54 = vrot.slane %v3730_v18, 6  ;;  %v4087_v43 = vsel %vm1072_vm6, %v4086_v39, %v4085_v13  ;;  %v3735_v49 = vsub.f32 %v3477_v41, %v8479_v10 }
 0xffa   : > { %v3748_v8 = vrot.slane %v3731_v62, 5  ;;  %v3750_v51 = vrot.slane %v3732_v44, 4  ;;  %v3752_v59 = vrot.slane %v3733_v2, 3  ;;  %v4089_v24 = vsel %vm1075_vm7, %v4088_v17, %v4087_v43 }
 0xffb   : > { %v3745_v7 = vsel %vm1069_vm0, %v3744_v5, %v3728_v9  ;;  %v4092_v3 = vrot.slane %v8486_v31, 3  ;;  %v3754_v39 = vrot.slane %v3734_v36, 2  ;;  %v4091_v46 = vsel %vm1078_vm8, %v4090_v32, %v4089_v24 }
 0xffc   : > { %v3747_v28 = vsel %vm1072_vm6, %v3746_v54, %v3745_v7  ;;  %v4094_v14 = vrot.slane %v8492_v56, 2  ;;  %v3756_v47 = vrot.slane %v3735_v49, 1  ;;  %v4096_v48 = vrot.slane %v8499_v11, 1 }
 0xffd   : > { %v3749_v63 = vsel %vm1075_vm7, %v3748_v8, %v3747_v28  ;;  %v4093_v61 = vsel %vm1081_vm9, %v4092_v3, %v4091_v46 }
 0xffe   : > { %v3751_v13 = vsel %vm1078_vm8, %v3750_v51, %v3749_v63  ;;  %v4095_v52 = vsel %vm1084_vm10, %v4094_v14, %v4093_v61 }
 0xfff   : > { %v3753_v20 = vsel %vm1081_vm9, %v3752_v59, %v3751_v13  ;;  %v4097_v34 = vsel %vm1087_vm11, %v4096_v48, %v4095_v52 }
0x1000   : > { %v3755_v29 = vsel %vm1084_vm10, %v3754_v39, %v3753_v20 }
0x1001   : > { %v3757_v4 = vsel %vm1087_vm11, %v3756_v47, %v3755_v29 }
0x1002   : > { %3758 = vrot.lane.b32.xlu0 %v3757_v4, %s6174_s27 }
0x1006   : > { %4098 = vrot.lane.b32.xlu0 %v4097_v34, %s6174_s27 }
0x1074   : > { %v3759_v58 = vpop.permute.xlu0 %3758 }
0x1075   : > { %v3761_v35 = vsel %vm1033_vm12, inf, %v3759_v58 }
0x1076   : > { %v3763_v1 = vrot.slane %v3761_v35, 1  ;;  %v3764_v30 = vrot.slane %v3761_v35, 2  ;;  %v3765_v26 = vrot.slane %v3761_v35, 3  ;;  %v3766_v16 = vrot.slane %v3761_v35, 4 }
0x1077   : > { %v3767_v41 = vrot.slane %v3761_v35, 5  ;;  %v3768_v17 = vrot.slane %v3761_v35, 6  ;;  %v3769_v5 = vrot.slane %v3761_v35, 7  ;;  %v8521_v28 = vmin.f32 %v3728_v9, %v3761_v35 }
0x1078   : > { %v8513_v54 = vmin.f32 %v3729_v53, %v3763_v1  ;;  %v8515_v43 = vmin.f32 %v3730_v18, %v3764_v30  ;;  %v4099_v32 = vpop.permute.xlu0 %4098  ;;  %v8517_v7 = vmin.f32 %v3731_v62, %v3765_v26  ;;  %v8519_v8 = vmin.f32 %v3732_v44, %v3766_v16 }
0x1079   : > { %v4101_v51 = vsel %vm1033_vm12, 0.0, %v4099_v32  ;;  %v8524_v63 = vmin.f32 %v3733_v2, %v3767_v41  ;;  %v8526_v59 = vmin.f32 %v3734_v36, %v3768_v17  ;;  %v8528_v53 = vmin.f32 %v3735_v49, %v3769_v5 }
0x107a   : > { %v4103_v24 = vrot.slane %v4101_v51, 1  ;;  %v4104_v3 = vrot.slane %v4101_v51, 2  ;;  %v4105_v13 = vrot.slane %v4101_v51, 3  ;;  %v4106_v18 = vrot.slane %v4101_v51, 4 }
0x107b   : > { %v8531_v39 = vadd.f32 %v4101_v51, %v8428_v6  ;;  %v3794_v62 = vrot.slane %v8513_v54, 7  ;;  %v3796_v44 = vrot.slane %v8515_v43, 6  ;;  %v3798_v36 = vrot.slane %v8517_v7, 5 }
0x107c   : > { %v8536_v9 = vadd.f32 %v4103_v24, %v8422_v27  ;;  %v8539_v2 = vadd.f32 %v4104_v3, %v8426_v55  ;;  %v3800_v46 = vrot.slane %v8519_v8, 4  ;;  %v3802_v14 = vrot.slane %v8524_v63, 3 }
0x107d   : > { %v3795_v49 = vsel %vm1069_vm0, %v3794_v62, %v8521_v28  ;;  %v3804_v20 = vrot.slane %v8526_v59, 2  ;;  %v4107_v47 = vrot.slane %v4101_v51, 5  ;;  %v4108_v4 = vrot.slane %v4101_v51, 6 }
0x107e   : > { %v3797_v29 = vsel %vm1072_vm6, %v3796_v44, %v3795_v49  ;;  %v4109_v61 = vrot.slane %v4101_v51, 7  ;;  %v8549_v48 = vadd.f32 %v4105_v13, %v8459_v23  ;;  %v8553_v34 = vadd.f32 %v4106_v18, %v8473_v19 }
0x107f   : > { %v3799_v52 = vsel %vm1075_vm7, %v3798_v36, %v3797_v29  ;;  %v8556_v58 = vadd.f32 %v4107_v47, %v8486_v31  ;;  %v4134_v35 = vrot.slane %v8536_v9, 7  ;;  %v3806_v30 = vrot.slane %v8528_v53, 1 }
0x1080   : > { %v3801_v1 = vsel %vm1078_vm8, %v3800_v46, %v3799_v52  ;;  %v8562_v26 = vadd.f32 %v4108_v4, %v8492_v56  ;;  %v4136_v16 = vrot.slane %v8539_v2, 6  ;;  %v8567_v17 = vadd.f32 %v4109_v61, %v8499_v11 }
0x1081   : > { %v3803_v41 = vsel %vm1081_vm9, %v3802_v14, %v3801_v1  ;;  %v4135_v5 = vsel %vm1069_vm0, %v4134_v35, %v8531_v39  ;;  %v4138_v32 = vrot.slane %v8549_v48, 5  ;;  %v4140_v3 = vrot.slane %v8553_v34, 4 }
0x1082   : > { %v3805_v51 = vsel %vm1084_vm10, %v3804_v20, %v3803_v41  ;;  %v4137_v24 = vsel %vm1072_vm6, %v4136_v16, %v4135_v5  ;;  %v4142_v62 = vrot.slane %v8556_v58, 3  ;;  %v4144_v36 = vrot.slane %v8562_v26, 2 }
0x1083   : > { %v3807_v13 = vsel %vm1087_vm11, %v3806_v30, %v3805_v51  ;;  %v4139_v18 = vsel %vm1075_vm7, %v4138_v32, %v4137_v24  ;;  %v4146_v49 = vrot.slane %v8567_v17, 1 }
0x1084   : > { %3808 = vrot.lane.b32.xlu1 %v3807_v13, %s6175_s6  ;;  %v4141_v44 = vsel %vm1078_vm8, %v4140_v3, %v4139_v18 }
0x1085   : > { %v4143_v46 = vsel %vm1081_vm9, %v4142_v62, %v4141_v44 }
0x1086   : > { %v4145_v14 = vsel %vm1084_vm10, %v4144_v36, %v4143_v46 }
0x1087   : > { %v4147_v20 = vsel %vm1087_vm11, %v4146_v49, %v4145_v14 }
0x1088   : > { %4148 = vrot.lane.b32.xlu0 %v4147_v20, %s6175_s6 }
0x10f6   : > { %v3809_v47 = vpop.permute.xlu1 %3808 }
0x10f7   : > { %v3811_v29 = vsel %vm1142_vm13, inf, %v3809_v47 }
0x10f8   : > { %v3813_v4 = vrot.slane %v3811_v29, 1  ;;  %v3814_v61 = vrot.slane %v3811_v29, 2  ;;  %v3815_v52 = vrot.slane %v3811_v29, 3  ;;  %v3816_v35 = vrot.slane %v3811_v29, 4 }
0x10f9   : > { %v3817_v1 = vrot.slane %v3811_v29, 5  ;;  %v3818_v30 = vrot.slane %v3811_v29, 6  ;;  %v3819_v16 = vrot.slane %v3811_v29, 7  ;;  %v8600_v3 = vmin.f32 %v8521_v28, %v3811_v29 }
0x10fa   : > { %v8588_v41 = vmin.f32 %v8513_v54, %v3813_v4  ;;  %v8591_v5 = vmin.f32 %v8515_v43, %v3814_v61  ;;  %v4149_v32 = vpop.permute.xlu0 %4148  ;;  %v8594_v51 = vmin.f32 %v8517_v7, %v3815_v52  ;;  %v8597_v24 = vmin.f32 %v8519_v8, %v3816_v35 }
0x10fb   : > { %v4151_v13 = vsel %vm1142_vm13, 0.0, %v4149_v32  ;;  %v8604_v18 = vmin.f32 %v8524_v63, %v3817_v1  ;;  %v8607_v54 = vmin.f32 %v8526_v59, %v3818_v30  ;;  %v8610_v7 = vmin.f32 %v8528_v53, %v3819_v16 }
0x10fc   : > { %v4153_v43 = vrot.slane %v4151_v13, 1  ;;  %v4154_v62 = vrot.slane %v4151_v13, 2  ;;  %v4155_v44 = vrot.slane %v4151_v13, 3  ;;  %v4156_v36 = vrot.slane %v4151_v13, 4 }
0x10fd   : > { %v8613_v8 = vadd.f32 %v4151_v13, %v8531_v39  ;;  %v3844_v28 = vrot.slane %v8588_v41, 7  ;;  %v3846_v46 = vrot.slane %v8591_v5, 6  ;;  %v3848_v49 = vrot.slane %v8594_v51, 5 }
0x10fe   : > { %v8618_v63 = vadd.f32 %v4153_v43, %v8536_v9  ;;  %v8621_v59 = vadd.f32 %v4154_v62, %v8539_v2  ;;  %v3850_v14 = vrot.slane %v8597_v24, 4  ;;  %v3852_v39 = vrot.slane %v8604_v18, 3 }
0x10ff   : > { %v3845_v53 = vsel %vm1069_vm0, %v3844_v28, %v8600_v3  ;;  %v3854_v20 = vrot.slane %v8607_v54, 2  ;;  %v4157_v47 = vrot.slane %v4151_v13, 5  ;;  %v4158_v4 = vrot.slane %v4151_v13, 6 }
0x1100   : > { %v3847_v29 = vsel %vm1072_vm6, %v3846_v46, %v3845_v53  ;;  %v4159_v9 = vrot.slane %v4151_v13, 7  ;;  %v8631_v61 = vadd.f32 %v4155_v44, %v8549_v48  ;;  %v8635_v52 = vadd.f32 %v4156_v36, %v8553_v34 }
0x1101   : > { %v3849_v2 = vsel %vm1075_vm7, %v3848_v49, %v3847_v29  ;;  %v8638_v35 = vadd.f32 %v4157_v47, %v8556_v58  ;;  %v4184_v1 = vrot.slane %v8618_v63, 7  ;;  %v3856_v16 = vrot.slane %v8610_v7, 1 }
0x1102   : > { %v3851_v30 = vsel %vm1078_vm8, %v3850_v14, %v3849_v2  ;;  %v8644_v32 = vadd.f32 %v4158_v4, %v8562_v26  ;;  %v4186_v48 = vrot.slane %v8621_v59, 6  ;;  %v8649_v43 = vadd.f32 %v4159_v9, %v8567_v17 }
0x1103   : > { %v3853_v13 = vsel %vm1081_vm9, %v3852_v39, %v3851_v30  ;;  %v4185_v34 = vsel %vm1069_vm0, %v4184_v1, %v8613_v8  ;;  %v4188_v58 = vrot.slane %v8631_v61, 5  ;;  %v4190_v36 = vrot.slane %v8635_v52, 4 }
0x1104   : > { %v3855_v62 = vsel %vm1084_vm10, %v3854_v20, %v3853_v13  ;;  %v4187_v44 = vsel %vm1072_vm6, %v4186_v48, %v4185_v34  ;;  %v4192_v46 = vrot.slane %v8638_v35, 3  ;;  %v4194_v49 = vrot.slane %v8644_v32, 2 }
0x1105   : > { %v3857_v26 = vsel %vm1087_vm11, %v3856_v16, %v3855_v62  ;;  %v4189_v28 = vsel %vm1075_vm7, %v4188_v58, %v4187_v44  ;;  %v4196_v53 = vrot.slane %v8649_v43, 1 }
0x1106   : > { %3858 = vrot.lane.b32.xlu1 %v3857_v26, %s6176_s7  ;;  %v4191_v17 = vsel %vm1078_vm8, %v4190_v36, %v4189_v28 }
0x1107   : > { %v4193_v14 = vsel %vm1081_vm9, %v4192_v46, %v4191_v17 }
0x1108   : > { %v4195_v39 = vsel %vm1084_vm10, %v4194_v49, %v4193_v14 }
0x1109   : > { %v4197_v20 = vsel %vm1087_vm11, %v4196_v53, %v4195_v39 }
0x110a   : > { %4198 = vrot.lane.b32.xlu0 %v4197_v20, %s6176_s7 }
0x1178   : > { %v3859_v47 = vpop.permute.xlu1 %3858 }
0x1179   : > { %v3861_v29 = vsel %vm1193_vm14, inf, %v3859_v47 }
0x117a   : > { %v3863_v4 = vrot.slane %v3861_v29, 1  ;;  %v3864_v9 = vrot.slane %v3861_v29, 2  ;;  %v3865_v2 = vrot.slane %v3861_v29, 3  ;;  %v3866_v1 = vrot.slane %v3861_v29, 4 }
0x117b   : > { %v3867_v30 = vrot.slane %v3861_v29, 5  ;;  %v3868_v16 = vrot.slane %v3861_v29, 6  ;;  %v3869_v48 = vrot.slane %v3861_v29, 7  ;;  %v8682_v36 = vmin.f32 %v8600_v3, %v3861_v29 }
0x117c   : > { %v8670_v13 = vmin.f32 %v8588_v41, %v3863_v4  ;;  %v8673_v34 = vmin.f32 %v8591_v5, %v3864_v9  ;;  %v4199_v58 = vpop.permute.xlu0 %4198  ;;  %v8676_v62 = vmin.f32 %v8594_v51, %v3865_v2  ;;  %v8679_v44 = vmin.f32 %v8597_v24, %v3866_v1 }
0x117d   : > { %v4201_v26 = vsel %vm1193_vm14, 0.0, %v4199_v58  ;;  %v8686_v28 = vmin.f32 %v8604_v18, %v3867_v30  ;;  %v8689_v41 = vmin.f32 %v8607_v54, %v3868_v16  ;;  %v8692_v51 = vmin.f32 %v8610_v7, %v3869_v48 }
0x117e   : > { %v4203_v5 = vrot.slane %v4201_v26, 1  ;;  %v4204_v46 = vrot.slane %v4201_v26, 2  ;;  %v4205_v17 = vrot.slane %v4201_v26, 3  ;;  %v4206_v49 = vrot.slane %v4201_v26, 4 }
0x117f   : > { %v8695_v24 = vadd.f32 %v4201_v26, %v8613_v8  ;;  %v3894_v3 = vrot.slane %v8670_v13, 7  ;;  %v3896_v14 = vrot.slane %v8673_v34, 6  ;;  %v3898_v53 = vrot.slane %v8676_v62, 5 }
0x1180   : > { %v8700_v18 = vadd.f32 %v4203_v5, %v8618_v63  ;;  %v8703_v54 = vadd.f32 %v4204_v46, %v8621_v59  ;;  %v3900_v39 = vrot.slane %v8679_v44, 4  ;;  %v3902_v8 = vrot.slane %v8686_v28, 3 }
0x1181   : > { %v3895_v7 = vsel %vm1069_vm0, %v3894_v3, %v8682_v36  ;;  %v3904_v20 = vrot.slane %v8689_v41, 2  ;;  %v4207_v47 = vrot.slane %v4201_v26, 5  ;;  %v4208_v4 = vrot.slane %v4201_v26, 6 }
0x1182   : > { %v3897_v29 = vsel %vm1072_vm6, %v3896_v14, %v3895_v7  ;;  %v4209_v63 = vrot.slane %v4201_v26, 7  ;;  %v8713_v9 = vadd.f32 %v4205_v17, %v8631_v61  ;;  %v8717_v2 = vadd.f32 %v4206_v49, %v8635_v52 }
0x1183   : > { %v3899_v59 = vsel %vm1075_vm7, %v3898_v53, %v3897_v29  ;;  %v8720_v1 = vadd.f32 %v4207_v47, %v8638_v35  ;;  %v4234_v30 = vrot.slane %v8700_v18, 7  ;;  %v3906_v48 = vrot.slane %v8692_v51, 1 }
0x1184   : > { %v3901_v16 = vsel %vm1078_vm8, %v3900_v39, %v3899_v59  ;;  %v8726_v58 = vadd.f32 %v4208_v4, %v8644_v32  ;;  %v4236_v61 = vrot.slane %v8703_v54, 6  ;;  %v8731_v5 = vadd.f32 %v4209_v63, %v8649_v43 }
0x1185   : > { %v3903_v26 = vsel %vm1081_vm9, %v3902_v8, %v3901_v16  ;;  %v4235_v52 = vsel %vm1069_vm0, %v4234_v30, %v8695_v24  ;;  %v4238_v35 = vrot.slane %v8713_v9, 5  ;;  %v4240_v49 = vrot.slane %v8717_v2, 4 }
0x1186   : > { %v3905_v46 = vsel %vm1084_vm10, %v3904_v20, %v3903_v26  ;;  %v4237_v17 = vsel %vm1072_vm6, %v4236_v61, %v4235_v52  ;;  %v4242_v14 = vrot.slane %v8720_v1, 3  ;;  %v4244_v53 = vrot.slane %v8726_v58, 2 }
0x1187   : > { %v3907_v32 = vsel %vm1087_vm11, %v3906_v48, %v3905_v46  ;;  %v4239_v3 = vsel %vm1075_vm7, %v4238_v35, %v4237_v17  ;;  %v4246_v7 = vrot.slane %v8731_v5, 1 }
0x1188   : > { %3908 = vrot.lane.b32.xlu1 %v3907_v32, %s6177_s8  ;;  %v4241_v43 = vsel %vm1078_vm8, %v4240_v49, %v4239_v3 }
0x1189   : > { %v4243_v39 = vsel %vm1081_vm9, %v4242_v14, %v4241_v43 }
0x118a   : > { %v4245_v8 = vsel %vm1084_vm10, %v4244_v53, %v4243_v39 }
0x118b   : > { %v4247_v20 = vsel %vm1087_vm11, %v4246_v7, %v4245_v8 }
0x118c   : > { %4248 = vrot.lane.b32.xlu0 %v4247_v20, %s6177_s8 }
0x11fa   : > { %v3909_v47 = vpop.permute.xlu1 %3908 }
0x11fb   : > { %v3911_v29 = vsel %vm1244_vm15, inf, %v3909_v47 }
0x11fc   : > { %v3913_v4 = vrot.slane %v3911_v29, 1  ;;  %v3914_v63 = vrot.slane %v3911_v29, 2  ;;  %v3915_v59 = vrot.slane %v3911_v29, 3  ;;  %v3916_v30 = vrot.slane %v3911_v29, 4 }
0x11fd   : > { %v3917_v16 = vrot.slane %v3911_v29, 5  ;;  %v3918_v48 = vrot.slane %v3911_v29, 6  ;;  %v3919_v61 = vrot.slane %v3911_v29, 7  ;;  %v8764_v49 = vmin.f32 %v8682_v36, %v3911_v29 }
0x11fe   : > { %v8752_v26 = vmin.f32 %v8670_v13, %v3913_v4  ;;  %v8755_v52 = vmin.f32 %v8673_v34, %v3914_v63  ;;  %v4249_v35 = vpop.permute.xlu0 %4248  ;;  %v8758_v46 = vmin.f32 %v8676_v62, %v3915_v59  ;;  %v8761_v17 = vmin.f32 %v8679_v44, %v3916_v30 }
0x11ff   : > { %v4251_v32 = vsel %vm1244_vm15, 0.0, %v4249_v35  ;;  %v8768_v3 = vmin.f32 %v8686_v28, %v3917_v16  ;;  %v8771_v13 = vmin.f32 %v8689_v41, %v3918_v48  ;;  %v8774_v62 = vmin.f32 %v8692_v51, %v3919_v61 }
0x1200   : > { %v4253_v34 = vrot.slane %v4251_v32, 1  ;;  %v4254_v14 = vrot.slane %v4251_v32, 2  ;;  %v4255_v43 = vrot.slane %v4251_v32, 3  ;;  %v4256_v53 = vrot.slane %v4251_v32, 4 }
0x1201   : > { %v8777_v44 = vadd.f32 %v4251_v32, %v8695_v24  ;;  %v3944_v36 = vrot.slane %v8752_v26, 7  ;;  %v3946_v39 = vrot.slane %v8755_v52, 6  ;;  %v3948_v7 = vrot.slane %v8758_v46, 5 }
0x1202   : > { %v8782_v28 = vadd.f32 %v4253_v34, %v8700_v18  ;;  %v8785_v41 = vadd.f32 %v4254_v14, %v8703_v54  ;;  %v3950_v8 = vrot.slane %v8761_v17, 4  ;;  %v3952_v24 = vrot.slane %v8768_v3, 3 }
0x1203   : > { %v3945_v51 = vsel %vm1069_vm0, %v3944_v36, %v8764_v49  ;;  %v3954_v20 = vrot.slane %v8771_v13, 2  ;;  %v4257_v47 = vrot.slane %v4251_v32, 5  ;;  %v4258_v4 = vrot.slane %v4251_v32, 6 }
0x1204   : > { %v3947_v29 = vsel %vm1072_vm6, %v3946_v39, %v3945_v51  ;;  %v4259_v18 = vrot.slane %v4251_v32, 7  ;;  %v8795_v63 = vadd.f32 %v4255_v43, %v8713_v9  ;;  %v8799_v59 = vadd.f32 %v4256_v53, %v8717_v2 }
0x1205   : > { %v3949_v54 = vsel %vm1075_vm7, %v3948_v7, %v3947_v29  ;;  %v8802_v30 = vadd.f32 %v4257_v47, %v8720_v1  ;;  %v4284_v16 = vrot.slane %v8782_v28, 7  ;;  %v3956_v61 = vrot.slane %v8774_v62, 1 }
0x1206   : > { %v3951_v48 = vsel %vm1078_vm8, %v3950_v8, %v3949_v54  ;;  %v8808_v35 = vadd.f32 %v4258_v4, %v8726_v58  ;;  %v4286_v9 = vrot.slane %v8785_v41, 6  ;;  %v8813_v34 = vadd.f32 %v4259_v18, %v8731_v5 }
0x1207   : > { %v3953_v32 = vsel %vm1081_vm9, %v3952_v24, %v3951_v48  ;;  %v4285_v2 = vsel %vm1069_vm0, %v4284_v16, %v8777_v44  ;;  %v4288_v1 = vrot.slane %v8795_v63, 5  ;;  %v4290_v58 = vrot.slane %v8799_v59, 4 }
0x1208   : > { %v3955_v14 = vsel %vm1084_vm10, %v3954_v20, %v3953_v32  ;;  %v4287_v43 = vsel %vm1072_vm6, %v4286_v9, %v4285_v2  ;;  %v4292_v39 = vrot.slane %v8802_v30, 3  ;;  %v4294_v7 = vrot.slane %v8808_v35, 2 }
0x1209   : > { %v3957_v53 = vsel %vm1087_vm11, %v3956_v61, %v3955_v14  ;;  %v4289_v36 = vsel %vm1075_vm7, %v4288_v1, %v4287_v43  ;;  %v4296_v51 = vrot.slane %v8813_v34, 1 }
0x120a   : > { %3958 = vrot.lane.b32.xlu1 %v3957_v53, %s6178_s9  ;;  %v4291_v5 = vsel %vm1078_vm8, %v4290_v58, %v4289_v36  ;;  %v3996_v53 = vstv %s3995_s18 }
0x120b   : > { %v4293_v8 = vsel %vm1081_vm9, %v4292_v39, %v4291_v5  ;;  %vm3997_vm3 = vcmp.eq.s32.totalorder %v3996_v53, 1 }
0x120c   : > { %v4295_v24 = vsel %vm1084_vm10, %v4294_v7, %v4293_v8 }
0x120d   : > { %v4297_v20 = vsel %vm1087_vm11, %v4296_v51, %v4295_v24 }
0x120e   : > { %4298 = vrot.lane.b32.xlu0 %v4297_v20, %s6178_s9 }
0x127c   : > { %v3959_v47 = vpop.permute.xlu1 %3958 }
0x127d   : > { %v3961_v29 = vsel %vm1295_vm1, inf, %v3959_v47 }
0x127e   : > { %v3963_v4 = vrot.slane %v3961_v29, 1  ;;  %v3964_v18 = vrot.slane %v3961_v29, 2  ;;  %v3965_v54 = vrot.slane %v3961_v29, 3  ;;  %v3966_v16 = vrot.slane %v3961_v29, 4 }
0x127f   : > { %v3967_v48 = vrot.slane %v3961_v29, 5  ;;  %v3968_v61 = vrot.slane %v3961_v29, 6  ;;  %v3969_v9 = vrot.slane %v3961_v29, 7  ;;  %v3978_v43 = vmin.f32 %v8764_v49, %v3961_v29  ;;  %v8908_v29 = vld [vmem:[#allocation3 + $0xe] sm:$0x1] }
0x1280   : > { %v3979_v32 = vmin.f32 %v8752_v26, %v3963_v4  ;;  %v3980_v2 = vmin.f32 %v8755_v52, %v3964_v18  ;;  %v3981_v1 = vmin.f32 %v8758_v46, %v3965_v54  ;;  %v3982_v14 = vmin.f32 %v8761_v17, %v3966_v16  ;;  %v4299_v47 = vpop.permute.xlu0 %4298 }
0x1281   : > { %v3983_v58 = vmin.f32 %v8768_v3, %v3967_v48  ;;  %v3984_v5 = vmin.f32 %v8771_v13, %v3968_v61  ;;  %v3985_v26 = vmin.f32 %v8774_v62, %v3969_v9  ;;  %v3986_v46 = vadd.f32 %v3978_v43, %v8434_v25  ;;  %v8912_v48 = vld [vmem:[#allocation3 + $0x16] sm:$0x1] }
0x1282   : > { %v3987_v36 = vadd.f32 %v3979_v32, %v8437_v12  ;;  %v3988_v39 = vadd.f32 %v3980_v2, %v8440_v37  ;;  %v3989_v7 = vadd.f32 %v3981_v1, %v8443_v38  ;;  %v3990_v52 = vadd.f32 %v3982_v14, %v8464_v40  ;;  %v8914_v32 = vld [vmem:[#allocation3 + $0x6] sm:$0x1] }
0x1283   : > { %v3991_v17 = vadd.f32 %v3983_v58, %v8467_v50  ;;  %v3992_v49 = vadd.f32 %v3984_v5, %v8476_v42  ;;  %v3993_v38 = vadd.f32 %v3985_v26, %v8479_v10  ;;  %v4301_v4 = vsel %vm1295_vm1, 0.0, %v4299_v47 }
0x1284   : > { %v8858_v12 = vsel %vm3997_vm3, %v3987_v36, %v8372_v15  ;;  %v8862_v37 = vsel %vm3997_vm3, %v3988_v39, %v8376_v22  ;;  %v8867_v40 = vsel %vm3997_vm3, %v3989_v7, %v8381_v60  ;;  %v8871_v25 = vsel %vm3997_vm3, %v3990_v52, %v8385_v57 }
0x1285   : > { %v4026_v50 = vrot.slane %v8858_v12, 7  ;;  %v4028_v42 = vrot.slane %v8862_v37, 6  ;;  %v8877_v15 = vsel %vm3997_vm3, %v3986_v46, %v8391_v21  ;;  %v8881_v22 = vsel %vm3997_vm3, %v3991_v17, %v8395_v33 }
0x1286   : > { %v8885_v60 = vsel %vm3997_vm3, %v3992_v49, %v8399_v0  ;;  %v4030_v10 = vrot.slane %v8867_v40, 5  ;;  %v8892_v3 = vsel %vm3997_vm3, %v3993_v38, %v8406_v45  ;;  %v4032_v33 = vrot.slane %v8871_v25, 4 }
0x1287   : > { %v4027_v57 = vsel %vm1069_vm0, %v4026_v50, %v8877_v15  ;;  %v4034_v62 = vrot.slane %v8881_v22, 3  ;;  %v4036_v8 = vrot.slane %v8885_v60, 2  ;;  %v4038_v24 = vrot.slane %v8892_v3, 1 }
0x1288   : > { %v4029_v21 = vsel %vm1072_vm6, %v4028_v42, %v4027_v57  ;;  %v4682_v18 = vrot.slane %v8908_v29, 7  ;;  %v4303_v54 = vrot.slane %v4301_v4, 1  ;;  %v4304_v16 = vrot.slane %v4301_v4, 2 }
0x1289   : > { %v4031_v13 = vsel %vm1075_vm7, %v4030_v10, %v4029_v21  ;;  %v4305_v61 = vrot.slane %v4301_v4, 3  ;;  %v4017_v9 = vstv %s4016_s20  ;;  %v4306_v2 = vrot.slane %v4301_v4, 4 }
0x128a   : > { %v4033_v0 = vsel %vm1078_vm8, %v4032_v33, %v4031_v13  ;;  %v4683_v1 = vsel %vm1069_vm0, %v4682_v18, %v8914_v32  ;;  %v4684_v14 = vrot.slane %v8912_v48, 6  ;;  %v4307_v43 = vrot.slane %v4301_v4, 5  ;;  %v8959_v18 = vld [vmem:[#allocation3 + $0x26] sm:$0x1] }
0x128b   : > { %v4035_v51 = vsel %vm1081_vm9, %v4034_v62, %v4033_v0  ;;  %v8920_v58 = vadd.f32 %v4301_v4, %v8777_v44  ;;  %v8923_v53 = vadd.f32 %v4303_v54, %v8782_v28  ;;  %v8926_v36 = vadd.f32 %v4304_v16, %v8785_v41 }
0x128c   : > { %v4037_v20 = vsel %vm1084_vm10, %v4036_v8, %v4035_v51  ;;  %v8929_v5 = vadd.f32 %v4305_v61, %v8795_v63  ;;  %v4308_v26 = vrot.slane %v4301_v4, 6  ;;  %v4309_v52 = vrot.slane %v4301_v4, 7 }
0x128d   : > { %v4039_v45 = vsel %vm1087_vm11, %v4038_v24, %v4037_v20  ;;  %v8945_v20 = vld [vmem:[#allocation3 + $0x1e] sm:$0x1]  ;;  %v8950_v47 = vadd.f32 %v4306_v2, %v8799_v59  ;;  %v8953_v4 = vadd.f32 %v4307_v43, %v8802_v30  ;;  %v8972_v2 = vld [vmem:[#allocation3 + $0x2e] sm:$0x1]  ;;  %v4688_v43 = vrot.slane %v8959_v18, 4 }
0x128e   : > { %4040 = vrot.lane.b32.xlu1 %v4039_v45, %s6174_s27  ;;  %v4686_v30 = vrot.slane %v8945_v20, 5 }
0x1300   : > { %v4041_v39 = vpop.permute.xlu1 %4040 }
0x1301   : > { %v4043_v7 = vsel %vm1033_vm12, %v4017_v9, %v4041_v39 }
0x1302   : > { %v4045_v46 = vrot.slane %v4043_v7, 1  ;;  %v4046_v17 = vrot.slane %v4043_v7, 2  ;;  %v4047_v49 = vrot.slane %v4043_v7, 3  ;;  %v4048_v38 = vrot.slane %v4043_v7, 4 }
0x1303   : > { %v4049_v44 = vrot.slane %v4043_v7, 5  ;;  %v4060_v50 = vmin.f32 %v8877_v15, %v4043_v7  ;;  %v4050_v28 = vrot.slane %v4043_v7, 6  ;;  %v4051_v42 = vrot.slane %v4043_v7, 7 }
0x1304   : > { %v4061_v41 = vmin.f32 %v8858_v12, %v4045_v46  ;;  %v4062_v57 = vmin.f32 %v8862_v37, %v4046_v17  ;;  %v4063_v63 = vmin.f32 %v8867_v40, %v4047_v49  ;;  %v4064_v10 = vmin.f32 %v8871_v25, %v4048_v38 }
0x1305   : > { %v4068_v21 = vadd.f32 %v4060_v50, %v8428_v6  ;;  %v4065_v33 = vmin.f32 %v8881_v22, %v4049_v44  ;;  %v4066_v13 = vmin.f32 %v8885_v60, %v4050_v28  ;;  %v4067_v62 = vmin.f32 %v8892_v3, %v4051_v42  ;;  %v8985_v50 = vld [vmem:[#allocation3 + $0x3e] sm:$0x1] }
0x1306   : > { %v4069_v0 = vadd.f32 %v4061_v41, %v8422_v27  ;;  %v4070_v8 = vadd.f32 %v4062_v57, %v8426_v55  ;;  %v4071_v51 = vadd.f32 %v4063_v63, %v8459_v23  ;;  %v4072_v24 = vadd.f32 %v4064_v10, %v8473_v19 }
0x1307   : > { %v4073_v45 = vadd.f32 %v4065_v33, %v8486_v31  ;;  %v4074_v6 = vadd.f32 %v4066_v13, %v8492_v56  ;;  %v4075_v27 = vadd.f32 %v4067_v62, %v8499_v11  ;;  %v8962_v31 = vadd.f32 %v4308_v26, %v8808_v35  ;;  %v8978_v26 = vld [vmem:[#allocation3 + $0x36] sm:$0x1] }
0x1308   : > { %v4327_v55 = vsub.f32 %v4069_v0, %v8923_v53  ;;  %v4328_v23 = vsub.f32 %v4070_v8, %v8926_v36  ;;  %v4329_v19 = vsub.f32 %v4071_v51, %v8929_v5  ;;  %v8965_v56 = vadd.f32 %v4309_v52, %v8813_v34 }
0x1309   : > { %v4330_v59 = vsub.f32 %v4072_v24, %v8950_v47  ;;  %v4326_v11 = vsub.f32 %v4068_v21, %v8920_v58  ;;  %v4331_v54 = vsub.f32 %v4073_v45, %v8953_v4  ;;  %v4332_v9 = vsub.f32 %v4074_v6, %v8962_v31 }
0x130a   : > { %v4342_v16 = vrot.slane %v4327_v55, 7  ;;  %v4344_v61 = vrot.slane %v4328_v23, 6  ;;  %v4685_v35 = vsel %vm1072_vm6, %v4684_v14, %v4683_v1  ;;  %v4333_v34 = vsub.f32 %v4075_v27, %v8965_v56 }
0x130b   : > { %v4346_v7 = vrot.slane %v4329_v19, 5  ;;  %v4348_v46 = vrot.slane %v4330_v59, 4  ;;  %v4350_v49 = vrot.slane %v4331_v54, 3  ;;  %v4687_v38 = vsel %vm1075_vm7, %v4686_v30, %v4685_v35 }
0x130c   : > { %v4343_v39 = vsel %vm1069_vm0, %v4342_v16, %v4326_v11  ;;  %v4690_v44 = vrot.slane %v8972_v2, 3  ;;  %v4352_v14 = vrot.slane %v4332_v9, 2  ;;  %v4689_v28 = vsel %vm1078_vm8, %v4688_v43, %v4687_v38 }
0x130d   : > { %v4345_v52 = vsel %vm1072_vm6, %v4344_v61, %v4343_v39  ;;  %v4692_v42 = vrot.slane %v8978_v26, 2  ;;  %v4354_v57 = vrot.slane %v4333_v34, 1  ;;  %v4694_v33 = vrot.slane %v8985_v50, 1 }
0x130e   : > { %v4347_v17 = vsel %vm1075_vm7, %v4346_v7, %v4345_v52  ;;  %v4691_v21 = vsel %vm1081_vm9, %v4690_v44, %v4689_v28 }
0x130f   : > { %v4349_v1 = vsel %vm1078_vm8, %v4348_v46, %v4347_v17  ;;  %v4693_v13 = vsel %vm1084_vm10, %v4692_v42, %v4691_v21 }
0x1310   : > { %v4351_v41 = vsel %vm1081_vm9, %v4350_v49, %v4349_v1  ;;  %v4695_v62 = vsel %vm1087_vm11, %v4694_v33, %v4693_v13 }
0x1311   : > { %v4353_v63 = vsel %vm1084_vm10, %v4352_v14, %v4351_v41 }
0x1312   : > { %v4355_v10 = vsel %vm1087_vm11, %v4354_v57, %v4353_v63 }
0x1313   : > { %4356 = vrot.lane.b32.xlu1 %v4355_v10, %s6174_s27 }
0x1317   : > { %4696 = vrot.lane.b32.xlu1 %v4695_v62, %s6174_s27 }
0x1385   : > { %v4357_v0 = vpop.permute.xlu1 %4356 }
0x1386   : > { %v4359_v8 = vsel %vm1033_vm12, inf, %v4357_v0 }
0x1387   : > { %v4361_v51 = vrot.slane %v4359_v8, 1  ;;  %v4362_v24 = vrot.slane %v4359_v8, 2  ;;  %v4363_v45 = vrot.slane %v4359_v8, 3  ;;  %v4364_v6 = vrot.slane %v4359_v8, 4 }
0x1388   : > { %v4365_v27 = vrot.slane %v4359_v8, 5  ;;  %v4366_v30 = vrot.slane %v4359_v8, 6  ;;  %v4367_v16 = vrot.slane %v4359_v8, 7  ;;  %v9007_v52 = vmin.f32 %v4326_v11, %v4359_v8 }
0x1389   : > { %v8999_v61 = vmin.f32 %v4327_v55, %v4361_v51  ;;  %v9001_v35 = vmin.f32 %v4328_v23, %v4362_v24  ;;  %v4697_v43 = vpop.permute.xlu1 %4696  ;;  %v9003_v39 = vmin.f32 %v4329_v19, %v4363_v45  ;;  %v9005_v7 = vmin.f32 %v4330_v59, %v4364_v6 }
0x138a   : > { %v4699_v46 = vsel %vm1033_vm12, 0.0, %v4697_v43  ;;  %v9010_v17 = vmin.f32 %v4331_v54, %v4365_v27  ;;  %v9012_v49 = vmin.f32 %v4332_v9, %v4366_v30  ;;  %v9014_v55 = vmin.f32 %v4333_v34, %v4367_v16 }
0x138b   : > { %v4701_v38 = vrot.slane %v4699_v46, 1  ;;  %v4702_v44 = vrot.slane %v4699_v46, 2  ;;  %v4703_v1 = vrot.slane %v4699_v46, 3  ;;  %v4704_v23 = vrot.slane %v4699_v46, 4 }
0x138c   : > { %v9017_v14 = vadd.f32 %v4699_v46, %v8914_v32  ;;  %v4392_v19 = vrot.slane %v8999_v61, 7  ;;  %v4394_v59 = vrot.slane %v9001_v35, 6  ;;  %v4396_v9 = vrot.slane %v9003_v39, 5 }
0x138d   : > { %v9022_v11 = vadd.f32 %v4701_v38, %v8908_v29  ;;  %v9025_v54 = vadd.f32 %v4702_v44, %v8912_v48  ;;  %v4398_v28 = vrot.slane %v9005_v7, 4  ;;  %v4400_v42 = vrot.slane %v9010_v17, 3 }
0x138e   : > { %v4393_v34 = vsel %vm1069_vm0, %v4392_v19, %v9007_v52  ;;  %v4402_v41 = vrot.slane %v9012_v49, 2  ;;  %v4705_v57 = vrot.slane %v4699_v46, 5  ;;  %v4706_v10 = vrot.slane %v4699_v46, 6 }
0x138f   : > { %v4395_v63 = vsel %vm1072_vm6, %v4394_v59, %v4393_v34  ;;  %v4707_v21 = vrot.slane %v4699_v46, 7  ;;  %v9035_v33 = vadd.f32 %v4703_v1, %v8945_v20  ;;  %v9039_v62 = vadd.f32 %v4704_v23, %v8959_v18 }
0x1390   : > { %v4397_v13 = vsel %vm1075_vm7, %v4396_v9, %v4395_v63  ;;  %v9042_v0 = vadd.f32 %v4705_v57, %v8972_v2  ;;  %v4732_v8 = vrot.slane %v9022_v11, 7  ;;  %v4404_v24 = vrot.slane %v9014_v55, 1 }
0x1391   : > { %v4399_v51 = vsel %vm1078_vm8, %v4398_v28, %v4397_v13  ;;  %v9048_v45 = vadd.f32 %v4706_v10, %v8978_v26  ;;  %v4734_v6 = vrot.slane %v9025_v54, 6  ;;  %v9053_v30 = vadd.f32 %v4707_v21, %v8985_v50 }
0x1392   : > { %v4401_v27 = vsel %vm1081_vm9, %v4400_v42, %v4399_v51  ;;  %v4733_v16 = vsel %vm1069_vm0, %v4732_v8, %v9017_v14  ;;  %v4736_v43 = vrot.slane %v9035_v33, 5  ;;  %v4738_v44 = vrot.slane %v9039_v62, 4 }
0x1393   : > { %v4403_v46 = vsel %vm1084_vm10, %v4402_v41, %v4401_v27  ;;  %v4735_v38 = vsel %vm1072_vm6, %v4734_v6, %v4733_v16  ;;  %v4740_v19 = vrot.slane %v9042_v0, 3  ;;  %v4742_v9 = vrot.slane %v9048_v45, 2 }
0x1394   : > { %v4405_v1 = vsel %vm1087_vm11, %v4404_v24, %v4403_v46  ;;  %v4737_v23 = vsel %vm1075_vm7, %v4736_v43, %v4735_v38  ;;  %v4744_v34 = vrot.slane %v9053_v30, 1 }
0x1395   : > { %4406 = vrot.lane.b32.xlu0 %v4405_v1, %s6175_s6  ;;  %v4739_v59 = vsel %vm1078_vm8, %v4738_v44, %v4737_v23 }
0x1396   : > { %v4741_v28 = vsel %vm1081_vm9, %v4740_v19, %v4739_v59 }
0x1397   : > { %v4743_v42 = vsel %vm1084_vm10, %v4742_v9, %v4741_v28 }
0x1398   : > { %v4745_v41 = vsel %vm1087_vm11, %v4744_v34, %v4743_v42 }
0x1399   : > { %4746 = vrot.lane.b32.xlu1 %v4745_v41, %s6175_s6 }
0x1407   : > { %v4407_v57 = vpop.permute.xlu0 %4406 }
0x1408   : > { %v4409_v63 = vsel %vm1142_vm13, inf, %v4407_v57 }
0x1409   : > { %v4411_v10 = vrot.slane %v4409_v63, 1  ;;  %v4412_v21 = vrot.slane %v4409_v63, 2  ;;  %v4413_v13 = vrot.slane %v4409_v63, 3  ;;  %v4414_v8 = vrot.slane %v4409_v63, 4 }
0x140a   : > { %v4415_v51 = vrot.slane %v4409_v63, 5  ;;  %v4416_v24 = vrot.slane %v4409_v63, 6  ;;  %v4417_v6 = vrot.slane %v4409_v63, 7  ;;  %v9086_v44 = vmin.f32 %v9007_v52, %v4409_v63 }
0x140b   : > { %v9074_v27 = vmin.f32 %v8999_v61, %v4411_v10  ;;  %v9077_v16 = vmin.f32 %v9001_v35, %v4412_v21  ;;  %v4747_v43 = vpop.permute.xlu1 %4746  ;;  %v9080_v46 = vmin.f32 %v9003_v39, %v4413_v13  ;;  %v9083_v38 = vmin.f32 %v9005_v7, %v4414_v8 }
0x140c   : > { %v4749_v1 = vsel %vm1142_vm13, 0.0, %v4747_v43  ;;  %v9090_v23 = vmin.f32 %v9010_v17, %v4415_v51  ;;  %v9093_v61 = vmin.f32 %v9012_v49, %v4416_v24  ;;  %v9096_v39 = vmin.f32 %v9014_v55, %v4417_v6 }
0x140d   : > { %v4751_v35 = vrot.slane %v4749_v1, 1  ;;  %v4752_v19 = vrot.slane %v4749_v1, 2  ;;  %v4753_v59 = vrot.slane %v4749_v1, 3  ;;  %v4754_v9 = vrot.slane %v4749_v1, 4 }
0x140e   : > { %v9099_v7 = vadd.f32 %v4749_v1, %v9017_v14  ;;  %v4442_v52 = vrot.slane %v9074_v27, 7  ;;  %v4444_v28 = vrot.slane %v9077_v16, 6  ;;  %v4446_v34 = vrot.slane %v9080_v46, 5 }
0x140f   : > { %v9104_v17 = vadd.f32 %v4751_v35, %v9022_v11  ;;  %v9107_v49 = vadd.f32 %v4752_v19, %v9025_v54  ;;  %v4448_v42 = vrot.slane %v9083_v38, 4  ;;  %v4450_v14 = vrot.slane %v9090_v23, 3 }
0x1410   : > { %v4443_v55 = vsel %vm1069_vm0, %v4442_v52, %v9086_v44  ;;  %v4452_v41 = vrot.slane %v9093_v61, 2  ;;  %v4755_v57 = vrot.slane %v4749_v1, 5  ;;  %v4756_v10 = vrot.slane %v4749_v1, 6 }
0x1411   : > { %v4445_v63 = vsel %vm1072_vm6, %v4444_v28, %v4443_v55  ;;  %v4757_v11 = vrot.slane %v4749_v1, 7  ;;  %v9117_v21 = vadd.f32 %v4753_v59, %v9035_v33  ;;  %v9121_v13 = vadd.f32 %v4754_v9, %v9039_v62 }
0x1412   : > { %v4447_v54 = vsel %vm1075_vm7, %v4446_v34, %v4445_v63  ;;  %v9124_v8 = vadd.f32 %v4755_v57, %v9042_v0  ;;  %v4782_v51 = vrot.slane %v9104_v17, 7  ;;  %v4454_v6 = vrot.slane %v9096_v39, 1 }
0x1413   : > { %v4449_v24 = vsel %vm1078_vm8, %v4448_v42, %v4447_v54  ;;  %v9130_v43 = vadd.f32 %v4756_v10, %v9048_v45  ;;  %v4784_v33 = vrot.slane %v9107_v49, 6  ;;  %v9135_v35 = vadd.f32 %v4757_v11, %v9053_v30 }
0x1414   : > { %v4451_v1 = vsel %vm1081_vm9, %v4450_v14, %v4449_v24  ;;  %v4783_v62 = vsel %vm1069_vm0, %v4782_v51, %v9099_v7  ;;  %v4786_v0 = vrot.slane %v9117_v21, 5  ;;  %v4788_v9 = vrot.slane %v9121_v13, 4 }
0x1415   : > { %v4453_v19 = vsel %vm1084_vm10, %v4452_v41, %v4451_v1  ;;  %v4785_v59 = vsel %vm1072_vm6, %v4784_v33, %v4783_v62  ;;  %v4790_v28 = vrot.slane %v9124_v8, 3  ;;  %v4792_v34 = vrot.slane %v9130_v43, 2 }
0x1416   : > { %v4455_v45 = vsel %vm1087_vm11, %v4454_v6, %v4453_v19  ;;  %v4787_v52 = vsel %vm1075_vm7, %v4786_v0, %v4785_v59  ;;  %v4794_v55 = vrot.slane %v9135_v35, 1 }
0x1417   : > { %4456 = vrot.lane.b32.xlu0 %v4455_v45, %s6176_s7  ;;  %v4789_v30 = vsel %vm1078_vm8, %v4788_v9, %v4787_v52 }
0x1418   : > { %v4791_v42 = vsel %vm1081_vm9, %v4790_v28, %v4789_v30 }
0x1419   : > { %v4793_v14 = vsel %vm1084_vm10, %v4792_v34, %v4791_v42 }
0x141a   : > { %v4795_v41 = vsel %vm1087_vm11, %v4794_v55, %v4793_v14 }
0x141b   : > { %4796 = vrot.lane.b32.xlu1 %v4795_v41, %s6176_s7 }
0x1489   : > { %v4457_v57 = vpop.permute.xlu0 %4456 }
0x148a   : > { %v4459_v63 = vsel %vm1193_vm14, inf, %v4457_v57 }
0x148b   : > { %v4461_v10 = vrot.slane %v4459_v63, 1  ;;  %v4462_v11 = vrot.slane %v4459_v63, 2  ;;  %v4463_v54 = vrot.slane %v4459_v63, 3  ;;  %v4464_v51 = vrot.slane %v4459_v63, 4 }
0x148c   : > { %v4465_v24 = vrot.slane %v4459_v63, 5  ;;  %v4466_v6 = vrot.slane %v4459_v63, 6  ;;  %v4467_v33 = vrot.slane %v4459_v63, 7  ;;  %v9168_v9 = vmin.f32 %v9086_v44, %v4459_v63 }
0x148d   : > { %v9156_v1 = vmin.f32 %v9074_v27, %v4461_v10  ;;  %v9159_v62 = vmin.f32 %v9077_v16, %v4462_v11  ;;  %v4797_v0 = vpop.permute.xlu1 %4796  ;;  %v9162_v19 = vmin.f32 %v9080_v46, %v4463_v54  ;;  %v9165_v59 = vmin.f32 %v9083_v38, %v4464_v51 }
0x148e   : > { %v4799_v45 = vsel %vm1193_vm14, 0.0, %v4797_v0  ;;  %v9172_v52 = vmin.f32 %v9090_v23, %v4465_v24  ;;  %v9175_v27 = vmin.f32 %v9093_v61, %v4466_v6  ;;  %v9178_v46 = vmin.f32 %v9096_v39, %v4467_v33 }
0x148f   : > { %v4801_v16 = vrot.slane %v4799_v45, 1  ;;  %v4802_v28 = vrot.slane %v4799_v45, 2  ;;  %v4803_v30 = vrot.slane %v4799_v45, 3  ;;  %v4804_v34 = vrot.slane %v4799_v45, 4 }
0x1490   : > { %v9181_v38 = vadd.f32 %v4799_v45, %v9099_v7  ;;  %v4492_v44 = vrot.slane %v9156_v1, 7  ;;  %v4494_v42 = vrot.slane %v9159_v62, 6  ;;  %v4496_v55 = vrot.slane %v9162_v19, 5 }
0x1491   : > { %v9186_v23 = vadd.f32 %v4801_v16, %v9104_v17  ;;  %v9189_v61 = vadd.f32 %v4802_v28, %v9107_v49  ;;  %v4498_v14 = vrot.slane %v9165_v59, 4  ;;  %v4500_v7 = vrot.slane %v9172_v52, 3 }
0x1492   : > { %v4493_v39 = vsel %vm1069_vm0, %v4492_v44, %v9168_v9  ;;  %v4502_v41 = vrot.slane %v9175_v27, 2  ;;  %v4805_v57 = vrot.slane %v4799_v45, 5  ;;  %v4806_v10 = vrot.slane %v4799_v45, 6 }
0x1493   : > { %v4495_v63 = vsel %vm1072_vm6, %v4494_v42, %v4493_v39  ;;  %v4807_v17 = vrot.slane %v4799_v45, 7  ;;  %v9199_v11 = vadd.f32 %v4803_v30, %v9117_v21  ;;  %v9203_v54 = vadd.f32 %v4804_v34, %v9121_v13 }
0x1494   : > { %v4497_v49 = vsel %vm1075_vm7, %v4496_v55, %v4495_v63  ;;  %v9206_v51 = vadd.f32 %v4805_v57, %v9124_v8  ;;  %v4832_v24 = vrot.slane %v9186_v23, 7  ;;  %v4504_v33 = vrot.slane %v9178_v46, 1 }
0x1495   : > { %v4499_v6 = vsel %vm1078_vm8, %v4498_v14, %v4497_v49  ;;  %v9212_v0 = vadd.f32 %v4806_v10, %v9130_v43  ;;  %v4834_v21 = vrot.slane %v9189_v61, 6  ;;  %v9217_v16 = vadd.f32 %v4807_v17, %v9135_v35 }
0x1496   : > { %v4501_v45 = vsel %vm1081_vm9, %v4500_v7, %v4499_v6  ;;  %v4833_v13 = vsel %vm1069_vm0, %v4832_v24, %v9181_v38  ;;  %v4836_v8 = vrot.slane %v9199_v11, 5  ;;  %v4838_v34 = vrot.slane %v9203_v54, 4 }
0x1497   : > { %v4503_v28 = vsel %vm1084_vm10, %v4502_v41, %v4501_v45  ;;  %v4835_v30 = vsel %vm1072_vm6, %v4834_v21, %v4833_v13  ;;  %v4840_v42 = vrot.slane %v9206_v51, 3  ;;  %v4842_v55 = vrot.slane %v9212_v0, 2 }
0x1498   : > { %v4505_v43 = vsel %vm1087_vm11, %v4504_v33, %v4503_v28  ;;  %v4837_v44 = vsel %vm1075_vm7, %v4836_v8, %v4835_v30  ;;  %v4844_v39 = vrot.slane %v9217_v16, 1 }
0x1499   : > { %4506 = vrot.lane.b32.xlu0 %v4505_v43, %s6177_s8  ;;  %v4839_v35 = vsel %vm1078_vm8, %v4838_v34, %v4837_v44 }
0x149a   : > { %v4841_v14 = vsel %vm1081_vm9, %v4840_v42, %v4839_v35 }
0x149b   : > { %v4843_v7 = vsel %vm1084_vm10, %v4842_v55, %v4841_v14 }
0x149c   : > { %v4845_v41 = vsel %vm1087_vm11, %v4844_v39, %v4843_v7 }
0x149d   : > { %4846 = vrot.lane.b32.xlu1 %v4845_v41, %s6177_s8 }
0x150b   : > { %v4507_v57 = vpop.permute.xlu0 %4506 }
0x150c   : > { %v4509_v63 = vsel %vm1244_vm15, inf, %v4507_v57 }
0x150d   : > { %v4511_v10 = vrot.slane %v4509_v63, 1  ;;  %v4512_v17 = vrot.slane %v4509_v63, 2  ;;  %v4513_v49 = vrot.slane %v4509_v63, 3  ;;  %v4514_v24 = vrot.slane %v4509_v63, 4 }
0x150e   : > { %v4515_v6 = vrot.slane %v4509_v63, 5  ;;  %v4516_v33 = vrot.slane %v4509_v63, 6  ;;  %v4517_v21 = vrot.slane %v4509_v63, 7  ;;  %v9250_v34 = vmin.f32 %v9168_v9, %v4509_v63 }
0x150f   : > { %v9238_v45 = vmin.f32 %v9156_v1, %v4511_v10  ;;  %v9241_v13 = vmin.f32 %v9159_v62, %v4512_v17  ;;  %v4847_v8 = vpop.permute.xlu1 %4846  ;;  %v9244_v28 = vmin.f32 %v9162_v19, %v4513_v49  ;;  %v9247_v30 = vmin.f32 %v9165_v59, %v4514_v24 }
0x1510   : > { %v4849_v43 = vsel %vm1244_vm15, 0.0, %v4847_v8  ;;  %v9254_v44 = vmin.f32 %v9172_v52, %v4515_v6  ;;  %v9257_v1 = vmin.f32 %v9175_v27, %v4516_v33  ;;  %v9260_v19 = vmin.f32 %v9178_v46, %v4517_v21 }
0x1511   : > { %v4851_v62 = vrot.slane %v4849_v43, 1  ;;  %v4852_v42 = vrot.slane %v4849_v43, 2  ;;  %v4853_v35 = vrot.slane %v4849_v43, 3  ;;  %v4854_v55 = vrot.slane %v4849_v43, 4 }
0x1512   : > { %v9263_v59 = vadd.f32 %v4849_v43, %v9181_v38  ;;  %v4542_v9 = vrot.slane %v9238_v45, 7  ;;  %v4544_v14 = vrot.slane %v9241_v13, 6  ;;  %v4546_v39 = vrot.slane %v9244_v28, 5 }
0x1513   : > { %v9268_v52 = vadd.f32 %v4851_v62, %v9186_v23  ;;  %v9271_v27 = vadd.f32 %v4852_v42, %v9189_v61  ;;  %v4548_v7 = vrot.slane %v9247_v30, 4  ;;  %v4550_v38 = vrot.slane %v9254_v44, 3 }
0x1514   : > { %v4543_v46 = vsel %vm1069_vm0, %v4542_v9, %v9250_v34  ;;  %v4552_v41 = vrot.slane %v9257_v1, 2  ;;  %v4855_v57 = vrot.slane %v4849_v43, 5  ;;  %v4856_v10 = vrot.slane %v4849_v43, 6 }
0x1515   : > { %v4545_v63 = vsel %vm1072_vm6, %v4544_v14, %v4543_v46  ;;  %v4857_v23 = vrot.slane %v4849_v43, 7  ;;  %v9281_v17 = vadd.f32 %v4853_v35, %v9199_v11  ;;  %v9285_v49 = vadd.f32 %v4854_v55, %v9203_v54 }
0x1516   : > { %v4547_v61 = vsel %vm1075_vm7, %v4546_v39, %v4545_v63  ;;  %v9288_v24 = vadd.f32 %v4855_v57, %v9206_v51  ;;  %v4882_v6 = vrot.slane %v9268_v52, 7  ;;  %v4554_v21 = vrot.slane %v9260_v19, 1 }
0x1517   : > { %v4549_v33 = vsel %vm1078_vm8, %v4548_v7, %v4547_v61  ;;  %v9294_v8 = vadd.f32 %v4856_v10, %v9212_v0  ;;  %v4884_v11 = vrot.slane %v9271_v27, 6  ;;  %v9299_v62 = vadd.f32 %v4857_v23, %v9217_v16 }
0x1518   : > { %v4551_v43 = vsel %vm1081_vm9, %v4550_v38, %v4549_v33  ;;  %v4883_v54 = vsel %vm1069_vm0, %v4882_v6, %v9263_v59  ;;  %v4886_v51 = vrot.slane %v9281_v17, 5  ;;  %v4888_v0 = vrot.slane %v9285_v49, 4 }
0x1519   : > { %v4553_v42 = vsel %vm1084_vm10, %v4552_v41, %v4551_v43  ;;  %v4885_v35 = vsel %vm1072_vm6, %v4884_v11, %v4883_v54  ;;  %v4890_v14 = vrot.slane %v9288_v24, 3  ;;  %v4892_v39 = vrot.slane %v9294_v8, 2 }
0x151a   : > { %v4555_v55 = vsel %vm1087_vm11, %v4554_v21, %v4553_v42  ;;  %v4887_v9 = vsel %vm1075_vm7, %v4886_v51, %v4885_v35  ;;  %v4894_v46 = vrot.slane %v9299_v62, 1 }
0x151b   : > { %4556 = vrot.lane.b32.xlu0 %v4555_v55, %s6178_s9  ;;  %v4889_v16 = vsel %vm1078_vm8, %v4888_v0, %v4887_v9  ;;  %v4594_v55 = vstv %s4593_s22 }
0x151c   : > { %v4891_v7 = vsel %vm1081_vm9, %v4890_v14, %v4889_v16  ;;  %vm4595_vm5 = vcmp.eq.s32.totalorder %v4594_v55, 1 }
0x151d   : > { %v4893_v38 = vsel %vm1084_vm10, %v4892_v39, %v4891_v7 }
0x151e   : > { %v4895_v41 = vsel %vm1087_vm11, %v4894_v46, %v4893_v38 }
0x151f   : > { %4896 = vrot.lane.b32.xlu1 %v4895_v41, %s6178_s9 }
0x158d   : > { %v4557_v57 = vpop.permute.xlu0 %4556 }
0x158e   : > { %v4559_v63 = vsel %vm1295_vm1, inf, %v4557_v57 }
0x158f   : > { %v4561_v10 = vrot.slane %v4559_v63, 1  ;;  %v4562_v23 = vrot.slane %v4559_v63, 2  ;;  %v4563_v61 = vrot.slane %v4559_v63, 3  ;;  %v4564_v6 = vrot.slane %v4559_v63, 4 }
0x1590   : > { %v4565_v33 = vrot.slane %v4559_v63, 5  ;;  %v4566_v21 = vrot.slane %v4559_v63, 6  ;;  %v4567_v11 = vrot.slane %v4559_v63, 7  ;;  %v4576_v35 = vmin.f32 %v9250_v34, %v4559_v63  ;;  %v9394_v63 = vld [vmem:[#allocation3 + $0xf] sm:$0x1] }
0x1591   : > { %v4577_v43 = vmin.f32 %v9238_v45, %v4561_v10  ;;  %v4578_v54 = vmin.f32 %v9241_v13, %v4562_v23  ;;  %v4579_v51 = vmin.f32 %v9244_v28, %v4563_v61  ;;  %v4580_v42 = vmin.f32 %v9247_v30, %v4564_v6  ;;  %v4897_v57 = vpop.permute.xlu1 %4896 }
0x1592   : > { %v4581_v0 = vmin.f32 %v9254_v44, %v4565_v33  ;;  %v4582_v16 = vmin.f32 %v9257_v1, %v4566_v21  ;;  %v4583_v45 = vmin.f32 %v9260_v19, %v4567_v11  ;;  %v4584_v28 = vadd.f32 %v4576_v35, %v8920_v58  ;;  %v9398_v33 = vld [vmem:[#allocation3 + $0x17] sm:$0x1] }
0x1593   : > { %v4585_v9 = vadd.f32 %v4577_v43, %v8923_v53  ;;  %v4586_v14 = vadd.f32 %v4578_v54, %v8926_v36  ;;  %v4587_v39 = vadd.f32 %v4579_v51, %v8929_v5  ;;  %v4588_v13 = vadd.f32 %v4580_v42, %v8950_v47  ;;  %v9400_v43 = vld [vmem:[#allocation3 + $0x7] sm:$0x1] }
0x1594   : > { %v4589_v30 = vadd.f32 %v4581_v0, %v8953_v4  ;;  %v4590_v34 = vadd.f32 %v4582_v16, %v8962_v31  ;;  %v4591_v5 = vadd.f32 %v4583_v45, %v8965_v56  ;;  %v4899_v10 = vsel %vm1295_vm1, 0.0, %v4897_v57 }
0x1595   : > { %v9344_v53 = vsel %vm4595_vm5, %v4585_v9, %v8858_v12  ;;  %v9348_v36 = vsel %vm4595_vm5, %v4586_v14, %v8862_v37  ;;  %v9353_v47 = vsel %vm4595_vm5, %v4587_v39, %v8867_v40  ;;  %v9357_v58 = vsel %vm4595_vm5, %v4588_v13, %v8871_v25 }
0x1596   : > { %v4624_v4 = vrot.slane %v9344_v53, 7  ;;  %v4626_v31 = vrot.slane %v9348_v36, 6  ;;  %v9363_v12 = vsel %vm4595_vm5, %v4584_v28, %v8877_v15  ;;  %v9367_v37 = vsel %vm4595_vm5, %v4589_v30, %v8881_v22 }
0x1597   : > { %v9371_v40 = vsel %vm4595_vm5, %v4590_v34, %v8885_v60  ;;  %v4628_v56 = vrot.slane %v9353_v47, 5  ;;  %v9378_v44 = vsel %vm4595_vm5, %v4591_v5, %v8892_v3  ;;  %v4630_v22 = vrot.slane %v9357_v58, 4 }
0x1598   : > { %v4625_v25 = vsel %vm1069_vm0, %v4624_v4, %v9363_v12  ;;  %v4632_v19 = vrot.slane %v9367_v37, 3  ;;  %v4634_v7 = vrot.slane %v9371_v40, 2  ;;  %v4636_v38 = vrot.slane %v9378_v44, 1 }
0x1599   : > { %v4627_v15 = vsel %vm1072_vm6, %v4626_v31, %v4625_v25  ;;  %v5280_v23 = vrot.slane %v9394_v63, 7  ;;  %v4901_v61 = vrot.slane %v4899_v10, 1  ;;  %v4902_v6 = vrot.slane %v4899_v10, 2 }
0x159a   : > { %v4629_v1 = vsel %vm1075_vm7, %v4628_v56, %v4627_v15  ;;  %v4903_v21 = vrot.slane %v4899_v10, 3  ;;  %v4615_v11 = vstv %s4614_s24  ;;  %v4904_v54 = vrot.slane %v4899_v10, 4 }
0x159b   : > { %v4631_v60 = vsel %vm1078_vm8, %v4630_v22, %v4629_v1  ;;  %v5281_v51 = vsel %vm1069_vm0, %v5280_v23, %v9400_v43  ;;  %v5282_v42 = vrot.slane %v9398_v33, 6  ;;  %v4905_v35 = vrot.slane %v4899_v10, 5  ;;  %v9445_v23 = vld [vmem:[#allocation3 + $0x27] sm:$0x1] }
0x159c   : > { %v4633_v46 = vsel %vm1081_vm9, %v4632_v19, %v4631_v60  ;;  %v9406_v0 = vadd.f32 %v4899_v10, %v9263_v59  ;;  %v9409_v55 = vadd.f32 %v4901_v61, %v9268_v52  ;;  %v9412_v9 = vadd.f32 %v4902_v6, %v9271_v27 }
0x159d   : > { %v4635_v41 = vsel %vm1084_vm10, %v4634_v7, %v4633_v46  ;;  %v9415_v16 = vadd.f32 %v4903_v21, %v9281_v17  ;;  %v4906_v45 = vrot.slane %v4899_v10, 6  ;;  %v4907_v13 = vrot.slane %v4899_v10, 7 }
0x159e   : > { %v4637_v3 = vsel %vm1087_vm11, %v4636_v38, %v4635_v41  ;;  %v9431_v41 = vld [vmem:[#allocation3 + $0x1f] sm:$0x1]  ;;  %v9436_v57 = vadd.f32 %v4904_v54, %v9285_v49  ;;  %v9439_v10 = vadd.f32 %v4905_v35, %v9288_v24  ;;  %v9458_v54 = vld [vmem:[#allocation3 + $0x2f] sm:$0x1]  ;;  %v5286_v35 = vrot.slane %v9445_v23, 4 }
0x159f   : > { %4638 = vrot.lane.b32.xlu0 %v4637_v3, %s6174_s27  ;;  %v5284_v24 = vrot.slane %v9431_v41, 5 }
0x1611   : > { %v4639_v14 = vpop.permute.xlu0 %4638 }
0x1612   : > { %v4641_v39 = vsel %vm1033_vm12, %v4615_v11, %v4639_v14 }
0x1613   : > { %v4643_v28 = vrot.slane %v4641_v39, 1  ;;  %v4644_v30 = vrot.slane %v4641_v39, 2  ;;  %v4645_v34 = vrot.slane %v4641_v39, 3  ;;  %v4646_v5 = vrot.slane %v4641_v39, 4 }
0x1614   : > { %v4647_v59 = vrot.slane %v4641_v39, 5  ;;  %v4658_v4 = vmin.f32 %v9363_v12, %v4641_v39  ;;  %v4648_v52 = vrot.slane %v4641_v39, 6  ;;  %v4649_v31 = vrot.slane %v4641_v39, 7 }
0x1615   : > { %v4659_v27 = vmin.f32 %v9344_v53, %v4643_v28  ;;  %v4660_v25 = vmin.f32 %v9348_v36, %v4644_v30  ;;  %v4661_v17 = vmin.f32 %v9353_v47, %v4645_v34  ;;  %v4662_v56 = vmin.f32 %v9357_v58, %v4646_v5 }
0x1616   : > { %v4666_v15 = vadd.f32 %v4658_v4, %v8914_v32  ;;  %v4663_v22 = vmin.f32 %v9367_v37, %v4647_v59  ;;  %v4664_v1 = vmin.f32 %v9371_v40, %v4648_v52  ;;  %v4665_v19 = vmin.f32 %v9378_v44, %v4649_v31  ;;  %v9471_v4 = vld [vmem:[#allocation3 + $0x3f] sm:$0x1] }
0x1617   : > { %v4667_v60 = vadd.f32 %v4659_v27, %v8908_v29  ;;  %v4668_v7 = vadd.f32 %v4660_v25, %v8912_v48  ;;  %v4669_v46 = vadd.f32 %v4661_v17, %v8945_v20  ;;  %v4670_v38 = vadd.f32 %v4662_v56, %v8959_v18 }
0x1618   : > { %v4671_v3 = vadd.f32 %v4663_v22, %v8972_v2  ;;  %v4672_v32 = vadd.f32 %v4664_v1, %v8978_v26  ;;  %v4673_v29 = vadd.f32 %v4665_v19, %v8985_v50  ;;  %v9448_v2 = vadd.f32 %v4906_v45, %v9294_v8  ;;  %v9464_v45 = vld [vmem:[#allocation3 + $0x37] sm:$0x1] }
0x1619   : > { %v4925_v48 = vsub.f32 %v4667_v60, %v9409_v55  ;;  %v4926_v20 = vsub.f32 %v4668_v7, %v9412_v9  ;;  %v4927_v18 = vsub.f32 %v4669_v46, %v9415_v16  ;;  %v9451_v26 = vadd.f32 %v4907_v13, %v9299_v62 }
0x161a   : > { %v4928_v49 = vsub.f32 %v4670_v38, %v9436_v57  ;;  %v4924_v50 = vsub.f32 %v4666_v15, %v9406_v0  ;;  %v4929_v61 = vsub.f32 %v4671_v3, %v9439_v10  ;;  %v4930_v11 = vsub.f32 %v4672_v32, %v9448_v2 }
0x161b   : > { %v4940_v6 = vrot.slane %v4925_v48, 7  ;;  %v4942_v21 = vrot.slane %v4926_v20, 6  ;;  %v5283_v8 = vsel %vm1072_vm6, %v5282_v42, %v5281_v51  ;;  %v4931_v62 = vsub.f32 %v4673_v29, %v9451_v26 }
0x161c   : > { %v4944_v39 = vrot.slane %v4927_v18, 5  ;;  %v4946_v28 = vrot.slane %v4928_v49, 4  ;;  %v4948_v34 = vrot.slane %v4929_v61, 3  ;;  %v5285_v5 = vsel %vm1075_vm7, %v5284_v24, %v5283_v8 }
0x161d   : > { %v4941_v14 = vsel %vm1069_vm0, %v4940_v6, %v4924_v50  ;;  %v5288_v59 = vrot.slane %v9458_v54, 3  ;;  %v4950_v42 = vrot.slane %v4930_v11, 2  ;;  %v5287_v52 = vsel %vm1078_vm8, %v5286_v35, %v5285_v5 }
0x161e   : > { %v4943_v13 = vsel %vm1072_vm6, %v4942_v21, %v4941_v14  ;;  %v5290_v31 = vrot.slane %v9464_v45, 2  ;;  %v4952_v25 = vrot.slane %v4931_v62, 1  ;;  %v5292_v22 = vrot.slane %v9471_v4, 1 }
0x161f   : > { %v4945_v30 = vsel %vm1075_vm7, %v4944_v39, %v4943_v13  ;;  %v5289_v15 = vsel %vm1081_vm9, %v5288_v59, %v5287_v52 }
0x1620   : > { %v4947_v51 = vsel %vm1078_vm8, %v4946_v28, %v4945_v30  ;;  %v5291_v1 = vsel %vm1084_vm10, %v5290_v31, %v5289_v15 }
0x1621   : > { %v4949_v27 = vsel %vm1081_vm9, %v4948_v34, %v4947_v51  ;;  %v5293_v19 = vsel %vm1087_vm11, %v5292_v22, %v5291_v1 }
0x1622   : > { %v4951_v17 = vsel %vm1084_vm10, %v4950_v42, %v4949_v27 }
0x1623   : > { %v4953_v56 = vsel %vm1087_vm11, %v4952_v25, %v4951_v17 }
0x1624   : > { %4954 = vrot.lane.b32.xlu0 %v4953_v56, %s6174_s27 }
0x1628   : > { %5294 = vrot.lane.b32.xlu0 %v5293_v19, %s6174_s27 }
0x1696   : > { %v4955_v60 = vpop.permute.xlu0 %4954 }
0x1697   : > { %v4957_v7 = vsel %vm1033_vm12, inf, %v4955_v60 }
0x1698   : > { %v4959_v46 = vrot.slane %v4957_v7, 1  ;;  %v4960_v38 = vrot.slane %v4957_v7, 2  ;;  %v4961_v3 = vrot.slane %v4957_v7, 3  ;;  %v4962_v32 = vrot.slane %v4957_v7, 4 }
0x1699   : > { %v4963_v29 = vrot.slane %v4957_v7, 5  ;;  %v4964_v24 = vrot.slane %v4957_v7, 6  ;;  %v4965_v6 = vrot.slane %v4957_v7, 7  ;;  %v9493_v13 = vmin.f32 %v4924_v50, %v4957_v7 }
0x169a   : > { %v9485_v21 = vmin.f32 %v4925_v48, %v4959_v46  ;;  %v9487_v8 = vmin.f32 %v4926_v20, %v4960_v38  ;;  %v5295_v35 = vpop.permute.xlu0 %5294  ;;  %v9489_v14 = vmin.f32 %v4927_v18, %v4961_v3  ;;  %v9491_v39 = vmin.f32 %v4928_v49, %v4962_v32 }
0x169b   : > { %v5297_v28 = vsel %vm1033_vm12, 0.0, %v5295_v35  ;;  %v9496_v30 = vmin.f32 %v4929_v61, %v4963_v29  ;;  %v9498_v34 = vmin.f32 %v4930_v11, %v4964_v24  ;;  %v9500_v48 = vmin.f32 %v4931_v62, %v4965_v6 }
0x169c   : > { %v5299_v5 = vrot.slane %v5297_v28, 1  ;;  %v5300_v59 = vrot.slane %v5297_v28, 2  ;;  %v5301_v51 = vrot.slane %v5297_v28, 3  ;;  %v5302_v20 = vrot.slane %v5297_v28, 4 }
0x169d   : > { %v9503_v42 = vadd.f32 %v5297_v28, %v9400_v43  ;;  %v4990_v18 = vrot.slane %v9485_v21, 7  ;;  %v4992_v49 = vrot.slane %v9487_v8, 6  ;;  %v4994_v11 = vrot.slane %v9489_v14, 5 }
0x169e   : > { %v9508_v50 = vadd.f32 %v5299_v5, %v9394_v63  ;;  %v9511_v61 = vadd.f32 %v5300_v59, %v9398_v33  ;;  %v4996_v52 = vrot.slane %v9491_v39, 4  ;;  %v4998_v31 = vrot.slane %v9496_v30, 3 }
0x169f   : > { %v4991_v62 = vsel %vm1069_vm0, %v4990_v18, %v9493_v13  ;;  %v5000_v27 = vrot.slane %v9498_v34, 2  ;;  %v5303_v25 = vrot.slane %v5297_v28, 5  ;;  %v5304_v56 = vrot.slane %v5297_v28, 6 }
0x16a0   : > { %v4993_v17 = vsel %vm1072_vm6, %v4992_v49, %v4991_v62  ;;  %v5305_v15 = vrot.slane %v5297_v28, 7  ;;  %v9521_v22 = vadd.f32 %v5301_v51, %v9431_v41  ;;  %v9525_v19 = vadd.f32 %v5302_v20, %v9445_v23 }
0x16a1   : > { %v4995_v1 = vsel %vm1075_vm7, %v4994_v11, %v4993_v17  ;;  %v9528_v60 = vadd.f32 %v5303_v25, %v9458_v54  ;;  %v5330_v7 = vrot.slane %v9508_v50, 7  ;;  %v5002_v38 = vrot.slane %v9500_v48, 1 }
0x16a2   : > { %v4997_v46 = vsel %vm1078_vm8, %v4996_v52, %v4995_v1  ;;  %v9534_v3 = vadd.f32 %v5304_v56, %v9464_v45  ;;  %v5332_v32 = vrot.slane %v9511_v61, 6  ;;  %v9539_v24 = vadd.f32 %v5305_v15, %v9471_v4 }
0x16a3   : > { %v4999_v29 = vsel %vm1081_vm9, %v4998_v31, %v4997_v46  ;;  %v5331_v6 = vsel %vm1069_vm0, %v5330_v7, %v9503_v42  ;;  %v5334_v35 = vrot.slane %v9521_v22, 5  ;;  %v5336_v59 = vrot.slane %v9525_v19, 4 }
0x16a4   : > { %v5001_v28 = vsel %vm1084_vm10, %v5000_v27, %v4999_v29  ;;  %v5333_v5 = vsel %vm1072_vm6, %v5332_v32, %v5331_v6  ;;  %v5338_v18 = vrot.slane %v9528_v60, 3  ;;  %v5340_v11 = vrot.slane %v9534_v3, 2 }
0x16a5   : > { %v5003_v51 = vsel %vm1087_vm11, %v5002_v38, %v5001_v28  ;;  %v5335_v20 = vsel %vm1075_vm7, %v5334_v35, %v5333_v5  ;;  %v5342_v62 = vrot.slane %v9539_v24, 1 }
0x16a6   : > { %5004 = vrot.lane.b32.xlu1 %v5003_v51, %s6175_s6  ;;  %v5337_v49 = vsel %vm1078_vm8, %v5336_v59, %v5335_v20 }
0x16a7   : > { %v5339_v52 = vsel %vm1081_vm9, %v5338_v18, %v5337_v49 }
0x16a8   : > { %v5341_v31 = vsel %vm1084_vm10, %v5340_v11, %v5339_v52 }
0x16a9   : > { %v5343_v27 = vsel %vm1087_vm11, %v5342_v62, %v5341_v31 }
0x16aa   : > { %5344 = vrot.lane.b32.xlu0 %v5343_v27, %s6175_s6 }
0x1718   : > { %v5005_v25 = vpop.permute.xlu1 %5004 }
0x1719   : > { %v5007_v17 = vsel %vm1142_vm13, inf, %v5005_v25 }
0x171a   : > { %v5009_v56 = vrot.slane %v5007_v17, 1  ;;  %v5010_v15 = vrot.slane %v5007_v17, 2  ;;  %v5011_v1 = vrot.slane %v5007_v17, 3  ;;  %v5012_v7 = vrot.slane %v5007_v17, 4 }
0x171b   : > { %v5013_v46 = vrot.slane %v5007_v17, 5  ;;  %v5014_v38 = vrot.slane %v5007_v17, 6  ;;  %v5015_v32 = vrot.slane %v5007_v17, 7  ;;  %v9572_v59 = vmin.f32 %v9493_v13, %v5007_v17 }
0x171c   : > { %v9560_v29 = vmin.f32 %v9485_v21, %v5009_v56  ;;  %v9563_v6 = vmin.f32 %v9487_v8, %v5010_v15  ;;  %v5345_v35 = vpop.permute.xlu0 %5344  ;;  %v9566_v28 = vmin.f32 %v9489_v14, %v5011_v1  ;;  %v9569_v5 = vmin.f32 %v9491_v39, %v5012_v7 }
0x171d   : > { %v5347_v51 = vsel %vm1142_vm13, 0.0, %v5345_v35  ;;  %v9576_v20 = vmin.f32 %v9496_v30, %v5013_v46  ;;  %v9579_v21 = vmin.f32 %v9498_v34, %v5014_v38  ;;  %v9582_v14 = vmin.f32 %v9500_v48, %v5015_v32 }
0x171e   : > { %v5349_v8 = vrot.slane %v5347_v51, 1  ;;  %v5350_v18 = vrot.slane %v5347_v51, 2  ;;  %v5351_v49 = vrot.slane %v5347_v51, 3  ;;  %v5352_v11 = vrot.slane %v5347_v51, 4 }
0x171f   : > { %v9585_v39 = vadd.f32 %v5347_v51, %v9503_v42  ;;  %v5040_v13 = vrot.slane %v9560_v29, 7  ;;  %v5042_v52 = vrot.slane %v9563_v6, 6  ;;  %v5044_v62 = vrot.slane %v9566_v28, 5 }
0x1720   : > { %v9590_v30 = vadd.f32 %v5349_v8, %v9508_v50  ;;  %v9593_v34 = vadd.f32 %v5350_v18, %v9511_v61  ;;  %v5046_v31 = vrot.slane %v9569_v5, 4  ;;  %v5048_v42 = vrot.slane %v9576_v20, 3 }
0x1721   : > { %v5041_v48 = vsel %vm1069_vm0, %v5040_v13, %v9572_v59  ;;  %v5050_v27 = vrot.slane %v9579_v21, 2  ;;  %v5353_v25 = vrot.slane %v5347_v51, 5  ;;  %v5354_v56 = vrot.slane %v5347_v51, 6 }
0x1722   : > { %v5043_v17 = vsel %vm1072_vm6, %v5042_v52, %v5041_v48  ;;  %v5355_v50 = vrot.slane %v5347_v51, 7  ;;  %v9603_v15 = vadd.f32 %v5351_v49, %v9521_v22  ;;  %v9607_v1 = vadd.f32 %v5352_v11, %v9525_v19 }
0x1723   : > { %v5045_v61 = vsel %vm1075_vm7, %v5044_v62, %v5043_v17  ;;  %v9610_v7 = vadd.f32 %v5353_v25, %v9528_v60  ;;  %v5380_v46 = vrot.slane %v9590_v30, 7  ;;  %v5052_v32 = vrot.slane %v9582_v14, 1 }
0x1724   : > { %v5047_v38 = vsel %vm1078_vm8, %v5046_v31, %v5045_v61  ;;  %v9616_v35 = vadd.f32 %v5354_v56, %v9534_v3  ;;  %v5382_v22 = vrot.slane %v9593_v34, 6  ;;  %v9621_v8 = vadd.f32 %v5355_v50, %v9539_v24 }
0x1725   : > { %v5049_v51 = vsel %vm1081_vm9, %v5048_v42, %v5047_v38  ;;  %v5381_v19 = vsel %vm1069_vm0, %v5380_v46, %v9585_v39  ;;  %v5384_v60 = vrot.slane %v9603_v15, 5  ;;  %v5386_v11 = vrot.slane %v9607_v1, 4 }
0x1726   : > { %v5051_v18 = vsel %vm1084_vm10, %v5050_v27, %v5049_v51  ;;  %v5383_v49 = vsel %vm1072_vm6, %v5382_v22, %v5381_v19  ;;  %v5388_v52 = vrot.slane %v9610_v7, 3  ;;  %v5390_v62 = vrot.slane %v9616_v35, 2 }
0x1727   : > { %v5053_v3 = vsel %vm1087_vm11, %v5052_v32, %v5051_v18  ;;  %v5385_v13 = vsel %vm1075_vm7, %v5384_v60, %v5383_v49  ;;  %v5392_v48 = vrot.slane %v9621_v8, 1 }
0x1728   : > { %5054 = vrot.lane.b32.xlu1 %v5053_v3, %s6176_s7  ;;  %v5387_v24 = vsel %vm1078_vm8, %v5386_v11, %v5385_v13 }
0x1729   : > { %v5389_v31 = vsel %vm1081_vm9, %v5388_v52, %v5387_v24 }
0x172a   : > { %v5391_v42 = vsel %vm1084_vm10, %v5390_v62, %v5389_v31 }
0x172b   : > { %v5393_v27 = vsel %vm1087_vm11, %v5392_v48, %v5391_v42 }
0x172c   : > { %5394 = vrot.lane.b32.xlu0 %v5393_v27, %s6176_s7 }
0x179a   : > { %v5055_v25 = vpop.permute.xlu1 %5054 }
0x179b   : > { %v5057_v17 = vsel %vm1193_vm14, inf, %v5055_v25 }
0x179c   : > { %v5059_v56 = vrot.slane %v5057_v17, 1  ;;  %v5060_v50 = vrot.slane %v5057_v17, 2  ;;  %v5061_v61 = vrot.slane %v5057_v17, 3  ;;  %v5062_v46 = vrot.slane %v5057_v17, 4 }
0x179d   : > { %v5063_v38 = vrot.slane %v5057_v17, 5  ;;  %v5064_v32 = vrot.slane %v5057_v17, 6  ;;  %v5065_v22 = vrot.slane %v5057_v17, 7  ;;  %v9654_v11 = vmin.f32 %v9572_v59, %v5057_v17 }
0x179e   : > { %v9642_v51 = vmin.f32 %v9560_v29, %v5059_v56  ;;  %v9645_v19 = vmin.f32 %v9563_v6, %v5060_v50  ;;  %v5395_v60 = vpop.permute.xlu0 %5394  ;;  %v9648_v18 = vmin.f32 %v9566_v28, %v5061_v61  ;;  %v9651_v49 = vmin.f32 %v9569_v5, %v5062_v46 }
0x179f   : > { %v5397_v3 = vsel %vm1193_vm14, 0.0, %v5395_v60  ;;  %v9658_v13 = vmin.f32 %v9576_v20, %v5063_v38  ;;  %v9661_v29 = vmin.f32 %v9579_v21, %v5064_v32  ;;  %v9664_v28 = vmin.f32 %v9582_v14, %v5065_v22 }
0x17a0   : > { %v5399_v6 = vrot.slane %v5397_v3, 1  ;;  %v5400_v52 = vrot.slane %v5397_v3, 2  ;;  %v5401_v24 = vrot.slane %v5397_v3, 3  ;;  %v5402_v62 = vrot.slane %v5397_v3, 4 }
0x17a1   : > { %v9667_v5 = vadd.f32 %v5397_v3, %v9585_v39  ;;  %v5090_v59 = vrot.slane %v9642_v51, 7  ;;  %v5092_v31 = vrot.slane %v9645_v19, 6  ;;  %v5094_v48 = vrot.slane %v9648_v18, 5 }
0x17a2   : > { %v9672_v20 = vadd.f32 %v5399_v6, %v9590_v30  ;;  %v9675_v21 = vadd.f32 %v5400_v52, %v9593_v34  ;;  %v5096_v42 = vrot.slane %v9651_v49, 4  ;;  %v5098_v39 = vrot.slane %v9658_v13, 3 }
0x17a3   : > { %v5091_v14 = vsel %vm1069_vm0, %v5090_v59, %v9654_v11  ;;  %v5100_v27 = vrot.slane %v9661_v29, 2  ;;  %v5403_v25 = vrot.slane %v5397_v3, 5  ;;  %v5404_v56 = vrot.slane %v5397_v3, 6 }
0x17a4   : > { %v5093_v17 = vsel %vm1072_vm6, %v5092_v31, %v5091_v14  ;;  %v5405_v30 = vrot.slane %v5397_v3, 7  ;;  %v9685_v50 = vadd.f32 %v5401_v24, %v9603_v15  ;;  %v9689_v61 = vadd.f32 %v5402_v62, %v9607_v1 }
0x17a5   : > { %v5095_v34 = vsel %vm1075_vm7, %v5094_v48, %v5093_v17  ;;  %v9692_v46 = vadd.f32 %v5403_v25, %v9610_v7  ;;  %v5430_v38 = vrot.slane %v9672_v20, 7  ;;  %v5102_v22 = vrot.slane %v9664_v28, 1 }
0x17a6   : > { %v5097_v32 = vsel %vm1078_vm8, %v5096_v42, %v5095_v34  ;;  %v9698_v60 = vadd.f32 %v5404_v56, %v9616_v35  ;;  %v5432_v15 = vrot.slane %v9675_v21, 6  ;;  %v9703_v6 = vadd.f32 %v5405_v30, %v9621_v8 }
0x17a7   : > { %v5099_v3 = vsel %vm1081_vm9, %v5098_v39, %v5097_v32  ;;  %v5431_v1 = vsel %vm1069_vm0, %v5430_v38, %v9667_v5  ;;  %v5434_v7 = vrot.slane %v9685_v50, 5  ;;  %v5436_v62 = vrot.slane %v9689_v61, 4 }
0x17a8   : > { %v5101_v52 = vsel %vm1084_vm10, %v5100_v27, %v5099_v3  ;;  %v5433_v24 = vsel %vm1072_vm6, %v5432_v15, %v5431_v1  ;;  %v5438_v31 = vrot.slane %v9692_v46, 3  ;;  %v5440_v48 = vrot.slane %v9698_v60, 2 }
0x17a9   : > { %v5103_v35 = vsel %vm1087_vm11, %v5102_v22, %v5101_v52  ;;  %v5435_v59 = vsel %vm1075_vm7, %v5434_v7, %v5433_v24  ;;  %v5442_v14 = vrot.slane %v9703_v6, 1 }
0x17aa   : > { %5104 = vrot.lane.b32.xlu1 %v5103_v35, %s6177_s8  ;;  %v5437_v8 = vsel %vm1078_vm8, %v5436_v62, %v5435_v59 }
0x17ab   : > { %v5439_v42 = vsel %vm1081_vm9, %v5438_v31, %v5437_v8 }
0x17ac   : > { %v5441_v39 = vsel %vm1084_vm10, %v5440_v48, %v5439_v42 }
0x17ad   : > { %v5443_v27 = vsel %vm1087_vm11, %v5442_v14, %v5441_v39 }
0x17ae   : > { %5444 = vrot.lane.b32.xlu0 %v5443_v27, %s6177_s8 }
0x181c   : > { %v5105_v25 = vpop.permute.xlu1 %5104 }
0x181d   : > { %v5107_v17 = vsel %vm1244_vm15, inf, %v5105_v25 }
0x181e   : > { %v5109_v56 = vrot.slane %v5107_v17, 1  ;;  %v5110_v30 = vrot.slane %v5107_v17, 2  ;;  %v5111_v34 = vrot.slane %v5107_v17, 3  ;;  %v5112_v38 = vrot.slane %v5107_v17, 4 }
0x181f   : > { %v5113_v32 = vrot.slane %v5107_v17, 5  ;;  %v5114_v22 = vrot.slane %v5107_v17, 6  ;;  %v5115_v15 = vrot.slane %v5107_v17, 7  ;;  %v9736_v62 = vmin.f32 %v9654_v11, %v5107_v17 }
0x1820   : > { %v9724_v3 = vmin.f32 %v9642_v51, %v5109_v56  ;;  %v9727_v1 = vmin.f32 %v9645_v19, %v5110_v30  ;;  %v5445_v7 = vpop.permute.xlu0 %5444  ;;  %v9730_v52 = vmin.f32 %v9648_v18, %v5111_v34  ;;  %v9733_v24 = vmin.f32 %v9651_v49, %v5112_v38 }
0x1821   : > { %v5447_v35 = vsel %vm1244_vm15, 0.0, %v5445_v7  ;;  %v9740_v59 = vmin.f32 %v9658_v13, %v5113_v32  ;;  %v9743_v51 = vmin.f32 %v9661_v29, %v5114_v22  ;;  %v9746_v18 = vmin.f32 %v9664_v28, %v5115_v15 }
0x1822   : > { %v5449_v19 = vrot.slane %v5447_v35, 1  ;;  %v5450_v31 = vrot.slane %v5447_v35, 2  ;;  %v5451_v8 = vrot.slane %v5447_v35, 3  ;;  %v5452_v48 = vrot.slane %v5447_v35, 4 }
0x1823   : > { %v9749_v49 = vadd.f32 %v5447_v35, %v9667_v5  ;;  %v5140_v11 = vrot.slane %v9724_v3, 7  ;;  %v5142_v42 = vrot.slane %v9727_v1, 6  ;;  %v5144_v14 = vrot.slane %v9730_v52, 5 }
0x1824   : > { %v9754_v13 = vadd.f32 %v5449_v19, %v9672_v20  ;;  %v9757_v29 = vadd.f32 %v5450_v31, %v9675_v21  ;;  %v5146_v39 = vrot.slane %v9733_v24, 4  ;;  %v5148_v5 = vrot.slane %v9740_v59, 3 }
0x1825   : > { %v5141_v28 = vsel %vm1069_vm0, %v5140_v11, %v9736_v62  ;;  %v5150_v27 = vrot.slane %v9743_v51, 2  ;;  %v5453_v25 = vrot.slane %v5447_v35, 5  ;;  %v5454_v56 = vrot.slane %v5447_v35, 6 }
0x1826   : > { %v5143_v17 = vsel %vm1072_vm6, %v5142_v42, %v5141_v28  ;;  %v5455_v20 = vrot.slane %v5447_v35, 7  ;;  %v9767_v30 = vadd.f32 %v5451_v8, %v9685_v50  ;;  %v9771_v34 = vadd.f32 %v5452_v48, %v9689_v61 }
0x1827   : > { %v5145_v21 = vsel %vm1075_vm7, %v5144_v14, %v5143_v17  ;;  %v9774_v38 = vadd.f32 %v5453_v25, %v9692_v46  ;;  %v5480_v32 = vrot.slane %v9754_v13, 7  ;;  %v5152_v15 = vrot.slane %v9746_v18, 1 }
0x1828   : > { %v5147_v22 = vsel %vm1078_vm8, %v5146_v39, %v5145_v21  ;;  %v9780_v7 = vadd.f32 %v5454_v56, %v9698_v60  ;;  %v5482_v50 = vrot.slane %v9757_v29, 6  ;;  %v9785_v19 = vadd.f32 %v5455_v20, %v9703_v6 }
0x1829   : > { %v5149_v35 = vsel %vm1081_vm9, %v5148_v5, %v5147_v22  ;;  %v5481_v61 = vsel %vm1069_vm0, %v5480_v32, %v9749_v49  ;;  %v5484_v46 = vrot.slane %v9767_v30, 5  ;;  %v5486_v60 = vrot.slane %v9771_v34, 4 }
0x182a   : > { %v5151_v31 = vsel %vm1084_vm10, %v5150_v27, %v5149_v35  ;;  %v5483_v8 = vsel %vm1072_vm6, %v5482_v50, %v5481_v61  ;;  %v5488_v42 = vrot.slane %v9774_v38, 3  ;;  %v5490_v14 = vrot.slane %v9780_v7, 2 }
0x182b   : > { %v5153_v48 = vsel %vm1087_vm11, %v5152_v15, %v5151_v31  ;;  %v5485_v11 = vsel %vm1075_vm7, %v5484_v46, %v5483_v8  ;;  %v5492_v28 = vrot.slane %v9785_v19, 1 }
0x182c   : > { %5154 = vrot.lane.b32.xlu1 %v5153_v48, %s6178_s9  ;;  %v5487_v6 = vsel %vm1078_vm8, %v5486_v60, %v5485_v11  ;;  %v5192_v48 = vstv %s5191_s26 }
0x182d   : > { %v5489_v39 = vsel %vm1081_vm9, %v5488_v42, %v5487_v6  ;;  %vm5193_vm2 = vcmp.eq.s32.totalorder %v5192_v48, 1 }
0x182e   : > { %v5491_v5 = vsel %vm1084_vm10, %v5490_v14, %v5489_v39 }
0x182f   : > { %v5493_v27 = vsel %vm1087_vm11, %v5492_v28, %v5491_v5 }
0x1830   : > { %5494 = vrot.lane.b32.xlu0 %v5493_v27, %s6178_s9 }
0x189e   : > { %v5155_v25 = vpop.permute.xlu1 %5154 }
0x189f   : > { %v5157_v17 = vsel %vm1295_vm1, inf, %v5155_v25 }
0x18a0   : > { %v5159_v56 = vrot.slane %v5157_v17, 1  ;;  %v5160_v20 = vrot.slane %v5157_v17, 2  ;;  %v5161_v21 = vrot.slane %v5157_v17, 3  ;;  %v5162_v32 = vrot.slane %v5157_v17, 4 }
0x18a1   : > { %v5163_v22 = vrot.slane %v5157_v17, 5  ;;  %v5164_v15 = vrot.slane %v5157_v17, 6  ;;  %v5165_v50 = vrot.slane %v5157_v17, 7  ;;  %v5174_v8 = vmin.f32 %v9736_v62, %v5157_v17 }
0x18a2   : > { %v5175_v35 = vmin.f32 %v9724_v3, %v5159_v56  ;;  %v5176_v61 = vmin.f32 %v9727_v1, %v5160_v20  ;;  %v5177_v46 = vmin.f32 %v9730_v52, %v5161_v21  ;;  %v5178_v31 = vmin.f32 %v9733_v24, %v5162_v32  ;;  %v5495_v25 = vpop.permute.xlu0 %5494 }
0x18a3   : > { %v5179_v60 = vmin.f32 %v9740_v59, %v5163_v22  ;;  %v5180_v6 = vmin.f32 %v9743_v51, %v5164_v15  ;;  %v5181_v3 = vmin.f32 %v9746_v18, %v5165_v50  ;;  %v5182_v52 = vadd.f32 %v5174_v8, %v9406_v0 }
0x18a4   : > { %v5183_v11 = vadd.f32 %v5175_v35, %v9409_v55  ;;  %v5184_v42 = vadd.f32 %v5176_v61, %v9412_v9  ;;  %v5185_v14 = vadd.f32 %v5177_v46, %v9415_v16  ;;  %v5186_v1 = vadd.f32 %v5178_v31, %v9436_v57 }
0x18a5   : > { %v5187_v24 = vadd.f32 %v5179_v60, %v9439_v10  ;;  %v5188_v62 = vadd.f32 %v5180_v6, %v9448_v2  ;;  %v5189_v16 = vadd.f32 %v5181_v3, %v9451_v26  ;;  %v5497_v17 = vsel %vm1295_vm1, 0.0, %v5495_v25 }
0x18a6   : > { %v9830_v55 = vsel %vm5193_vm2, %v5183_v11, %v9344_v53  ;;  %v9834_v9 = vsel %vm5193_vm2, %v5184_v42, %v9348_v36  ;;  %v9839_v57 = vsel %vm5193_vm2, %v5185_v14, %v9353_v47  ;;  %v9843_v0 = vsel %vm5193_vm2, %v5186_v1, %v9357_v58 }
0x18a7   : > { %v5222_v10 = vrot.slane %v9830_v55, 7  ;;  %v5224_v2 = vrot.slane %v9834_v9, 6  ;;  %v9849_v53 = vsel %vm5193_vm2, %v5182_v52, %v9363_v12  ;;  %v9853_v36 = vsel %vm5193_vm2, %v5187_v24, %v9367_v37 }
0x18a8   : > { %v9857_v47 = vsel %vm5193_vm2, %v5188_v62, %v9371_v40  ;;  %v5226_v26 = vrot.slane %v9839_v57, 5  ;;  %v9864_v59 = vsel %vm5193_vm2, %v5189_v16, %v9378_v44  ;;  %v5228_v37 = vrot.slane %v9843_v0, 4 }
0x18a9   : > { %v5223_v58 = vsel %vm1069_vm0, %v5222_v10, %v9849_v53  ;;  %v5230_v18 = vrot.slane %v9853_v36, 3  ;;  %v5232_v39 = vrot.slane %v9857_v47, 2  ;;  %v5234_v5 = vrot.slane %v9864_v59, 1 }
0x18aa   : > { %v5225_v12 = vsel %vm1072_vm6, %v5224_v2, %v5223_v58  ;;  %v5499_v56 = vrot.slane %v5497_v17, 1  ;;  %v5500_v20 = vrot.slane %v5497_v17, 2  ;;  %v5501_v21 = vrot.slane %v5497_v17, 3 }
0x18ab   : > { %v5227_v51 = vsel %vm1075_vm7, %v5226_v26, %v5225_v12  ;;  %v5213_v32 = vstv %s5212_s29  ;;  %v5502_v22 = vrot.slane %v5497_v17, 4  ;;  %v5503_v15 = vrot.slane %v5497_v17, 5 }
0x18ac   : > { %v5229_v40 = vsel %vm1078_vm8, %v5228_v37, %v5227_v51  ;;  %v9882_v50 = vadd.f32 %v5497_v17, %v9749_v49  ;;  %v9885_v35 = vadd.f32 %v5499_v56, %v9754_v13  ;;  %v9888_v61 = vadd.f32 %v5500_v20, %v9757_v29 }
0x18ad   : > { %v5231_v28 = vsel %vm1081_vm9, %v5230_v18, %v5229_v40  ;;  %v9891_v31 = vadd.f32 %v5501_v21, %v9767_v30  ;;  %v5504_v60 = vrot.slane %v5497_v17, 6  ;;  %v5505_v48 = vrot.slane %v5497_v17, 7 }
0x18ae   : > { %v5233_v27 = vsel %vm1084_vm10, %v5232_v39, %v5231_v28  ;;  %v9913_v40 = vadd.f32 %v5503_v15, %v9774_v38 }
0x18af   : > { %v5235_v44 = vsel %vm1087_vm11, %v5234_v5, %v5233_v27 }
0x18b0   : > { %5236 = vrot.lane.b32.xlu1 %v5235_v44, %s6174_s27 }
0x1922   : > { %v5237_v46 = vpop.permute.xlu1 %5236 }
0x1923   : > { %v5239_v8 = vsel %vm1033_vm12, %v5213_v32, %v5237_v46 }
0x1924   : > { %v5241_v11 = vrot.slane %v5239_v8, 1  ;;  %v5242_v42 = vrot.slane %v5239_v8, 2  ;;  %v5243_v6 = vrot.slane %v5239_v8, 3  ;;  %v5244_v14 = vrot.slane %v5239_v8, 4 }
0x1925   : > { %v5245_v49 = vrot.slane %v5239_v8, 5  ;;  %v5256_v3 = vmin.f32 %v9849_v53, %v5239_v8  ;;  %v5246_v13 = vrot.slane %v5239_v8, 6  ;;  %v5247_v1 = vrot.slane %v5239_v8, 7 }
0x1926   : > { %v5257_v29 = vmin.f32 %v9830_v55, %v5241_v11  ;;  %v5258_v52 = vmin.f32 %v9834_v9, %v5242_v42  ;;  %v5259_v30 = vmin.f32 %v9839_v57, %v5243_v6  ;;  %v5260_v24 = vmin.f32 %v9843_v0, %v5244_v14 }
0x1927   : > { %v5264_v62 = vadd.f32 %v5256_v3, %v9400_v43  ;;  %v5261_v16 = vmin.f32 %v9853_v36, %v5245_v49  ;;  %v5262_v10 = vmin.f32 %v9857_v47, %v5246_v13  ;;  %v5263_v2 = vmin.f32 %v9864_v59, %v5247_v1 }
0x1928   : > { %v5265_v58 = vadd.f32 %v5257_v29, %v9394_v63  ;;  %v5266_v26 = vadd.f32 %v5258_v52, %v9398_v33  ;;  %v5267_v12 = vadd.f32 %v5259_v30, %v9431_v41  ;;  %v5268_v37 = vadd.f32 %v5260_v24, %v9445_v23 }
0x1929   : > { %v5269_v51 = vadd.f32 %v5261_v16, %v9458_v54  ;;  %v5270_v18 = vadd.f32 %v5262_v10, %v9464_v45  ;;  %v9910_v43 = vadd.f32 %v5502_v22, %v9771_v34  ;;  %v5271_v39 = vadd.f32 %v5263_v2, %v9471_v4 }
0x192a   : > { %v5523_v63 = vsub.f32 %v5265_v58, %v9885_v35  ;;  %v5524_v33 = vsub.f32 %v5266_v26, %v9888_v61  ;;  %v5525_v41 = vsub.f32 %v5267_v12, %v9891_v31  ;;  %v9920_v23 = vadd.f32 %v5504_v60, %v9780_v7 }
0x192b   : > { %v9923_v54 = vadd.f32 %v5505_v48, %v9785_v19  ;;  %v5526_v45 = vsub.f32 %v5268_v37, %v9910_v43  ;;  %v5522_v34 = vsub.f32 %v5264_v62, %v9882_v50  ;;  %v5527_v38 = vsub.f32 %v5269_v51, %v9913_v40 }
0x192c   : > { %v5538_v28 = vrot.slane %v5523_v63, 7  ;;  %v5540_v4 = vrot.slane %v5524_v33, 6  ;;  %v5528_v5 = vsub.f32 %v5270_v18, %v9920_v23  ;;  %v5542_v25 = vrot.slane %v5525_v41, 5 }
0x192d   : > { %v5529_v27 = vsub.f32 %v5271_v39, %v9923_v54  ;;  %v5544_v17 = vrot.slane %v5526_v45, 4  ;;  %v5546_v56 = vrot.slane %v5527_v38, 3 }
0x192e   : > { %v5539_v44 = vsel %vm1069_vm0, %v5538_v28, %v5522_v34  ;;  %v5548_v21 = vrot.slane %v5528_v5, 2 }
0x192f   : > { %v5541_v7 = vsel %vm1072_vm6, %v5540_v4, %v5539_v44  ;;  %v5550_v22 = vrot.slane %v5529_v27, 1 }
0x1930   : > { %v5543_v19 = vsel %vm1075_vm7, %v5542_v25, %v5541_v7 }
0x1931   : > { %v5545_v20 = vsel %vm1078_vm8, %v5544_v17, %v5543_v19 }
0x1932   : > { %v5547_v32 = vsel %vm1081_vm9, %v5546_v56, %v5545_v20 }
0x1933   : > { %v5549_v15 = vsel %vm1084_vm10, %v5548_v21, %v5547_v32 }
0x1934   : > { %v5551_v46 = vsel %vm1087_vm11, %v5550_v22, %v5549_v15 }
0x1935   : > { %5552 = vrot.lane.b32.xlu1 %v5551_v46, %s6174_s27  ;;  %s5789_s27 = scalar_select %p5788_p11, 1, 0 }
0x19a7   : > { %v5553_v8 = vpop.permute.xlu1 %5552 }
0x19a8   : > { %v5555_v60 = vsel %vm1033_vm12, inf, %v5553_v8 }
0x19a9   : > { %v5557_v48 = vrot.slane %v5555_v60, 1  ;;  %v5558_v11 = vrot.slane %v5555_v60, 2  ;;  %v5559_v42 = vrot.slane %v5555_v60, 3  ;;  %v5560_v6 = vrot.slane %v5555_v60, 4 }
0x19aa   : > { %v5561_v14 = vrot.slane %v5555_v60, 5  ;;  %v5562_v49 = vrot.slane %v5555_v60, 6  ;;  %v5563_v1 = vrot.slane %v5555_v60, 7  ;;  %v5572_v30 = vmin.f32 %v5522_v34, %v5555_v60 }
0x19ab   : > { %v5573_v3 = vmin.f32 %v5523_v63, %v5557_v48  ;;  %v5574_v13 = vmin.f32 %v5524_v33, %v5558_v11  ;;  %v5575_v29 = vmin.f32 %v5525_v41, %v5559_v42  ;;  %v5576_v52 = vmin.f32 %v5526_v45, %v5560_v6 }
0x19ac   : > { %v5577_v24 = vmin.f32 %v5527_v38, %v5561_v14  ;;  %v5578_v10 = vmin.f32 %v5528_v5, %v5562_v49  ;;  %v5579_v2 = vmin.f32 %v5529_v27, %v5563_v1 }
0x19ad   : > { %v5588_v62 = vrot.slane %v5573_v3, 7  ;;  %v5590_v16 = vrot.slane %v5574_v13, 6  ;;  %v5592_v26 = vrot.slane %v5575_v29, 5  ;;  %v5594_v37 = vrot.slane %v5576_v52, 4 }
0x19ae   : > { %v5596_v18 = vrot.slane %v5577_v24, 3  ;;  %v5598_v63 = vrot.slane %v5578_v10, 2  ;;  %v5600_v41 = vrot.slane %v5579_v2, 1 }
0x19af   : > { %v5589_v58 = vsel %vm1069_vm0, %v5588_v62, %v5572_v30 }
0x19b0   : > { %v5591_v12 = vsel %vm1072_vm6, %v5590_v16, %v5589_v58 }
0x19b1   : > { %v5593_v51 = vsel %vm1075_vm7, %v5592_v26, %v5591_v12 }
0x19b2   : > { %v5595_v39 = vsel %vm1078_vm8, %v5594_v37, %v5593_v51 }
0x19b3   : > { %v5597_v33 = vsel %vm1081_vm9, %v5596_v18, %v5595_v39 }
0x19b4   : > { %v5599_v45 = vsel %vm1084_vm10, %v5598_v63, %v5597_v33 }
0x19b5   : > { %v5601_v34 = vsel %vm1087_vm11, %v5600_v41, %v5599_v45 }
0x19b6   : > { %5602 = vrot.lane.b32.xlu0 %v5601_v34, %s6175_s6  ;;  %s6179_s6 = smov (!%p5958_p12), 112  }
0x1a28   : > { %v5603_v38 = vpop.permute.xlu0 %5602 }
0x1a29   : > { %v5605_v28 = vsel %vm1142_vm13, inf, %v5603_v38 }
0x1a2a   : > { %v5607_v4 = vrot.slane %v5605_v28, 1  ;;  %v5608_v5 = vrot.slane %v5605_v28, 2  ;;  %v5609_v27 = vrot.slane %v5605_v28, 3  ;;  %v5610_v44 = vrot.slane %v5605_v28, 4 }
0x1a2b   : > { %v5611_v25 = vrot.slane %v5605_v28, 5  ;;  %v5612_v7 = vrot.slane %v5605_v28, 6  ;;  %v5613_v56 = vrot.slane %v5605_v28, 7  ;;  %v5622_v32 = vmin.f32 %v5572_v30, %v5605_v28 }
0x1a2c   : > { %v5623_v17 = vmin.f32 %v5573_v3, %v5607_v4  ;;  %v5624_v19 = vmin.f32 %v5574_v13, %v5608_v5  ;;  %v5625_v20 = vmin.f32 %v5575_v29, %v5609_v27  ;;  %v5626_v21 = vmin.f32 %v5576_v52, %v5610_v44 }
0x1a2d   : > { %v5627_v22 = vmin.f32 %v5577_v24, %v5611_v25  ;;  %v5628_v8 = vmin.f32 %v5578_v10, %v5612_v7  ;;  %v5629_v60 = vmin.f32 %v5579_v2, %v5613_v56 }
0x1a2e   : > { %v5638_v15 = vrot.slane %v5623_v17, 7  ;;  %v5640_v46 = vrot.slane %v5624_v19, 6  ;;  %v5642_v11 = vrot.slane %v5625_v20, 5  ;;  %v5644_v6 = vrot.slane %v5626_v21, 4 }
0x1a2f   : > { %v5646_v49 = vrot.slane %v5627_v22, 3  ;;  %v5648_v13 = vrot.slane %v5628_v8, 2  ;;  %v5650_v29 = vrot.slane %v5629_v60, 1 }
0x1a30   : > { %v5639_v48 = vsel %vm1069_vm0, %v5638_v15, %v5622_v32 }
0x1a31   : > { %v5641_v42 = vsel %vm1072_vm6, %v5640_v46, %v5639_v48 }
0x1a32   : > { %v5643_v14 = vsel %vm1075_vm7, %v5642_v11, %v5641_v42 }
0x1a33   : > { %v5645_v3 = vsel %vm1078_vm8, %v5644_v6, %v5643_v14 }
0x1a34   : > { %v5647_v1 = vsel %vm1081_vm9, %v5646_v49, %v5645_v3 }
0x1a35   : > { %v5649_v52 = vsel %vm1084_vm10, %v5648_v13, %v5647_v1 }
0x1a36   : > { %v5651_v30 = vsel %vm1087_vm11, %v5650_v29, %v5649_v52 }
0x1a37   : > { %5652 = vrot.lane.b32.xlu1 %v5651_v30, %s6176_s7 }
0x1aa9   : > { %v5653_v24 = vpop.permute.xlu1 %5652 }
0x1aaa   : > { %v5655_v62 = vsel %vm1193_vm14, inf, %v5653_v24 }
0x1aab   : > { %v5657_v16 = vrot.slane %v5655_v62, 1  ;;  %v5658_v10 = vrot.slane %v5655_v62, 2  ;;  %v5659_v2 = vrot.slane %v5655_v62, 3  ;;  %v5660_v58 = vrot.slane %v5655_v62, 4 }
0x1aac   : > { %v5661_v26 = vrot.slane %v5655_v62, 5  ;;  %v5662_v12 = vrot.slane %v5655_v62, 6  ;;  %v5663_v18 = vrot.slane %v5655_v62, 7  ;;  %v5672_v33 = vmin.f32 %v5622_v32, %v5655_v62 }
0x1aad   : > { %v5673_v37 = vmin.f32 %v5623_v17, %v5657_v16  ;;  %v5674_v51 = vmin.f32 %v5624_v19, %v5658_v10  ;;  %v5675_v39 = vmin.f32 %v5625_v20, %v5659_v2  ;;  %v5676_v63 = vmin.f32 %v5626_v21, %v5660_v58 }
0x1aae   : > { %v5677_v41 = vmin.f32 %v5627_v22, %v5661_v26  ;;  %v5678_v38 = vmin.f32 %v5628_v8, %v5662_v12  ;;  %v5679_v28 = vmin.f32 %v5629_v60, %v5663_v18 }
0x1aaf   : > { %v5688_v45 = vrot.slane %v5673_v37, 7  ;;  %v5690_v34 = vrot.slane %v5674_v51, 6  ;;  %v5692_v5 = vrot.slane %v5675_v39, 5  ;;  %v5694_v44 = vrot.slane %v5676_v63, 4 }
0x1ab0   : > { %v5696_v7 = vrot.slane %v5677_v41, 3  ;;  %v5698_v19 = vrot.slane %v5678_v38, 2  ;;  %v5700_v20 = vrot.slane %v5679_v28, 1 }
0x1ab1   : > { %v5689_v4 = vsel %vm1069_vm0, %v5688_v45, %v5672_v33  ;;  %v5790_v45 = vstv %s5789_s27 }
0x1ab2   : > { %v5691_v27 = vsel %vm1072_vm6, %v5690_v34, %v5689_v4  ;;  %vm5791_vm13 = vcmp.eq.s32.totalorder %v5790_v45, 1 }
0x1ab3   : > { %v5693_v25 = vsel %vm1075_vm7, %v5692_v5, %v5691_v27 }
0x1ab4   : > { %v5695_v17 = vsel %vm1078_vm8, %v5694_v44, %v5693_v25 }
0x1ab5   : > { %v5697_v56 = vsel %vm1081_vm9, %v5696_v7, %v5695_v17 }
0x1ab6   : > { %v5699_v21 = vsel %vm1084_vm10, %v5698_v19, %v5697_v56 }
0x1ab7   : > { %v5701_v32 = vsel %vm1087_vm11, %v5700_v20, %v5699_v21 }
0x1ab8   : > { %5702 = vrot.lane.b32.xlu0 %v5701_v32, %s6177_s8 }
0x1b2a   : > { %v5703_v22 = vpop.permute.xlu0 %5702 }
0x1b2b   : > { %v5705_v15 = vsel %vm1244_vm15, inf, %v5703_v22 }
0x1b2c   : > { %v5707_v46 = vrot.slane %v5705_v15, 1  ;;  %v5708_v8 = vrot.slane %v5705_v15, 2  ;;  %v5709_v60 = vrot.slane %v5705_v15, 3  ;;  %v5710_v48 = vrot.slane %v5705_v15, 4 }
0x1b2d   : > { %v5711_v11 = vrot.slane %v5705_v15, 5  ;;  %v5712_v42 = vrot.slane %v5705_v15, 6  ;;  %v5713_v49 = vrot.slane %v5705_v15, 7  ;;  %v5722_v1 = vmin.f32 %v5672_v33, %v5705_v15 }
0x1b2e   : > { %v5723_v6 = vmin.f32 %v5673_v37, %v5707_v46  ;;  %v5724_v14 = vmin.f32 %v5674_v51, %v5708_v8  ;;  %v5725_v3 = vmin.f32 %v5675_v39, %v5709_v60  ;;  %v5726_v13 = vmin.f32 %v5676_v63, %v5710_v48 }
0x1b2f   : > { %v5727_v29 = vmin.f32 %v5677_v41, %v5711_v11  ;;  %v5728_v24 = vmin.f32 %v5678_v38, %v5712_v42  ;;  %v5729_v62 = vmin.f32 %v5679_v28, %v5713_v49 }
0x1b30   : > { %v5738_v52 = vrot.slane %v5723_v6, 7  ;;  %v5740_v30 = vrot.slane %v5724_v14, 6  ;;  %v5742_v10 = vrot.slane %v5725_v3, 5  ;;  %v5744_v58 = vrot.slane %v5726_v13, 4 }
0x1b31   : > { %v5746_v12 = vrot.slane %v5727_v29, 3  ;;  %v5748_v51 = vrot.slane %v5728_v24, 2  ;;  %v5750_v39 = vrot.slane %v5729_v62, 1 }
0x1b32   : > { %v5739_v16 = vsel %vm1069_vm0, %v5738_v52, %v5722_v1 }
0x1b33   : > { %v5741_v2 = vsel %vm1072_vm6, %v5740_v30, %v5739_v16 }
0x1b34   : > { %v5743_v26 = vsel %vm1075_vm7, %v5742_v10, %v5741_v2 }
0x1b35   : > { %v5745_v37 = vsel %vm1078_vm8, %v5744_v58, %v5743_v26 }
0x1b36   : > { %v5747_v18 = vsel %vm1081_vm9, %v5746_v12, %v5745_v37 }
0x1b37   : > { %v5749_v63 = vsel %vm1084_vm10, %v5748_v51, %v5747_v18 }
0x1b38   : > { %v5751_v33 = vsel %vm1087_vm11, %v5750_v39, %v5749_v63 }
0x1b39   : > { %5752 = vrot.lane.b32.xlu1 %v5751_v33, %s6178_s9 }
0x1bab   : > { %v5753_v41 = vpop.permute.xlu1 %5752 }
0x1bac   : > { %v5755_v34 = vsel %vm1295_vm1, inf, %v5753_v41 }
0x1bad   : > { %v5757_v38 = vrot.slane %v5755_v34, 1  ;;  %v5758_v28 = vrot.slane %v5755_v34, 2  ;;  %v5759_v4 = vrot.slane %v5755_v34, 3  ;;  %v5760_v5 = vrot.slane %v5755_v34, 4 }
0x1bae   : > { %v5761_v27 = vrot.slane %v5755_v34, 5  ;;  %v5762_v44 = vrot.slane %v5755_v34, 6  ;;  %v5763_v25 = vrot.slane %v5755_v34, 7  ;;  %v5772_v7 = vmin.f32 %v5722_v1, %v5755_v34 }
0x1baf   : > { %v5773_v17 = vmin.f32 %v5723_v6, %v5757_v38  ;;  %v5774_v19 = vmin.f32 %v5724_v14, %v5758_v28  ;;  %v5775_v56 = vmin.f32 %v5725_v3, %v5759_v4  ;;  %v5776_v20 = vmin.f32 %v5726_v13, %v5760_v5 }
0x1bb0   : > { %v5777_v21 = vmin.f32 %v5727_v29, %v5761_v27  ;;  %v5778_v32 = vmin.f32 %v5728_v24, %v5762_v44  ;;  %v5779_v22 = vmin.f32 %v5729_v62, %v5763_v25  ;;  %v5780_v15 = vadd.f32 %v5772_v7, %v9882_v50 }
0x1bb1   : > { %v5781_v46 = vadd.f32 %v5773_v17, %v9885_v35  ;;  %v5782_v8 = vadd.f32 %v5774_v19, %v9888_v61  ;;  %v5783_v60 = vadd.f32 %v5775_v56, %v9891_v31  ;;  %v5784_v48 = vadd.f32 %v5776_v20, %v9910_v43 }
0x1bb2   : > { %v5785_v11 = vadd.f32 %v5777_v21, %v9913_v40  ;;  %v5786_v42 = vadd.f32 %v5778_v32, %v9920_v23  ;;  %v5787_v6 = vadd.f32 %v5779_v22, %v9923_v54  ;;  %v5792_v31 = vsel %vm5791_vm13, %v5780_v15, %v9849_v53 }
0x1bb3   : > { %v5793_v14 = vsel %vm5791_vm13, %v5781_v46, %v9830_v55  ;;  %v5794_v49 = vsel %vm5791_vm13, %v5782_v8, %v9834_v9  ;;  %v5795_v50 = vsel %vm5791_vm13, %v5783_v60, %v9839_v57  ;;  %v5796_v35 = vsel %vm5791_vm13, %v5784_v48, %v9843_v0 }
0x1bb4   : > { %v5808_v61 = vrot.slane %v5793_v14, 7  ;;  %v5797_v43 = vsel %vm5791_vm13, %v5785_v11, %v9853_v36  ;;  %v5810_v3 = vrot.slane %v5794_v49, 6  ;;  %v5798_v40 = vsel %vm5791_vm13, %v5786_v42, %v9857_v47 }
0x1bb5   : > { %v5812_v13 = vrot.slane %v5795_v50, 5  ;;  %v5799_v54 = vsel %vm5791_vm13, %v5787_v6, %v9864_v59  ;;  %v5814_v9 = vrot.slane %v5796_v35, 4  ;;  %v5816_v1 = vrot.slane %v5797_v43, 3 }
0x1bb6   : > { %v5809_v23 = vsel %vm1069_vm0, %v5808_v61, %v5792_v31  ;;  %v5818_v29 = vrot.slane %v5798_v40, 2  ;;  %v5820_v36 = vrot.slane %v5799_v54, 1 }
0x1bb7   : > { %v5811_v55 = vsel %vm1072_vm6, %v5810_v3, %v5809_v23 }
0x1bb8   : > { %v5813_v57 = vsel %vm1075_vm7, %v5812_v13, %v5811_v55 }
0x1bb9   : > { %v5815_v0 = vsel %vm1078_vm8, %v5814_v9, %v5813_v57  ;;  %5827 = sbr.rel (%p5958_p12) target bundleno = 7225 (0x1c39), region = 74 }
0x1bba   : > { %v5817_v53 = vsel %vm1081_vm9, %v5816_v1, %v5815_v0 }
0x1bbb   : > { %v5819_v52 = vsel %vm1084_vm10, %v5818_v29, %v5817_v53 }
0x1bbc   : > { %v5821_v47 = vsel %vm1087_vm11, %v5820_v36, %v5819_v52 }
0x1bbd   : > { %5823 = vst.msk [vmem:[#allocation2] sm:$0xff] %vm1007_vm4, %v5821_v47 }
0x1bc4   : > { %v5828_v59 = vld [vmem:[#allocation2] sm:$0xff] }
0x1bc5   : > { %5830 = vrot.lane.b32.xlu0 %v5828_v59, %s6179_s6 }
0x1c37   : > { %v5831_v30 = vpop.permute.xlu0 %5830 }
0x1c38   : > { %5833 = vst.msk [vmem:[%s10023_s2] sm:$0xff] %vm1033_vm12, %v5831_v30 }
0x1c39 PF: > { %s12_s13 = sadd.s32 1, %s6169_s13   ;;  %s10032_s9 = smov %s6157_s10 }
0x1c3a   : > { %p9_p13 = scmp.ge.s32.totalorder %s12_s13, 5   ;;  %s10033_s10 = smov %s6230_s17 }
0x1c3b   : > { %s10034_s11 = smov %s6165_s12  ;;  %s10035_s12 = smov %s10037_s14 }
0x1c3c   :  { %11 = sbr.rel (!%p9_p13) target bundleno = 3 (0x3), region = 112 }

</bundles_post_ra>
